<compile_context>
chip_gen: v7x
topology: tpu7x:2x2x1
jax: 0.10.0
libtpu: 0.0.40
codegen_flags: <defaults>
</compile_context>

<pallas_src>
import math
from functools import partial

import jax
import jax.numpy as jnp
from jax.experimental import pallas as pl
from jax.experimental.pallas import tpu as pltpu


def _make_kernel(num_heads, qk_length, value_length):
    H, dk, dv = num_heads, qk_length, value_length
    NEG = -1e9

    def layer_norm2d(v, gamma, beta, eps=1e-5):
        mean = jnp.mean(v, axis=-1, keepdims=True)
        var = jnp.mean((v - mean) ** 2, axis=-1, keepdims=True)
        return (v - mean) * jax.lax.rsqrt(var + eps) * gamma + beta

    def kernel(x_ref, enc_ref, mask_ref,
               wqkv1_ref, bqkv1_ref, wo1_ref,
               wq2_ref, bq2_ref, wkv2_ref, bkv2_ref, wo2_ref,
               fw1_ref, fb1_ref, fw2_ref, vecs_ref,
               out_ref, o_scr):
        BB, T, C = x_ref.shape
        S = enc_ref.shape[1]

        # Fold the batch block into the matmul M dimension (layout-free reshape:
        # last dim unchanged; T/S multiples of 8 are enforced by the wrapper).
        x2 = x_ref[...].reshape(BB * T, C)
        enc2 = enc_ref[...].reshape(BB * S, C)

        # Additive mask bias, computed ONCE (shared over heads and batch block).
        mask_bias = jnp.where(mask_ref[...] > 0.0, 0.0, NEG).astype(jnp.float32)

        vecs = vecs_ref[...]      # rows: [bo1, g1, be1, bo2, g2, be2, fb2, g3, be3]
        bo1, g1, be1 = vecs[0:1, :], vecs[1:2, :], vecs[2:3, :]
        bo2, g2, be2 = vecs[3:4, :], vecs[4:5, :], vecs[5:6, :]
        fb2, g3, be3 = vecs[6:7, :], vecs[7:8, :], vecs[8:9, :]

        def attn_core(Q, K, V, wo, bo, bias, tq, tk):
            # Static unrolled loops over the (small) batch block and heads; each
            # head output lands in the VMEM scratch at a static offset so the
            # output projection is a single large matmul (no concatenate).
            for bb in range(BB):
                q0, k0 = bb * tq, bb * tk
                for h in range(H):
                    Qh = Q[q0:q0 + tq, h * dk:(h + 1) * dk]
                    Kh = K[k0:k0 + tk, h * dk:(h + 1) * dk]
                    Vh = V[k0:k0 + tk, h * dv:(h + 1) * dv]
                    # 1/sqrt(dk) is folded into W_q wrapper-side.
                    s = jnp.dot(Qh, Kh.T, preferred_element_type=jnp.float32)
                    if bias is not None:
                        s = s + bias
                    s = s - jnp.max(s, axis=-1, keepdims=True)
                    p = jnp.exp(s)
                    p = p * pl.reciprocal(jnp.sum(p, axis=-1, keepdims=True),
                                          approx=True)
                    o_scr[q0:q0 + tq, h * dv:(h + 1) * dv] = jnp.dot(
                        p, Vh, preferred_element_type=jnp.float32)
            return jnp.dot(o_scr[...], wo,
                           preferred_element_type=jnp.float32) + bo

        # 1) masked self-attention + residual(LayerNorm)
        qkv = jnp.dot(x2, wqkv1_ref[...],
                      preferred_element_type=jnp.float32) + bqkv1_ref[...]
        Q1 = qkv[:, :H * dk]
        K1 = qkv[:, H * dk:2 * H * dk]
        V1 = qkv[:, 2 * H * dk:]
        out1 = attn_core(Q1, K1, V1, wo1_ref[...], bo1, mask_bias, T, T)
        out2 = x2 + layer_norm2d(out1, g1, be1)

        # 2) cross-attention with the encoder output + residual(LayerNorm)
        Q2 = jnp.dot(out2, wq2_ref[...],
                     preferred_element_type=jnp.float32) + bq2_ref[...]
        kv = jnp.dot(enc2, wkv2_ref[...],
                     preferred_element_type=jnp.float32) + bkv2_ref[...]
        K2 = kv[:, :H * dk]
        V2 = kv[:, H * dk:]
        out3 = attn_core(Q2, K2, V2, wo2_ref[...], bo2, None, T, S)
        out4 = out2 + layer_norm2d(out3, g2, be2)

        # 3) FFN (Linear -> ReLU -> Linear) + residual(LayerNorm)
        hdn = jnp.dot(out4, fw1_ref[...],
                      preferred_element_type=jnp.float32) + fb1_ref[...]
        hdn = jnp.maximum(hdn, 0.0)
        out5 = jnp.dot(hdn, fw2_ref[...],
                       preferred_element_type=jnp.float32) + fb2
        # TODO(synk): nn.Dropout(p=0.1) is identity in eval/inference mode; not applied.
        out7 = out4 + layer_norm2d(out5, g3, be3)

        out_ref[...] = out7.reshape(BB, T, C).astype(out_ref.dtype)

    return kernel


def _pack_params(params, num_heads, qk_length, value_length):
    """Pack the 26 raw parameters into 12 slabs; fold 1/sqrt(dk) into W_q/b_q."""
    (wq1, bq1, wk1, bk1, wv1, bv1, wo1, bo1, g1, be1,
     wq2, bq2, wk2, bk2, wv2, bv2, wo2, bo2, g2, be2,
     fw1, fb1, fw2, fb2, g3, be3) = params
    scale = 1.0 / math.sqrt(qk_length)

    # Self-attention: fully fused QKV projection slab.
    wqkv1 = jnp.concatenate([wq1 * scale, wk1, wv1], axis=1)   # (C, 2*H*dk + H*dv)
    bqkv1 = jnp.concatenate([bq1 * scale, bk1, bv1], axis=1)   # (1, 2*H*dk + H*dv)

    # Cross-attention: Q from the decoder stream, fused KV from the encoder.
    wq2s, bq2s = wq2 * scale, bq2 * scale                      # (C, H*dk), (1, H*dk)
    wkv2 = jnp.concatenate([wk2, wv2], axis=1)                 # (C, H*dk + H*dv)
    bkv2 = jnp.concatenate([bk2, bv2], axis=1)                 # (1, H*dk + H*dv)

    # All per-channel vectors in one slab (rows sliced statically in-kernel).
    vecs = jnp.concatenate([bo1, g1, be1, bo2, g2, be2, fb2, g3, be3],
                           axis=0)                             # (9, C)

    return [wqkv1, bqkv1, wo1,
            wq2s, bq2s, wkv2, bkv2, wo2,
            fw1, fb1, fw2, vecs]


def decoder_layer(x, enc_x, mask, params, *, num_heads, qk_length, value_length,
                  block_b=None):
    B, T, C = x.shape
    S = enc_x.shape[1]
    H, dv = num_heads, value_length

    if block_b is None:
        # Keep >= 2 grid steps (both v7x TensorCores) while folding batches into M.
        block_b = B // 2 if (B % 2 == 0 and B >= 2) else 1
    if T % 8 != 0 or S % 8 != 0:
        block_b = 1  # keep the leading-dim reshapes layout-free
    assert B % block_b == 0
    grid_b = B // block_b

    packed = _pack_params(params, num_heads, qk_length, value_length)
    kernel = _make_kernel(num_heads, qk_length, value_length)

    def resident_spec(p):
        nd = p.ndim
        return pl.BlockSpec(p.shape, lambda b, _nd=nd: (0,) * _nd)

    in_specs = [
        pl.BlockSpec((block_b, T, C), lambda b: (b, 0, 0)),   # x
        pl.BlockSpec((block_b, S, C), lambda b: (b, 0, 0)),   # enc_x
        pl.BlockSpec((T, T), lambda b: (0, 0)),               # mask (shared)
    ] + [resident_spec(p) for p in packed]

    out_spec = pl.BlockSpec((block_b, T, C), lambda b: (b, 0, 0))

    return pl.pallas_call(
        kernel,
        out_shape=jax.ShapeDtypeStruct((B, T, C), jnp.float32),
        grid_spec=pltpu.PrefetchScalarGridSpec(
            num_scalar_prefetch=0,
            grid=(grid_b,),
            in_specs=in_specs,
            out_specs=out_spec,
            scratch_shapes=[pltpu.VMEM((block_b * T, H * dv), jnp.float32)],
        ),
        compiler_params=pltpu.CompilerParams(
            dimension_semantics=("parallel",),
            vmem_limit_bytes=32 * 1024 * 1024,
        ),
    )(x, enc_x, mask, *packed)


def _reference(x, enc_x, mask, params, *, num_heads, qk_length, value_length):
    """Pure-JAX reference matching the PyTorch forward (eval mode)."""
    (wq1, bq1, wk1, bk1, wv1, bv1, wo1, bo1, g1, be1,
     wq2, bq2, wk2, bk2, wv2, bv2, wo2, bo2, g2, be2,
     fw1, fb1, fw2, fb2, g3, be3) = params
    H, dk, dv = num_heads, qk_length, value_length

    def ln(v, g, b, eps=1e-5):
        m = jnp.mean(v, -1, keepdims=True)
        va = jnp.mean((v - m) ** 2, -1, keepdims=True)
        return (v - m) / jnp.sqrt(va + eps) * g + b

    def mha(qi, kvi, wq, bq, wk, bk, wv, bv, wo, bo, msk=None):
        B, Tq, _ = qi.shape
        Tk = kvi.shape[1]
        Q = (qi @ wq + bq).reshape(B, Tq, H, dk).transpose(0, 2, 1, 3)
        K = (kvi @ wk + bk).reshape(B, Tk, H, dk).transpose(0, 2, 1, 3)
        V = (kvi @ wv + bv).reshape(B, Tk, H, dv).transpose(0, 2, 1, 3)
        s = jnp.einsum("bhqd,bhkd->bhqk", Q, K) / math.sqrt(dk)
        if msk is not None:
            s = jnp.where(msk[None, None] > 0, s, -1e9)
        p = jax.nn.softmax(s, axis=-1)
        o = jnp.einsum("bhqk,bhkd->bhqd", p, V).transpose(0, 2, 1, 3).reshape(B, Tq, H * dv)
        return o @ wo + bo

    out1 = mha(x, x, wq1, bq1, wk1, bk1, wv1, bv1, wo1, bo1, mask)
    out2 = x + ln(out1, g1, be1)
    out3 = mha(out2, enc_x, wq2, bq2, wk2, bk2, wv2, bv2, wo2, bo2)
    out4 = out2 + ln(out3, g2, be2)
    out5 = jnp.maximum(out4 @ fw1 + fb1, 0.0) @ fw2 + fb2
    return out4 + ln(out5, g3, be3)


if __name__ == "__main__":
    # Small config consistent with the module's __init__. B=4 exercises the
    # batch-folded path (block_b=2, grid of 2 steps); S != T exercises cross-attn.
    B, T, S = 4, 8, 16
    num_heads, embedding_dim, ffn_hidden_dim = 4, 32, 64
    qk_length, value_length = 8, 8
    C, F, H, dk, dv = embedding_dim, ffn_hidden_dim, num_heads, qk_length, value_length

    key = jax.random.PRNGKey(0)
    ks = iter(jax.random.split(key, 64))

    def w(shape, scale=0.02):
        return (scale * jax.random.normal(next(ks), shape)).astype(jnp.float32)

    params = [
        # attention1 (masked self-attention)
        w((C, H * dk)), w((1, H * dk)),    # W_q, b_q
        w((C, H * dk)), w((1, H * dk)),    # W_k, b_k
        w((C, H * dv)), w((1, H * dv)),    # W_v, b_v
        w((H * dv, C)), w((1, C)),         # W_o, b_o
        jnp.ones((1, C), jnp.float32), jnp.zeros((1, C), jnp.float32),  # norm1
        # attention2 (cross-attention)
        w((C, H * dk)), w((1, H * dk)),
        w((C, H * dk)), w((1, H * dk)),
        w((C, H * dv)), w((1, H * dv)),
        w((H * dv, C)), w((1, C)),
        jnp.ones((1, C), jnp.float32), jnp.zeros((1, C), jnp.float32),  # norm2
        # FFN
        w((C, F)), w((1, F)),
        w((F, C)), w((1, C)),
        jnp.ones((1, C), jnp.float32), jnp.zeros((1, C), jnp.float32),  # norm3
    ]

    x = jax.random.normal(next(ks), (B, T, C), dtype=jnp.float32)
    enc_x = jax.random.normal(next(ks), (B, S, C), dtype=jnp.float32)
    # causal mask: 1 = attend, 0 = masked
    mask = jnp.tril(jnp.ones((T, T), dtype=jnp.float32))

    run = partial(decoder_layer, num_heads=num_heads,
                  qk_length=qk_length, value_length=value_length)
    out = jax.block_until_ready(run(x, enc_x, mask, params))

    ref = _reference(x, enc_x, mask, params, num_heads=num_heads,
                     qk_length=qk_length, value_length=value_length)
    assert out.shape == (B, T, C)
    # Tolerance accommodates the approximate (EUP) softmax reciprocal; flip
    # approx=False in the kernel for strict f32 parity at 1e-4.
    assert jnp.allclose(out, ref, atol=1e-2, rtol=1e-2), "mismatch vs JAX reference"
    print("KERNEL_OK")
</pallas_src>

<mosaic_0001>
module attributes {stable_mosaic.version = 11 : i64} {
  func.func @kernel(%arg0: i32, %arg1: memref<2x8x32xf32, #tpu.memory_space<vmem>>, %arg2: memref<2x16x32xf32, #tpu.memory_space<vmem>>, %arg3: memref<8x8xf32, #tpu.memory_space<vmem>>, %arg4: memref<32x96xf32, #tpu.memory_space<vmem>>, %arg5: memref<1x96xf32, #tpu.memory_space<vmem>>, %arg6: memref<32x32xf32, #tpu.memory_space<vmem>>, %arg7: memref<32x32xf32, #tpu.memory_space<vmem>>, %arg8: memref<1x32xf32, #tpu.memory_space<vmem>>, %arg9: memref<32x64xf32, #tpu.memory_space<vmem>>, %arg10: memref<1x64xf32, #tpu.memory_space<vmem>>, %arg11: memref<32x32xf32, #tpu.memory_space<vmem>>, %arg12: memref<32x64xf32, #tpu.memory_space<vmem>>, %arg13: memref<1x64xf32, #tpu.memory_space<vmem>>, %arg14: memref<64x32xf32, #tpu.memory_space<vmem>>, %arg15: memref<9x32xf32, #tpu.memory_space<vmem>>, %arg16: memref<2x8x32xf32, #tpu.memory_space<vmem>>, %arg17: memref<16x32xf32, #tpu.memory_space<vmem>>) attributes {dimension_semantics = [#tpu.dimension_semantics<parallel>], iteration_bounds = array<i64: 2>, scalar_prefetch = 0 : i64, scratch_operands = 1 : i64, tpu.core_type = #tpu.core_type<tc>, window_params = [{transform_indices = @transform_0, window_bounds = array<i64: 2, 8, 32>}, {transform_indices = @transform_1, window_bounds = array<i64: 2, 16, 32>}, {pipeline_mode = #tpu.pipeline_mode<synchronous>, transform_indices = @transform_2, window_bounds = array<i64: 8, 8>}, {pipeline_mode = #tpu.pipeline_mode<synchronous>, transform_indices = @transform_3, window_bounds = array<i64: 32, 96>}, {pipeline_mode = #tpu.pipeline_mode<synchronous>, transform_indices = @transform_4, window_bounds = array<i64: 1, 96>}, {pipeline_mode = #tpu.pipeline_mode<synchronous>, transform_indices = @transform_5, window_bounds = array<i64: 32, 32>}, {pipeline_mode = #tpu.pipeline_mode<synchronous>, transform_indices = @transform_6, window_bounds = array<i64: 32, 32>}, {pipeline_mode = #tpu.pipeline_mode<synchronous>, transform_indices = @transform_7, window_bounds = array<i64: 1, 32>}, {pipeline_mode = #tpu.pipeline_mode<synchronous>, transform_indices = @transform_8, window_bounds = array<i64: 32, 64>}, {pipeline_mode = #tpu.pipeline_mode<synchronous>, transform_indices = @transform_9, window_bounds = array<i64: 1, 64>}, {pipeline_mode = #tpu.pipeline_mode<synchronous>, transform_indices = @transform_10, window_bounds = array<i64: 32, 32>}, {pipeline_mode = #tpu.pipeline_mode<synchronous>, transform_indices = @transform_11, window_bounds = array<i64: 32, 64>}, {pipeline_mode = #tpu.pipeline_mode<synchronous>, transform_indices = @transform_12, window_bounds = array<i64: 1, 64>}, {pipeline_mode = #tpu.pipeline_mode<synchronous>, transform_indices = @transform_13, window_bounds = array<i64: 64, 32>}, {pipeline_mode = #tpu.pipeline_mode<synchronous>, transform_indices = @transform_14, window_bounds = array<i64: 9, 32>}, {transform_indices = @transform_15, window_bounds = array<i64: 2, 8, 32>}]} {
    %c0 = arith.constant 0 : index
    %c0_0 = arith.constant 0 : index
    %c0_1 = arith.constant 0 : index
    %0 = vector.load %arg1[%c0, %c0_0, %c0_1] : memref<2x8x32xf32, #tpu.memory_space<vmem>>, vector<2x8x32xf32>
    %1 = vector.shape_cast %0 : vector<2x8x32xf32> to vector<16x32xf32>
    %c0_2 = arith.constant 0 : index
    %c0_3 = arith.constant 0 : index
    %c0_4 = arith.constant 0 : index
    %2 = vector.load %arg2[%c0_2, %c0_3, %c0_4] : memref<2x16x32xf32, #tpu.memory_space<vmem>>, vector<2x16x32xf32>
    %3 = vector.shape_cast %2 : vector<2x16x32xf32> to vector<32x32xf32>
    %c0_5 = arith.constant 0 : index
    %c0_6 = arith.constant 0 : index
    %4 = vector.load %arg3[%c0_5, %c0_6] : memref<8x8xf32, #tpu.memory_space<vmem>>, vector<8x8xf32>
    %cst = arith.constant 0.000000e+00 : f32
    %5 = vector.broadcast %cst : f32 to vector<8x8xf32>
    %6 = arith.cmpf ogt, %4, %5 : vector<8x8xf32>
    %cst_7 = arith.constant 0.000000e+00 : f32
    %cst_8 = arith.constant -1.000000e+09 : f32
    %7 = vector.broadcast %cst_7 : f32 to vector<8x8xf32>
    %8 = vector.broadcast %cst_8 : f32 to vector<8x8xf32>
    %9 = arith.select %6, %7, %8 : vector<8x8xi1>, vector<8x8xf32>
    %c0_9 = arith.constant 0 : index
    %c0_10 = arith.constant 0 : index
    %10 = vector.load %arg15[%c0_9, %c0_10] : memref<9x32xf32, #tpu.memory_space<vmem>>, vector<9x32xf32>
    %11 = vector.extract_strided_slice %10 {offsets = [0, 0], sizes = [1, 32], strides = [1, 1]} : vector<9x32xf32> to vector<1x32xf32>
    %12 = vector.extract_strided_slice %10 {offsets = [1, 0], sizes = [1, 32], strides = [1, 1]} : vector<9x32xf32> to vector<1x32xf32>
    %13 = vector.extract_strided_slice %10 {offsets = [2, 0], sizes = [1, 32], strides = [1, 1]} : vector<9x32xf32> to vector<1x32xf32>
    %14 = vector.extract_strided_slice %10 {offsets = [3, 0], sizes = [1, 32], strides = [1, 1]} : vector<9x32xf32> to vector<1x32xf32>
    %15 = vector.extract_strided_slice %10 {offsets = [4, 0], sizes = [1, 32], strides = [1, 1]} : vector<9x32xf32> to vector<1x32xf32>
    %16 = vector.extract_strided_slice %10 {offsets = [5, 0], sizes = [1, 32], strides = [1, 1]} : vector<9x32xf32> to vector<1x32xf32>
    %17 = vector.extract_strided_slice %10 {offsets = [6, 0], sizes = [1, 32], strides = [1, 1]} : vector<9x32xf32> to vector<1x32xf32>
    %18 = vector.extract_strided_slice %10 {offsets = [7, 0], sizes = [1, 32], strides = [1, 1]} : vector<9x32xf32> to vector<1x32xf32>
    %19 = vector.extract_strided_slice %10 {offsets = [8, 0], sizes = [1, 32], strides = [1, 1]} : vector<9x32xf32> to vector<1x32xf32>
    %c0_11 = arith.constant 0 : index
    %c0_12 = arith.constant 0 : index
    %20 = vector.load %arg4[%c0_11, %c0_12] : memref<32x96xf32, #tpu.memory_space<vmem>>, vector<32x96xf32>
    %cst_13 = arith.constant dense<0.000000e+00> : vector<16x96xf32>
    %21 = tpu.matmul %1, %20, %cst_13 {dimension_numbers = #tpu.dot_dimension_numbers<[1], [0], [0], [1], [0, 0, 1, 1], [], []>} : vector<16x32xf32>, vector<32x96xf32>, vector<16x96xf32> -> vector<16x96xf32>
    %c0_14 = arith.constant 0 : index
    %c0_15 = arith.constant 0 : index
    %22 = vector.load %arg5[%c0_14, %c0_15] : memref<1x96xf32, #tpu.memory_space<vmem>>, vector<1x96xf32>
    %23 = vector.broadcast %22 : vector<1x96xf32> to vector<16x96xf32>
    %24 = arith.addf %21, %23 : vector<16x96xf32>
    %25 = vector.extract_strided_slice %24 {offsets = [0, 0], sizes = [16, 32], strides = [1, 1]} : vector<16x96xf32> to vector<16x32xf32>
    %26 = vector.extract_strided_slice %24 {offsets = [0, 32], sizes = [16, 32], strides = [1, 1]} : vector<16x96xf32> to vector<16x32xf32>
    %27 = vector.extract_strided_slice %24 {offsets = [0, 64], sizes = [16, 32], strides = [1, 1]} : vector<16x96xf32> to vector<16x32xf32>
    %c0_16 = arith.constant 0 : index
    %c0_17 = arith.constant 0 : index
    %28 = vector.load %arg6[%c0_16, %c0_17] : memref<32x32xf32, #tpu.memory_space<vmem>>, vector<32x32xf32>
    %29 = vector.extract_strided_slice %25 {offsets = [0, 0], sizes = [8, 8], strides = [1, 1]} : vector<16x32xf32> to vector<8x8xf32>
    %30 = vector.extract_strided_slice %26 {offsets = [0, 0], sizes = [8, 8], strides = [1, 1]} : vector<16x32xf32> to vector<8x8xf32>
    %31 = vector.extract_strided_slice %27 {offsets = [0, 0], sizes = [8, 8], strides = [1, 1]} : vector<16x32xf32> to vector<8x8xf32>
    %32 = tpu.transpose %30, [1, 0] : vector<8x8xf32> -> vector<8x8xf32>
    %cst_18 = arith.constant dense<0.000000e+00> : vector<8x8xf32>
    %33 = tpu.matmul %29, %32, %cst_18 {dimension_numbers = #tpu.dot_dimension_numbers<[1], [0], [0], [1], [0, 0, 1, 1], [], []>} : vector<8x8xf32>, vector<8x8xf32>, vector<8x8xf32> -> vector<8x8xf32>
    %34 = arith.addf %33, %9 : vector<8x8xf32>
    %cst_19 = arith.constant dense<0xFF800000> : vector<8xf32>
    %35 = vector.multi_reduction <maximumf>, %34, %cst_19 [1] : vector<8x8xf32> to vector<8xf32>
    %36 = vector.shape_cast %35 : vector<8xf32> to vector<8x1xf32>
    %37 = vector.broadcast %36 : vector<8x1xf32> to vector<8x8xf32>
    %38 = arith.subf %34, %37 : vector<8x8xf32>
    %39 = math.exp %38 : vector<8x8xf32>
    %cst_20 = arith.constant dense<0.000000e+00> : vector<8xf32>
    %40 = vector.multi_reduction <add>, %39, %cst_20 [1] : vector<8x8xf32> to vector<8xf32>
    %41 = vector.shape_cast %40 : vector<8xf32> to vector<8x1xf32>
    %42 = tpu.reciprocal %41 {approx = true} : vector<8x1xf32> -> vector<8x1xf32>
    %43 = vector.broadcast %42 : vector<8x1xf32> to vector<8x8xf32>
    %44 = arith.mulf %39, %43 : vector<8x8xf32>
    %cst_21 = arith.constant dense<0.000000e+00> : vector<8x8xf32>
    %45 = tpu.matmul %44, %31, %cst_21 {dimension_numbers = #tpu.dot_dimension_numbers<[1], [0], [0], [1], [0, 0, 1, 1], [], []>} : vector<8x8xf32>, vector<8x8xf32>, vector<8x8xf32> -> vector<8x8xf32>
    %c0_22 = arith.constant 0 : index
    %c0_23 = arith.constant 0 : index
    %46 = vector.load %arg17[%c0_22, %c0_23] : memref<16x32xf32, #tpu.memory_space<vmem>>, vector<8x8xf32>
    tpu.vector_store %arg17[%c0_22, %c0_23], %45 {strides = array<i32>} : memref<16x32xf32, #tpu.memory_space<vmem>>, vector<8x8xf32>,
    %47 = vector.extract_strided_slice %25 {offsets = [0, 8], sizes = [8, 8], strides = [1, 1]} : vector<16x32xf32> to vector<8x8xf32>
    %48 = vector.extract_strided_slice %26 {offsets = [0, 8], sizes = [8, 8], strides = [1, 1]} : vector<16x32xf32> to vector<8x8xf32>
    %49 = vector.extract_strided_slice %27 {offsets = [0, 8], sizes = [8, 8], strides = [1, 1]} : vector<16x32xf32> to vector<8x8xf32>
    %50 = tpu.transpose %48, [1, 0] : vector<8x8xf32> -> vector<8x8xf32>
    %cst_24 = arith.constant dense<0.000000e+00> : vector<8x8xf32>
    %51 = tpu.matmul %47, %50, %cst_24 {dimension_numbers = #tpu.dot_dimension_numbers<[1], [0], [0], [1], [0, 0, 1, 1], [], []>} : vector<8x8xf32>, vector<8x8xf32>, vector<8x8xf32> -> vector<8x8xf32>
    %52 = arith.addf %51, %9 : vector<8x8xf32>
    %cst_25 = arith.constant dense<0xFF800000> : vector<8xf32>
    %53 = vector.multi_reduction <maximumf>, %52, %cst_25 [1] : vector<8x8xf32> to vector<8xf32>
    %54 = vector.shape_cast %53 : vector<8xf32> to vector<8x1xf32>
    %55 = vector.broadcast %54 : vector<8x1xf32> to vector<8x8xf32>
    %56 = arith.subf %52, %55 : vector<8x8xf32>
    %57 = math.exp %56 : vector<8x8xf32>
    %cst_26 = arith.constant dense<0.000000e+00> : vector<8xf32>
    %58 = vector.multi_reduction <add>, %57, %cst_26 [1] : vector<8x8xf32> to vector<8xf32>
    %59 = vector.shape_cast %58 : vector<8xf32> to vector<8x1xf32>
    %60 = tpu.reciprocal %59 {approx = true} : vector<8x1xf32> -> vector<8x1xf32>
    %61 = vector.broadcast %60 : vector<8x1xf32> to vector<8x8xf32>
    %62 = arith.mulf %57, %61 : vector<8x8xf32>
    %cst_27 = arith.constant dense<0.000000e+00> : vector<8x8xf32>
    %63 = tpu.matmul %62, %49, %cst_27 {dimension_numbers = #tpu.dot_dimension_numbers<[1], [0], [0], [1], [0, 0, 1, 1], [], []>} : vector<8x8xf32>, vector<8x8xf32>, vector<8x8xf32> -> vector<8x8xf32>
    %c0_28 = arith.constant 0 : index
    %c8 = arith.constant 8 : index
    %64 = vector.load %arg17[%c0_28, %c8] : memref<16x32xf32, #tpu.memory_space<vmem>>, vector<8x8xf32>
    tpu.vector_store %arg17[%c0_28, %c8], %63 {strides = array<i32>} : memref<16x32xf32, #tpu.memory_space<vmem>>, vector<8x8xf32>,
    %65 = vector.extract_strided_slice %25 {offsets = [0, 16], sizes = [8, 8], strides = [1, 1]} : vector<16x32xf32> to vector<8x8xf32>
    %66 = vector.extract_strided_slice %26 {offsets = [0, 16], sizes = [8, 8], strides = [1, 1]} : vector<16x32xf32> to vector<8x8xf32>
    %67 = vector.extract_strided_slice %27 {offsets = [0, 16], sizes = [8, 8], strides = [1, 1]} : vector<16x32xf32> to vector<8x8xf32>
    %68 = tpu.transpose %66, [1, 0] : vector<8x8xf32> -> vector<8x8xf32>
    %cst_29 = arith.constant dense<0.000000e+00> : vector<8x8xf32>
    %69 = tpu.matmul %65, %68, %cst_29 {dimension_numbers = #tpu.dot_dimension_numbers<[1], [0], [0], [1], [0, 0, 1, 1], [], []>} : vector<8x8xf32>, vector<8x8xf32>, vector<8x8xf32> -> vector<8x8xf32>
    %70 = arith.addf %69, %9 : vector<8x8xf32>
    %cst_30 = arith.constant dense<0xFF800000> : vector<8xf32>
    %71 = vector.multi_reduction <maximumf>, %70, %cst_30 [1] : vector<8x8xf32> to vector<8xf32>
    %72 = vector.shape_cast %71 : vector<8xf32> to vector<8x1xf32>
    %73 = vector.broadcast %72 : vector<8x1xf32> to vector<8x8xf32>
    %74 = arith.subf %70, %73 : vector<8x8xf32>
    %75 = math.exp %74 : vector<8x8xf32>
    %cst_31 = arith.constant dense<0.000000e+00> : vector<8xf32>
    %76 = vector.multi_reduction <add>, %75, %cst_31 [1] : vector<8x8xf32> to vector<8xf32>
    %77 = vector.shape_cast %76 : vector<8xf32> to vector<8x1xf32>
    %78 = tpu.reciprocal %77 {approx = true} : vector<8x1xf32> -> vector<8x1xf32>
    %79 = vector.broadcast %78 : vector<8x1xf32> to vector<8x8xf32>
    %80 = arith.mulf %75, %79 : vector<8x8xf32>
    %cst_32 = arith.constant dense<0.000000e+00> : vector<8x8xf32>
    %81 = tpu.matmul %80, %67, %cst_32 {dimension_numbers = #tpu.dot_dimension_numbers<[1], [0], [0], [1], [0, 0, 1, 1], [], []>} : vector<8x8xf32>, vector<8x8xf32>, vector<8x8xf32> -> vector<8x8xf32>
    %c0_33 = arith.constant 0 : index
    %c16 = arith.constant 16 : index
    %82 = vector.load %arg17[%c0_33, %c16] : memref<16x32xf32, #tpu.memory_space<vmem>>, vector<8x8xf32>
    tpu.vector_store %arg17[%c0_33, %c16], %81 {strides = array<i32>} : memref<16x32xf32, #tpu.memory_space<vmem>>, vector<8x8xf32>,
    %83 = vector.extract_strided_slice %25 {offsets = [0, 24], sizes = [8, 8], strides = [1, 1]} : vector<16x32xf32> to vector<8x8xf32>
    %84 = vector.extract_strided_slice %26 {offsets = [0, 24], sizes = [8, 8], strides = [1, 1]} : vector<16x32xf32> to vector<8x8xf32>
    %85 = vector.extract_strided_slice %27 {offsets = [0, 24], sizes = [8, 8], strides = [1, 1]} : vector<16x32xf32> to vector<8x8xf32>
    %86 = tpu.transpose %84, [1, 0] : vector<8x8xf32> -> vector<8x8xf32>
    %cst_34 = arith.constant dense<0.000000e+00> : vector<8x8xf32>
    %87 = tpu.matmul %83, %86, %cst_34 {dimension_numbers = #tpu.dot_dimension_numbers<[1], [0], [0], [1], [0, 0, 1, 1], [], []>} : vector<8x8xf32>, vector<8x8xf32>, vector<8x8xf32> -> vector<8x8xf32>
    %88 = arith.addf %87, %9 : vector<8x8xf32>
    %cst_35 = arith.constant dense<0xFF800000> : vector<8xf32>
    %89 = vector.multi_reduction <maximumf>, %88, %cst_35 [1] : vector<8x8xf32> to vector<8xf32>
    %90 = vector.shape_cast %89 : vector<8xf32> to vector<8x1xf32>
    %91 = vector.broadcast %90 : vector<8x1xf32> to vector<8x8xf32>
    %92 = arith.subf %88, %91 : vector<8x8xf32>
    %93 = math.exp %92 : vector<8x8xf32>
    %cst_36 = arith.constant dense<0.000000e+00> : vector<8xf32>
    %94 = vector.multi_reduction <add>, %93, %cst_36 [1] : vector<8x8xf32> to vector<8xf32>
    %95 = vector.shape_cast %94 : vector<8xf32> to vector<8x1xf32>
    %96 = tpu.reciprocal %95 {approx = true} : vector<8x1xf32> -> vector<8x1xf32>
    %97 = vector.broadcast %96 : vector<8x1xf32> to vector<8x8xf32>
    %98 = arith.mulf %93, %97 : vector<8x8xf32>
    %cst_37 = arith.constant dense<0.000000e+00> : vector<8x8xf32>
    %99 = tpu.matmul %98, %85, %cst_37 {dimension_numbers = #tpu.dot_dimension_numbers<[1], [0], [0], [1], [0, 0, 1, 1], [], []>} : vector<8x8xf32>, vector<8x8xf32>, vector<8x8xf32> -> vector<8x8xf32>
    %c0_38 = arith.constant 0 : index
    %c24 = arith.constant 24 : index
    %100 = vector.load %arg17[%c0_38, %c24] : memref<16x32xf32, #tpu.memory_space<vmem>>, vector<8x8xf32>
    tpu.vector_store %arg17[%c0_38, %c24], %99 {strides = array<i32>} : memref<16x32xf32, #tpu.memory_space<vmem>>, vector<8x8xf32>,
    %101 = vector.extract_strided_slice %25 {offsets = [8, 0], sizes = [8, 8], strides = [1, 1]} : vector<16x32xf32> to vector<8x8xf32>
    %102 = vector.extract_strided_slice %26 {offsets = [8, 0], sizes = [8, 8], strides = [1, 1]} : vector<16x32xf32> to vector<8x8xf32>
    %103 = vector.extract_strided_slice %27 {offsets = [8, 0], sizes = [8, 8], strides = [1, 1]} : vector<16x32xf32> to vector<8x8xf32>
    %104 = tpu.transpose %102, [1, 0] : vector<8x8xf32> -> vector<8x8xf32>
    %cst_39 = arith.constant dense<0.000000e+00> : vector<8x8xf32>
    %105 = tpu.matmul %101, %104, %cst_39 {dimension_numbers = #tpu.dot_dimension_numbers<[1], [0], [0], [1], [0, 0, 1, 1], [], []>} : vector<8x8xf32>, vector<8x8xf32>, vector<8x8xf32> -> vector<8x8xf32>
    %106 = arith.addf %105, %9 : vector<8x8xf32>
    %cst_40 = arith.constant dense<0xFF800000> : vector<8xf32>
    %107 = vector.multi_reduction <maximumf>, %106, %cst_40 [1] : vector<8x8xf32> to vector<8xf32>
    %108 = vector.shape_cast %107 : vector<8xf32> to vector<8x1xf32>
    %109 = vector.broadcast %108 : vector<8x1xf32> to vector<8x8xf32>
    %110 = arith.subf %106, %109 : vector<8x8xf32>
    %111 = math.exp %110 : vector<8x8xf32>
    %cst_41 = arith.constant dense<0.000000e+00> : vector<8xf32>
    %112 = vector.multi_reduction <add>, %111, %cst_41 [1] : vector<8x8xf32> to vector<8xf32>
    %113 = vector.shape_cast %112 : vector<8xf32> to vector<8x1xf32>
    %114 = tpu.reciprocal %113 {approx = true} : vector<8x1xf32> -> vector<8x1xf32>
    %115 = vector.broadcast %114 : vector<8x1xf32> to vector<8x8xf32>
    %116 = arith.mulf %111, %115 : vector<8x8xf32>
    %cst_42 = arith.constant dense<0.000000e+00> : vector<8x8xf32>
    %117 = tpu.matmul %116, %103, %cst_42 {dimension_numbers = #tpu.dot_dimension_numbers<[1], [0], [0], [1], [0, 0, 1, 1], [], []>} : vector<8x8xf32>, vector<8x8xf32>, vector<8x8xf32> -> vector<8x8xf32>
    %c8_43 = arith.constant 8 : index
    %c0_44 = arith.constant 0 : index
    %118 = vector.load %arg17[%c8_43, %c0_44] : memref<16x32xf32, #tpu.memory_space<vmem>>, vector<8x8xf32>
    tpu.vector_store %arg17[%c8_43, %c0_44], %117 {strides = array<i32>} : memref<16x32xf32, #tpu.memory_space<vmem>>, vector<8x8xf32>,
    %119 = vector.extract_strided_slice %25 {offsets = [8, 8], sizes = [8, 8], strides = [1, 1]} : vector<16x32xf32> to vector<8x8xf32>
    %120 = vector.extract_strided_slice %26 {offsets = [8, 8], sizes = [8, 8], strides = [1, 1]} : vector<16x32xf32> to vector<8x8xf32>
    %121 = vector.extract_strided_slice %27 {offsets = [8, 8], sizes = [8, 8], strides = [1, 1]} : vector<16x32xf32> to vector<8x8xf32>
    %122 = tpu.transpose %120, [1, 0] : vector<8x8xf32> -> vector<8x8xf32>
    %cst_45 = arith.constant dense<0.000000e+00> : vector<8x8xf32>
    %123 = tpu.matmul %119, %122, %cst_45 {dimension_numbers = #tpu.dot_dimension_numbers<[1], [0], [0], [1], [0, 0, 1, 1], [], []>} : vector<8x8xf32>, vector<8x8xf32>, vector<8x8xf32> -> vector<8x8xf32>
    %124 = arith.addf %123, %9 : vector<8x8xf32>
    %cst_46 = arith.constant dense<0xFF800000> : vector<8xf32>
    %125 = vector.multi_reduction <maximumf>, %124, %cst_46 [1] : vector<8x8xf32> to vector<8xf32>
    %126 = vector.shape_cast %125 : vector<8xf32> to vector<8x1xf32>
    %127 = vector.broadcast %126 : vector<8x1xf32> to vector<8x8xf32>
    %128 = arith.subf %124, %127 : vector<8x8xf32>
    %129 = math.exp %128 : vector<8x8xf32>
    %cst_47 = arith.constant dense<0.000000e+00> : vector<8xf32>
    %130 = vector.multi_reduction <add>, %129, %cst_47 [1] : vector<8x8xf32> to vector<8xf32>
    %131 = vector.shape_cast %130 : vector<8xf32> to vector<8x1xf32>
    %132 = tpu.reciprocal %131 {approx = true} : vector<8x1xf32> -> vector<8x1xf32>
    %133 = vector.broadcast %132 : vector<8x1xf32> to vector<8x8xf32>
    %134 = arith.mulf %129, %133 : vector<8x8xf32>
    %cst_48 = arith.constant dense<0.000000e+00> : vector<8x8xf32>
    %135 = tpu.matmul %134, %121, %cst_48 {dimension_numbers = #tpu.dot_dimension_numbers<[1], [0], [0], [1], [0, 0, 1, 1], [], []>} : vector<8x8xf32>, vector<8x8xf32>, vector<8x8xf32> -> vector<8x8xf32>
    %c8_49 = arith.constant 8 : index
    %c8_50 = arith.constant 8 : index
    %136 = vector.load %arg17[%c8_49, %c8_50] : memref<16x32xf32, #tpu.memory_space<vmem>>, vector<8x8xf32>
    tpu.vector_store %arg17[%c8_49, %c8_50], %135 {strides = array<i32>} : memref<16x32xf32, #tpu.memory_space<vmem>>, vector<8x8xf32>,
    %137 = vector.extract_strided_slice %25 {offsets = [8, 16], sizes = [8, 8], strides = [1, 1]} : vector<16x32xf32> to vector<8x8xf32>
    %138 = vector.extract_strided_slice %26 {offsets = [8, 16], sizes = [8, 8], strides = [1, 1]} : vector<16x32xf32> to vector<8x8xf32>
    %139 = vector.extract_strided_slice %27 {offsets = [8, 16], sizes = [8, 8], strides = [1, 1]} : vector<16x32xf32> to vector<8x8xf32>
    %140 = tpu.transpose %138, [1, 0] : vector<8x8xf32> -> vector<8x8xf32>
    %cst_51 = arith.constant dense<0.000000e+00> : vector<8x8xf32>
    %141 = tpu.matmul %137, %140, %cst_51 {dimension_numbers = #tpu.dot_dimension_numbers<[1], [0], [0], [1], [0, 0, 1, 1], [], []>} : vector<8x8xf32>, vector<8x8xf32>, vector<8x8xf32> -> vector<8x8xf32>
    %142 = arith.addf %141, %9 : vector<8x8xf32>
    %cst_52 = arith.constant dense<0xFF800000> : vector<8xf32>
    %143 = vector.multi_reduction <maximumf>, %142, %cst_52 [1] : vector<8x8xf32> to vector<8xf32>
    %144 = vector.shape_cast %143 : vector<8xf32> to vector<8x1xf32>
    %145 = vector.broadcast %144 : vector<8x1xf32> to vector<8x8xf32>
    %146 = arith.subf %142, %145 : vector<8x8xf32>
    %147 = math.exp %146 : vector<8x8xf32>
    %cst_53 = arith.constant dense<0.000000e+00> : vector<8xf32>
    %148 = vector.multi_reduction <add>, %147, %cst_53 [1] : vector<8x8xf32> to vector<8xf32>
    %149 = vector.shape_cast %148 : vector<8xf32> to vector<8x1xf32>
    %150 = tpu.reciprocal %149 {approx = true} : vector<8x1xf32> -> vector<8x1xf32>
    %151 = vector.broadcast %150 : vector<8x1xf32> to vector<8x8xf32>
    %152 = arith.mulf %147, %151 : vector<8x8xf32>
    %cst_54 = arith.constant dense<0.000000e+00> : vector<8x8xf32>
    %153 = tpu.matmul %152, %139, %cst_54 {dimension_numbers = #tpu.dot_dimension_numbers<[1], [0], [0], [1], [0, 0, 1, 1], [], []>} : vector<8x8xf32>, vector<8x8xf32>, vector<8x8xf32> -> vector<8x8xf32>
    %c8_55 = arith.constant 8 : index
    %c16_56 = arith.constant 16 : index
    %154 = vector.load %arg17[%c8_55, %c16_56] : memref<16x32xf32, #tpu.memory_space<vmem>>, vector<8x8xf32>
    tpu.vector_store %arg17[%c8_55, %c16_56], %153 {strides = array<i32>} : memref<16x32xf32, #tpu.memory_space<vmem>>, vector<8x8xf32>,
    %155 = vector.extract_strided_slice %25 {offsets = [8, 24], sizes = [8, 8], strides = [1, 1]} : vector<16x32xf32> to vector<8x8xf32>
    %156 = vector.extract_strided_slice %26 {offsets = [8, 24], sizes = [8, 8], strides = [1, 1]} : vector<16x32xf32> to vector<8x8xf32>
    %157 = vector.extract_strided_slice %27 {offsets = [8, 24], sizes = [8, 8], strides = [1, 1]} : vector<16x32xf32> to vector<8x8xf32>
    %158 = tpu.transpose %156, [1, 0] : vector<8x8xf32> -> vector<8x8xf32>
    %cst_57 = arith.constant dense<0.000000e+00> : vector<8x8xf32>
    %159 = tpu.matmul %155, %158, %cst_57 {dimension_numbers = #tpu.dot_dimension_numbers<[1], [0], [0], [1], [0, 0, 1, 1], [], []>} : vector<8x8xf32>, vector<8x8xf32>, vector<8x8xf32> -> vector<8x8xf32>
    %160 = arith.addf %159, %9 : vector<8x8xf32>
    %cst_58 = arith.constant dense<0xFF800000> : vector<8xf32>
    %161 = vector.multi_reduction <maximumf>, %160, %cst_58 [1] : vector<8x8xf32> to vector<8xf32>
    %162 = vector.shape_cast %161 : vector<8xf32> to vector<8x1xf32>
    %163 = vector.broadcast %162 : vector<8x1xf32> to vector<8x8xf32>
    %164 = arith.subf %160, %163 : vector<8x8xf32>
    %165 = math.exp %164 : vector<8x8xf32>
    %cst_59 = arith.constant dense<0.000000e+00> : vector<8xf32>
    %166 = vector.multi_reduction <add>, %165, %cst_59 [1] : vector<8x8xf32> to vector<8xf32>
    %167 = vector.shape_cast %166 : vector<8xf32> to vector<8x1xf32>
    %168 = tpu.reciprocal %167 {approx = true} : vector<8x1xf32> -> vector<8x1xf32>
    %169 = vector.broadcast %168 : vector<8x1xf32> to vector<8x8xf32>
    %170 = arith.mulf %165, %169 : vector<8x8xf32>
    %cst_60 = arith.constant dense<0.000000e+00> : vector<8x8xf32>
    %171 = tpu.matmul %170, %157, %cst_60 {dimension_numbers = #tpu.dot_dimension_numbers<[1], [0], [0], [1], [0, 0, 1, 1], [], []>} : vector<8x8xf32>, vector<8x8xf32>, vector<8x8xf32> -> vector<8x8xf32>
    %c8_61 = arith.constant 8 : index
    %c24_62 = arith.constant 24 : index
    %172 = vector.load %arg17[%c8_61, %c24_62] : memref<16x32xf32, #tpu.memory_space<vmem>>, vector<8x8xf32>
    tpu.vector_store %arg17[%c8_61, %c24_62], %171 {strides = array<i32>} : memref<16x32xf32, #tpu.memory_space<vmem>>, vector<8x8xf32>,
    %c0_63 = arith.constant 0 : index
    %c0_64 = arith.constant 0 : index
    %173 = vector.load %arg17[%c0_63, %c0_64] : memref<16x32xf32, #tpu.memory_space<vmem>>, vector<16x32xf32>
    %cst_65 = arith.constant dense<0.000000e+00> : vector<16x32xf32>
    %174 = tpu.matmul %173, %28, %cst_65 {dimension_numbers = #tpu.dot_dimension_numbers<[1], [0], [0], [1], [0, 0, 1, 1], [], []>} : vector<16x32xf32>, vector<32x32xf32>, vector<16x32xf32> -> vector<16x32xf32>
    %175 = vector.broadcast %11 : vector<1x32xf32> to vector<16x32xf32>
    %176 = arith.addf %174, %175 : vector<16x32xf32>
    %cst_66 = arith.constant dense<0.000000e+00> : vector<16xf32>
    %177 = vector.multi_reduction <add>, %176, %cst_66 [1] : vector<16x32xf32> to vector<16xf32>
    %178 = vector.shape_cast %177 : vector<16xf32> to vector<16x1xf32>
    %cst_67 = arith.constant 3.200000e+01 : f32
    %179 = vector.broadcast %cst_67 : f32 to vector<16x1xf32>
    %180 = arith.divf %178, %179 : vector<16x1xf32>
    %181 = vector.broadcast %180 : vector<16x1xf32> to vector<16x32xf32>
    %182 = arith.subf %176, %181 : vector<16x32xf32>
    %183 = arith.mulf %182, %182 : vector<16x32xf32>
    %cst_68 = arith.constant dense<0.000000e+00> : vector<16xf32>
    %184 = vector.multi_reduction <add>, %183, %cst_68 [1] : vector<16x32xf32> to vector<16xf32>
    %185 = vector.shape_cast %184 : vector<16xf32> to vector<16x1xf32>
    %cst_69 = arith.constant 3.200000e+01 : f32
    %186 = vector.broadcast %cst_69 : f32 to vector<16x1xf32>
    %187 = arith.divf %185, %186 : vector<16x1xf32>
    %188 = vector.broadcast %180 : vector<16x1xf32> to vector<16x32xf32>
    %189 = arith.subf %176, %188 : vector<16x32xf32>
    %cst_70 = arith.constant 9.99999974E-6 : f32
    %190 = vector.broadcast %cst_70 : f32 to vector<16x1xf32>
    %191 = arith.addf %187, %190 : vector<16x1xf32>
    %192 = math.rsqrt %191 : vector<16x1xf32>
    %193 = vector.broadcast %192 : vector<16x1xf32> to vector<16x32xf32>
    %194 = arith.mulf %189, %193 : vector<16x32xf32>
    %195 = vector.broadcast %12 : vector<1x32xf32> to vector<16x32xf32>
    %196 = arith.mulf %194, %195 : vector<16x32xf32>
    %197 = vector.broadcast %13 : vector<1x32xf32> to vector<16x32xf32>
    %198 = arith.addf %196, %197 : vector<16x32xf32>
    %199 = arith.addf %1, %198 : vector<16x32xf32>
    %c0_71 = arith.constant 0 : index
    %c0_72 = arith.constant 0 : index
    %200 = vector.load %arg7[%c0_71, %c0_72] : memref<32x32xf32, #tpu.memory_space<vmem>>, vector<32x32xf32>
    %cst_73 = arith.constant dense<0.000000e+00> : vector<16x32xf32>
    %201 = tpu.matmul %199, %200, %cst_73 {dimension_numbers = #tpu.dot_dimension_numbers<[1], [0], [0], [1], [0, 0, 1, 1], [], []>} : vector<16x32xf32>, vector<32x32xf32>, vector<16x32xf32> -> vector<16x32xf32>
    %c0_74 = arith.constant 0 : index
    %c0_75 = arith.constant 0 : index
    %202 = vector.load %arg8[%c0_74, %c0_75] : memref<1x32xf32, #tpu.memory_space<vmem>>, vector<1x32xf32>
    %203 = vector.broadcast %202 : vector<1x32xf32> to vector<16x32xf32>
    %204 = arith.addf %201, %203 : vector<16x32xf32>
    %c0_76 = arith.constant 0 : index
    %c0_77 = arith.constant 0 : index
    %205 = vector.load %arg9[%c0_76, %c0_77] : memref<32x64xf32, #tpu.memory_space<vmem>>, vector<32x64xf32>
    %cst_78 = arith.constant dense<0.000000e+00> : vector<32x64xf32>
    %206 = tpu.matmul %3, %205, %cst_78 {dimension_numbers = #tpu.dot_dimension_numbers<[1], [0], [0], [1], [0, 0, 1, 1], [], []>} : vector<32x32xf32>, vector<32x64xf32>, vector<32x64xf32> -> vector<32x64xf32>
    %c0_79 = arith.constant 0 : index
    %c0_80 = arith.constant 0 : index
    %207 = vector.load %arg10[%c0_79, %c0_80] : memref<1x64xf32, #tpu.memory_space<vmem>>, vector<1x64xf32>
    %208 = vector.broadcast %207 : vector<1x64xf32> to vector<32x64xf32>
    %209 = arith.addf %206, %208 : vector<32x64xf32>
    %210 = vector.extract_strided_slice %209 {offsets = [0, 0], sizes = [32, 32], strides = [1, 1]} : vector<32x64xf32> to vector<32x32xf32>
    %211 = vector.extract_strided_slice %209 {offsets = [0, 32], sizes = [32, 32], strides = [1, 1]} : vector<32x64xf32> to vector<32x32xf32>
    %c0_81 = arith.constant 0 : index
    %c0_82 = arith.constant 0 : index
    %212 = vector.load %arg11[%c0_81, %c0_82] : memref<32x32xf32, #tpu.memory_space<vmem>>, vector<32x32xf32>
    %213 = vector.extract_strided_slice %204 {offsets = [0, 0], sizes = [8, 8], strides = [1, 1]} : vector<16x32xf32> to vector<8x8xf32>
    %214 = vector.extract_strided_slice %210 {offsets = [0, 0], sizes = [16, 8], strides = [1, 1]} : vector<32x32xf32> to vector<16x8xf32>
    %215 = vector.extract_strided_slice %211 {offsets = [0, 0], sizes = [16, 8], strides = [1, 1]} : vector<32x32xf32> to vector<16x8xf32>
    %216 = tpu.transpose %214, [1, 0] : vector<16x8xf32> -> vector<8x16xf32>
    %cst_83 = arith.constant dense<0.000000e+00> : vector<8x16xf32>
    %217 = tpu.matmul %213, %216, %cst_83 {dimension_numbers = #tpu.dot_dimension_numbers<[1], [0], [0], [1], [0, 0, 1, 1], [], []>} : vector<8x8xf32>, vector<8x16xf32>, vector<8x16xf32> -> vector<8x16xf32>
    %cst_84 = arith.constant dense<0xFF800000> : vector<8xf32>
    %218 = vector.multi_reduction <maximumf>, %217, %cst_84 [1] : vector<8x16xf32> to vector<8xf32>
    %219 = vector.shape_cast %218 : vector<8xf32> to vector<8x1xf32>
    %220 = vector.broadcast %219 : vector<8x1xf32> to vector<8x16xf32>
    %221 = arith.subf %217, %220 : vector<8x16xf32>
    %222 = math.exp %221 : vector<8x16xf32>
    %cst_85 = arith.constant dense<0.000000e+00> : vector<8xf32>
    %223 = vector.multi_reduction <add>, %222, %cst_85 [1] : vector<8x16xf32> to vector<8xf32>
    %224 = vector.shape_cast %223 : vector<8xf32> to vector<8x1xf32>
    %225 = tpu.reciprocal %224 {approx = true} : vector<8x1xf32> -> vector<8x1xf32>
    %226 = vector.broadcast %225 : vector<8x1xf32> to vector<8x16xf32>
    %227 = arith.mulf %222, %226 : vector<8x16xf32>
    %cst_86 = arith.constant dense<0.000000e+00> : vector<8x8xf32>
    %228 = tpu.matmul %227, %215, %cst_86 {dimension_numbers = #tpu.dot_dimension_numbers<[1], [0], [0], [1], [0, 0, 1, 1], [], []>} : vector<8x16xf32>, vector<16x8xf32>, vector<8x8xf32> -> vector<8x8xf32>
    %c0_87 = arith.constant 0 : index
    %c0_88 = arith.constant 0 : index
    %229 = vector.load %arg17[%c0_87, %c0_88] : memref<16x32xf32, #tpu.memory_space<vmem>>, vector<8x8xf32>
    tpu.vector_store %arg17[%c0_87, %c0_88], %228 {strides = array<i32>} : memref<16x32xf32, #tpu.memory_space<vmem>>, vector<8x8xf32>,
    %230 = vector.extract_strided_slice %204 {offsets = [0, 8], sizes = [8, 8], strides = [1, 1]} : vector<16x32xf32> to vector<8x8xf32>
    %231 = vector.extract_strided_slice %210 {offsets = [0, 8], sizes = [16, 8], strides = [1, 1]} : vector<32x32xf32> to vector<16x8xf32>
    %232 = vector.extract_strided_slice %211 {offsets = [0, 8], sizes = [16, 8], strides = [1, 1]} : vector<32x32xf32> to vector<16x8xf32>
    %233 = tpu.transpose %231, [1, 0] : vector<16x8xf32> -> vector<8x16xf32>
    %cst_89 = arith.constant dense<0.000000e+00> : vector<8x16xf32>
    %234 = tpu.matmul %230, %233, %cst_89 {dimension_numbers = #tpu.dot_dimension_numbers<[1], [0], [0], [1], [0, 0, 1, 1], [], []>} : vector<8x8xf32>, vector<8x16xf32>, vector<8x16xf32> -> vector<8x16xf32>
    %cst_90 = arith.constant dense<0xFF800000> : vector<8xf32>
    %235 = vector.multi_reduction <maximumf>, %234, %cst_90 [1] : vector<8x16xf32> to vector<8xf32>
    %236 = vector.shape_cast %235 : vector<8xf32> to vector<8x1xf32>
    %237 = vector.broadcast %236 : vector<8x1xf32> to vector<8x16xf32>
    %238 = arith.subf %234, %237 : vector<8x16xf32>
    %239 = math.exp %238 : vector<8x16xf32>
    %cst_91 = arith.constant dense<0.000000e+00> : vector<8xf32>
    %240 = vector.multi_reduction <add>, %239, %cst_91 [1] : vector<8x16xf32> to vector<8xf32>
    %241 = vector.shape_cast %240 : vector<8xf32> to vector<8x1xf32>
    %242 = tpu.reciprocal %241 {approx = true} : vector<8x1xf32> -> vector<8x1xf32>
    %243 = vector.broadcast %242 : vector<8x1xf32> to vector<8x16xf32>
    %244 = arith.mulf %239, %243 : vector<8x16xf32>
    %cst_92 = arith.constant dense<0.000000e+00> : vector<8x8xf32>
    %245 = tpu.matmul %244, %232, %cst_92 {dimension_numbers = #tpu.dot_dimension_numbers<[1], [0], [0], [1], [0, 0, 1, 1], [], []>} : vector<8x16xf32>, vector<16x8xf32>, vector<8x8xf32> -> vector<8x8xf32>
    %c0_93 = arith.constant 0 : index
    %c8_94 = arith.constant 8 : index
    %246 = vector.load %arg17[%c0_93, %c8_94] : memref<16x32xf32, #tpu.memory_space<vmem>>, vector<8x8xf32>
    tpu.vector_store %arg17[%c0_93, %c8_94], %245 {strides = array<i32>} : memref<16x32xf32, #tpu.memory_space<vmem>>, vector<8x8xf32>,
    %247 = vector.extract_strided_slice %204 {offsets = [0, 16], sizes = [8, 8], strides = [1, 1]} : vector<16x32xf32> to vector<8x8xf32>
    %248 = vector.extract_strided_slice %210 {offsets = [0, 16], sizes = [16, 8], strides = [1, 1]} : vector<32x32xf32> to vector<16x8xf32>
    %249 = vector.extract_strided_slice %211 {offsets = [0, 16], sizes = [16, 8], strides = [1, 1]} : vector<32x32xf32> to vector<16x8xf32>
    %250 = tpu.transpose %248, [1, 0] : vector<16x8xf32> -> vector<8x16xf32>
    %cst_95 = arith.constant dense<0.000000e+00> : vector<8x16xf32>
    %251 = tpu.matmul %247, %250, %cst_95 {dimension_numbers = #tpu.dot_dimension_numbers<[1], [0], [0], [1], [0, 0, 1, 1], [], []>} : vector<8x8xf32>, vector<8x16xf32>, vector<8x16xf32> -> vector<8x16xf32>
    %cst_96 = arith.constant dense<0xFF800000> : vector<8xf32>
    %252 = vector.multi_reduction <maximumf>, %251, %cst_96 [1] : vector<8x16xf32> to vector<8xf32>
    %253 = vector.shape_cast %252 : vector<8xf32> to vector<8x1xf32>
    %254 = vector.broadcast %253 : vector<8x1xf32> to vector<8x16xf32>
    %255 = arith.subf %251, %254 : vector<8x16xf32>
    %256 = math.exp %255 : vector<8x16xf32>
    %cst_97 = arith.constant dense<0.000000e+00> : vector<8xf32>
    %257 = vector.multi_reduction <add>, %256, %cst_97 [1] : vector<8x16xf32> to vector<8xf32>
    %258 = vector.shape_cast %257 : vector<8xf32> to vector<8x1xf32>
    %259 = tpu.reciprocal %258 {approx = true} : vector<8x1xf32> -> vector<8x1xf32>
    %260 = vector.broadcast %259 : vector<8x1xf32> to vector<8x16xf32>
    %261 = arith.mulf %256, %260 : vector<8x16xf32>
    %cst_98 = arith.constant dense<0.000000e+00> : vector<8x8xf32>
    %262 = tpu.matmul %261, %249, %cst_98 {dimension_numbers = #tpu.dot_dimension_numbers<[1], [0], [0], [1], [0, 0, 1, 1], [], []>} : vector<8x16xf32>, vector<16x8xf32>, vector<8x8xf32> -> vector<8x8xf32>
    %c0_99 = arith.constant 0 : index
    %c16_100 = arith.constant 16 : index
    %263 = vector.load %arg17[%c0_99, %c16_100] : memref<16x32xf32, #tpu.memory_space<vmem>>, vector<8x8xf32>
    tpu.vector_store %arg17[%c0_99, %c16_100], %262 {strides = array<i32>} : memref<16x32xf32, #tpu.memory_space<vmem>>, vector<8x8xf32>,
    %264 = vector.extract_strided_slice %204 {offsets = [0, 24], sizes = [8, 8], strides = [1, 1]} : vector<16x32xf32> to vector<8x8xf32>
    %265 = vector.extract_strided_slice %210 {offsets = [0, 24], sizes = [16, 8], strides = [1, 1]} : vector<32x32xf32> to vector<16x8xf32>
    %266 = vector.extract_strided_slice %211 {offsets = [0, 24], sizes = [16, 8], strides = [1, 1]} : vector<32x32xf32> to vector<16x8xf32>
    %267 = tpu.transpose %265, [1, 0] : vector<16x8xf32> -> vector<8x16xf32>
    %cst_101 = arith.constant dense<0.000000e+00> : vector<8x16xf32>
    %268 = tpu.matmul %264, %267, %cst_101 {dimension_numbers = #tpu.dot_dimension_numbers<[1], [0], [0], [1], [0, 0, 1, 1], [], []>} : vector<8x8xf32>, vector<8x16xf32>, vector<8x16xf32> -> vector<8x16xf32>
    %cst_102 = arith.constant dense<0xFF800000> : vector<8xf32>
    %269 = vector.multi_reduction <maximumf>, %268, %cst_102 [1] : vector<8x16xf32> to vector<8xf32>
    %270 = vector.shape_cast %269 : vector<8xf32> to vector<8x1xf32>
    %271 = vector.broadcast %270 : vector<8x1xf32> to vector<8x16xf32>
    %272 = arith.subf %268, %271 : vector<8x16xf32>
    %273 = math.exp %272 : vector<8x16xf32>
    %cst_103 = arith.constant dense<0.000000e+00> : vector<8xf32>
    %274 = vector.multi_reduction <add>, %273, %cst_103 [1] : vector<8x16xf32> to vector<8xf32>
    %275 = vector.shape_cast %274 : vector<8xf32> to vector<8x1xf32>
    %276 = tpu.reciprocal %275 {approx = true} : vector<8x1xf32> -> vector<8x1xf32>
    %277 = vector.broadcast %276 : vector<8x1xf32> to vector<8x16xf32>
    %278 = arith.mulf %273, %277 : vector<8x16xf32>
    %cst_104 = arith.constant dense<0.000000e+00> : vector<8x8xf32>
    %279 = tpu.matmul %278, %266, %cst_104 {dimension_numbers = #tpu.dot_dimension_numbers<[1], [0], [0], [1], [0, 0, 1, 1], [], []>} : vector<8x16xf32>, vector<16x8xf32>, vector<8x8xf32> -> vector<8x8xf32>
    %c0_105 = arith.constant 0 : index
    %c24_106 = arith.constant 24 : index
    %280 = vector.load %arg17[%c0_105, %c24_106] : memref<16x32xf32, #tpu.memory_space<vmem>>, vector<8x8xf32>
    tpu.vector_store %arg17[%c0_105, %c24_106], %279 {strides = array<i32>} : memref<16x32xf32, #tpu.memory_space<vmem>>, vector<8x8xf32>,
    %281 = vector.extract_strided_slice %204 {offsets = [8, 0], sizes = [8, 8], strides = [1, 1]} : vector<16x32xf32> to vector<8x8xf32>
    %282 = vector.extract_strided_slice %210 {offsets = [16, 0], sizes = [16, 8], strides = [1, 1]} : vector<32x32xf32> to vector<16x8xf32>
    %283 = vector.extract_strided_slice %211 {offsets = [16, 0], sizes = [16, 8], strides = [1, 1]} : vector<32x32xf32> to vector<16x8xf32>
    %284 = tpu.transpose %282, [1, 0] : vector<16x8xf32> -> vector<8x16xf32>
    %cst_107 = arith.constant dense<0.000000e+00> : vector<8x16xf32>
    %285 = tpu.matmul %281, %284, %cst_107 {dimension_numbers = #tpu.dot_dimension_numbers<[1], [0], [0], [1], [0, 0, 1, 1], [], []>} : vector<8x8xf32>, vector<8x16xf32>, vector<8x16xf32> -> vector<8x16xf32>
    %cst_108 = arith.constant dense<0xFF800000> : vector<8xf32>
    %286 = vector.multi_reduction <maximumf>, %285, %cst_108 [1] : vector<8x16xf32> to vector<8xf32>
    %287 = vector.shape_cast %286 : vector<8xf32> to vector<8x1xf32>
    %288 = vector.broadcast %287 : vector<8x1xf32> to vector<8x16xf32>
    %289 = arith.subf %285, %288 : vector<8x16xf32>
    %290 = math.exp %289 : vector<8x16xf32>
    %cst_109 = arith.constant dense<0.000000e+00> : vector<8xf32>
    %291 = vector.multi_reduction <add>, %290, %cst_109 [1] : vector<8x16xf32> to vector<8xf32>
    %292 = vector.shape_cast %291 : vector<8xf32> to vector<8x1xf32>
    %293 = tpu.reciprocal %292 {approx = true} : vector<8x1xf32> -> vector<8x1xf32>
    %294 = vector.broadcast %293 : vector<8x1xf32> to vector<8x16xf32>
    %295 = arith.mulf %290, %294 : vector<8x16xf32>
    %cst_110 = arith.constant dense<0.000000e+00> : vector<8x8xf32>
    %296 = tpu.matmul %295, %283, %cst_110 {dimension_numbers = #tpu.dot_dimension_numbers<[1], [0], [0], [1], [0, 0, 1, 1], [], []>} : vector<8x16xf32>, vector<16x8xf32>, vector<8x8xf32> -> vector<8x8xf32>
    %c8_111 = arith.constant 8 : index
    %c0_112 = arith.constant 0 : index
    %297 = vector.load %arg17[%c8_111, %c0_112] : memref<16x32xf32, #tpu.memory_space<vmem>>, vector<8x8xf32>
    tpu.vector_store %arg17[%c8_111, %c0_112], %296 {strides = array<i32>} : memref<16x32xf32, #tpu.memory_space<vmem>>, vector<8x8xf32>,
    %298 = vector.extract_strided_slice %204 {offsets = [8, 8], sizes = [8, 8], strides = [1, 1]} : vector<16x32xf32> to vector<8x8xf32>
    %299 = vector.extract_strided_slice %210 {offsets = [16, 8], sizes = [16, 8], strides = [1, 1]} : vector<32x32xf32> to vector<16x8xf32>
    %300 = vector.extract_strided_slice %211 {offsets = [16, 8], sizes = [16, 8], strides = [1, 1]} : vector<32x32xf32> to vector<16x8xf32>
    %301 = tpu.transpose %299, [1, 0] : vector<16x8xf32> -> vector<8x16xf32>
    %cst_113 = arith.constant dense<0.000000e+00> : vector<8x16xf32>
    %302 = tpu.matmul %298, %301, %cst_113 {dimension_numbers = #tpu.dot_dimension_numbers<[1], [0], [0], [1], [0, 0, 1, 1], [], []>} : vector<8x8xf32>, vector<8x16xf32>, vector<8x16xf32> -> vector<8x16xf32>
    %cst_114 = arith.constant dense<0xFF800000> : vector<8xf32>
    %303 = vector.multi_reduction <maximumf>, %302, %cst_114 [1] : vector<8x16xf32> to vector<8xf32>
    %304 = vector.shape_cast %303 : vector<8xf32> to vector<8x1xf32>
    %305 = vector.broadcast %304 : vector<8x1xf32> to vector<8x16xf32>
    %306 = arith.subf %302, %305 : vector<8x16xf32>
    %307 = math.exp %306 : vector<8x16xf32>
    %cst_115 = arith.constant dense<0.000000e+00> : vector<8xf32>
    %308 = vector.multi_reduction <add>, %307, %cst_115 [1] : vector<8x16xf32> to vector<8xf32>
    %309 = vector.shape_cast %308 : vector<8xf32> to vector<8x1xf32>
    %310 = tpu.reciprocal %309 {approx = true} : vector<8x1xf32> -> vector<8x1xf32>
    %311 = vector.broadcast %310 : vector<8x1xf32> to vector<8x16xf32>
    %312 = arith.mulf %307, %311 : vector<8x16xf32>
    %cst_116 = arith.constant dense<0.000000e+00> : vector<8x8xf32>
    %313 = tpu.matmul %312, %300, %cst_116 {dimension_numbers = #tpu.dot_dimension_numbers<[1], [0], [0], [1], [0, 0, 1, 1], [], []>} : vector<8x16xf32>, vector<16x8xf32>, vector<8x8xf32> -> vector<8x8xf32>
    %c8_117 = arith.constant 8 : index
    %c8_118 = arith.constant 8 : index
    %314 = vector.load %arg17[%c8_117, %c8_118] : memref<16x32xf32, #tpu.memory_space<vmem>>, vector<8x8xf32>
    tpu.vector_store %arg17[%c8_117, %c8_118], %313 {strides = array<i32>} : memref<16x32xf32, #tpu.memory_space<vmem>>, vector<8x8xf32>,
    %315 = vector.extract_strided_slice %204 {offsets = [8, 16], sizes = [8, 8], strides = [1, 1]} : vector<16x32xf32> to vector<8x8xf32>
    %316 = vector.extract_strided_slice %210 {offsets = [16, 16], sizes = [16, 8], strides = [1, 1]} : vector<32x32xf32> to vector<16x8xf32>
    %317 = vector.extract_strided_slice %211 {offsets = [16, 16], sizes = [16, 8], strides = [1, 1]} : vector<32x32xf32> to vector<16x8xf32>
    %318 = tpu.transpose %316, [1, 0] : vector<16x8xf32> -> vector<8x16xf32>
    %cst_119 = arith.constant dense<0.000000e+00> : vector<8x16xf32>
    %319 = tpu.matmul %315, %318, %cst_119 {dimension_numbers = #tpu.dot_dimension_numbers<[1], [0], [0], [1], [0, 0, 1, 1], [], []>} : vector<8x8xf32>, vector<8x16xf32>, vector<8x16xf32> -> vector<8x16xf32>
    %cst_120 = arith.constant dense<0xFF800000> : vector<8xf32>
    %320 = vector.multi_reduction <maximumf>, %319, %cst_120 [1] : vector<8x16xf32> to vector<8xf32>
    %321 = vector.shape_cast %320 : vector<8xf32> to vector<8x1xf32>
    %322 = vector.broadcast %321 : vector<8x1xf32> to vector<8x16xf32>
    %323 = arith.subf %319, %322 : vector<8x16xf32>
    %324 = math.exp %323 : vector<8x16xf32>
    %cst_121 = arith.constant dense<0.000000e+00> : vector<8xf32>
    %325 = vector.multi_reduction <add>, %324, %cst_121 [1] : vector<8x16xf32> to vector<8xf32>
    %326 = vector.shape_cast %325 : vector<8xf32> to vector<8x1xf32>
    %327 = tpu.reciprocal %326 {approx = true} : vector<8x1xf32> -> vector<8x1xf32>
    %328 = vector.broadcast %327 : vector<8x1xf32> to vector<8x16xf32>
    %329 = arith.mulf %324, %328 : vector<8x16xf32>
    %cst_122 = arith.constant dense<0.000000e+00> : vector<8x8xf32>
    %330 = tpu.matmul %329, %317, %cst_122 {dimension_numbers = #tpu.dot_dimension_numbers<[1], [0], [0], [1], [0, 0, 1, 1], [], []>} : vector<8x16xf32>, vector<16x8xf32>, vector<8x8xf32> -> vector<8x8xf32>
    %c8_123 = arith.constant 8 : index
    %c16_124 = arith.constant 16 : index
    %331 = vector.load %arg17[%c8_123, %c16_124] : memref<16x32xf32, #tpu.memory_space<vmem>>, vector<8x8xf32>
    tpu.vector_store %arg17[%c8_123, %c16_124], %330 {strides = array<i32>} : memref<16x32xf32, #tpu.memory_space<vmem>>, vector<8x8xf32>,
    %332 = vector.extract_strided_slice %204 {offsets = [8, 24], sizes = [8, 8], strides = [1, 1]} : vector<16x32xf32> to vector<8x8xf32>
    %333 = vector.extract_strided_slice %210 {offsets = [16, 24], sizes = [16, 8], strides = [1, 1]} : vector<32x32xf32> to vector<16x8xf32>
    %334 = vector.extract_strided_slice %211 {offsets = [16, 24], sizes = [16, 8], strides = [1, 1]} : vector<32x32xf32> to vector<16x8xf32>
    %335 = tpu.transpose %333, [1, 0] : vector<16x8xf32> -> vector<8x16xf32>
    %cst_125 = arith.constant dense<0.000000e+00> : vector<8x16xf32>
    %336 = tpu.matmul %332, %335, %cst_125 {dimension_numbers = #tpu.dot_dimension_numbers<[1], [0], [0], [1], [0, 0, 1, 1], [], []>} : vector<8x8xf32>, vector<8x16xf32>, vector<8x16xf32> -> vector<8x16xf32>
    %cst_126 = arith.constant dense<0xFF800000> : vector<8xf32>
    %337 = vector.multi_reduction <maximumf>, %336, %cst_126 [1] : vector<8x16xf32> to vector<8xf32>
    %338 = vector.shape_cast %337 : vector<8xf32> to vector<8x1xf32>
    %339 = vector.broadcast %338 : vector<8x1xf32> to vector<8x16xf32>
    %340 = arith.subf %336, %339 : vector<8x16xf32>
    %341 = math.exp %340 : vector<8x16xf32>
    %cst_127 = arith.constant dense<0.000000e+00> : vector<8xf32>
    %342 = vector.multi_reduction <add>, %341, %cst_127 [1] : vector<8x16xf32> to vector<8xf32>
    %343 = vector.shape_cast %342 : vector<8xf32> to vector<8x1xf32>
    %344 = tpu.reciprocal %343 {approx = true} : vector<8x1xf32> -> vector<8x1xf32>
    %345 = vector.broadcast %344 : vector<8x1xf32> to vector<8x16xf32>
    %346 = arith.mulf %341, %345 : vector<8x16xf32>
    %cst_128 = arith.constant dense<0.000000e+00> : vector<8x8xf32>
    %347 = tpu.matmul %346, %334, %cst_128 {dimension_numbers = #tpu.dot_dimension_numbers<[1], [0], [0], [1], [0, 0, 1, 1], [], []>} : vector<8x16xf32>, vector<16x8xf32>, vector<8x8xf32> -> vector<8x8xf32>
    %c8_129 = arith.constant 8 : index
    %c24_130 = arith.constant 24 : index
    %348 = vector.load %arg17[%c8_129, %c24_130] : memref<16x32xf32, #tpu.memory_space<vmem>>, vector<8x8xf32>
    tpu.vector_store %arg17[%c8_129, %c24_130], %347 {strides = array<i32>} : memref<16x32xf32, #tpu.memory_space<vmem>>, vector<8x8xf32>,
    %c0_131 = arith.constant 0 : index
    %c0_132 = arith.constant 0 : index
    %349 = vector.load %arg17[%c0_131, %c0_132] : memref<16x32xf32, #tpu.memory_space<vmem>>, vector<16x32xf32>
    %cst_133 = arith.constant dense<0.000000e+00> : vector<16x32xf32>
    %350 = tpu.matmul %349, %212, %cst_133 {dimension_numbers = #tpu.dot_dimension_numbers<[1], [0], [0], [1], [0, 0, 1, 1], [], []>} : vector<16x32xf32>, vector<32x32xf32>, vector<16x32xf32> -> vector<16x32xf32>
    %351 = vector.broadcast %14 : vector<1x32xf32> to vector<16x32xf32>
    %352 = arith.addf %350, %351 : vector<16x32xf32>
    %cst_134 = arith.constant dense<0.000000e+00> : vector<16xf32>
    %353 = vector.multi_reduction <add>, %352, %cst_134 [1] : vector<16x32xf32> to vector<16xf32>
    %354 = vector.shape_cast %353 : vector<16xf32> to vector<16x1xf32>
    %cst_135 = arith.constant 3.200000e+01 : f32
    %355 = vector.broadcast %cst_135 : f32 to vector<16x1xf32>
    %356 = arith.divf %354, %355 : vector<16x1xf32>
    %357 = vector.broadcast %356 : vector<16x1xf32> to vector<16x32xf32>
    %358 = arith.subf %352, %357 : vector<16x32xf32>
    %359 = arith.mulf %358, %358 : vector<16x32xf32>
    %cst_136 = arith.constant dense<0.000000e+00> : vector<16xf32>
    %360 = vector.multi_reduction <add>, %359, %cst_136 [1] : vector<16x32xf32> to vector<16xf32>
    %361 = vector.shape_cast %360 : vector<16xf32> to vector<16x1xf32>
    %cst_137 = arith.constant 3.200000e+01 : f32
    %362 = vector.broadcast %cst_137 : f32 to vector<16x1xf32>
    %363 = arith.divf %361, %362 : vector<16x1xf32>
    %364 = vector.broadcast %356 : vector<16x1xf32> to vector<16x32xf32>
    %365 = arith.subf %352, %364 : vector<16x32xf32>
    %cst_138 = arith.constant 9.99999974E-6 : f32
    %366 = vector.broadcast %cst_138 : f32 to vector<16x1xf32>
    %367 = arith.addf %363, %366 : vector<16x1xf32>
    %368 = math.rsqrt %367 : vector<16x1xf32>
    %369 = vector.broadcast %368 : vector<16x1xf32> to vector<16x32xf32>
    %370 = arith.mulf %365, %369 : vector<16x32xf32>
    %371 = vector.broadcast %15 : vector<1x32xf32> to vector<16x32xf32>
    %372 = arith.mulf %370, %371 : vector<16x32xf32>
    %373 = vector.broadcast %16 : vector<1x32xf32> to vector<16x32xf32>
    %374 = arith.addf %372, %373 : vector<16x32xf32>
    %375 = arith.addf %199, %374 : vector<16x32xf32>
    %c0_139 = arith.constant 0 : index
    %c0_140 = arith.constant 0 : index
    %376 = vector.load %arg12[%c0_139, %c0_140] : memref<32x64xf32, #tpu.memory_space<vmem>>, vector<32x64xf32>
    %cst_141 = arith.constant dense<0.000000e+00> : vector<16x64xf32>
    %377 = tpu.matmul %375, %376, %cst_141 {dimension_numbers = #tpu.dot_dimension_numbers<[1], [0], [0], [1], [0, 0, 1, 1], [], []>} : vector<16x32xf32>, vector<32x64xf32>, vector<16x64xf32> -> vector<16x64xf32>
    %c0_142 = arith.constant 0 : index
    %c0_143 = arith.constant 0 : index
    %378 = vector.load %arg13[%c0_142, %c0_143] : memref<1x64xf32, #tpu.memory_space<vmem>>, vector<1x64xf32>
    %379 = vector.broadcast %378 : vector<1x64xf32> to vector<16x64xf32>
    %380 = arith.addf %377, %379 : vector<16x64xf32>
    %cst_144 = arith.constant 0.000000e+00 : f32
    %381 = vector.broadcast %cst_144 : f32 to vector<16x64xf32>
    %382 = arith.maximumf %380, %381 : vector<16x64xf32>
    %c0_145 = arith.constant 0 : index
    %c0_146 = arith.constant 0 : index
    %383 = vector.load %arg14[%c0_145, %c0_146] : memref<64x32xf32, #tpu.memory_space<vmem>>, vector<64x32xf32>
    %cst_147 = arith.constant dense<0.000000e+00> : vector<16x32xf32>
    %384 = tpu.matmul %382, %383, %cst_147 {dimension_numbers = #tpu.dot_dimension_numbers<[1], [0], [0], [1], [0, 0, 1, 1], [], []>} : vector<16x64xf32>, vector<64x32xf32>, vector<16x32xf32> -> vector<16x32xf32>
    %385 = vector.broadcast %17 : vector<1x32xf32> to vector<16x32xf32>
    %386 = arith.addf %384, %385 : vector<16x32xf32>
    %cst_148 = arith.constant dense<0.000000e+00> : vector<16xf32>
    %387 = vector.multi_reduction <add>, %386, %cst_148 [1] : vector<16x32xf32> to vector<16xf32>
    %388 = vector.shape_cast %387 : vector<16xf32> to vector<16x1xf32>
    %cst_149 = arith.constant 3.200000e+01 : f32
    %389 = vector.broadcast %cst_149 : f32 to vector<16x1xf32>
    %390 = arith.divf %388, %389 : vector<16x1xf32>
    %391 = vector.broadcast %390 : vector<16x1xf32> to vector<16x32xf32>
    %392 = arith.subf %386, %391 : vector<16x32xf32>
    %393 = arith.mulf %392, %392 : vector<16x32xf32>
    %cst_150 = arith.constant dense<0.000000e+00> : vector<16xf32>
    %394 = vector.multi_reduction <add>, %393, %cst_150 [1] : vector<16x32xf32> to vector<16xf32>
    %395 = vector.shape_cast %394 : vector<16xf32> to vector<16x1xf32>
    %cst_151 = arith.constant 3.200000e+01 : f32
    %396 = vector.broadcast %cst_151 : f32 to vector<16x1xf32>
    %397 = arith.divf %395, %396 : vector<16x1xf32>
    %398 = vector.broadcast %390 : vector<16x1xf32> to vector<16x32xf32>
    %399 = arith.subf %386, %398 : vector<16x32xf32>
    %cst_152 = arith.constant 9.99999974E-6 : f32
    %400 = vector.broadcast %cst_152 : f32 to vector<16x1xf32>
    %401 = arith.addf %397, %400 : vector<16x1xf32>
    %402 = math.rsqrt %401 : vector<16x1xf32>
    %403 = vector.broadcast %402 : vector<16x1xf32> to vector<16x32xf32>
    %404 = arith.mulf %399, %403 : vector<16x32xf32>
    %405 = vector.broadcast %18 : vector<1x32xf32> to vector<16x32xf32>
    %406 = arith.mulf %404, %405 : vector<16x32xf32>
    %407 = vector.broadcast %19 : vector<1x32xf32> to vector<16x32xf32>
    %408 = arith.addf %406, %407 : vector<16x32xf32>
    %409 = arith.addf %375, %408 : vector<16x32xf32>
    %410 = vector.shape_cast %409 : vector<16x32xf32> to vector<2x8x32xf32>
    %c0_153 = arith.constant 0 : index
    %c0_154 = arith.constant 0 : index
    %c0_155 = arith.constant 0 : index
    %411 = vector.load %arg16[%c0_153, %c0_154, %c0_155] : memref<2x8x32xf32, #tpu.memory_space<vmem>>, vector<2x8x32xf32>
    tpu.vector_store %arg16[%c0_153, %c0_154, %c0_155], %410 {strides = array<i32>} : memref<2x8x32xf32, #tpu.memory_space<vmem>>, vector<2x8x32xf32>,
    return
  }
  func.func @transform_0(%arg0: i32) -> (i32, i32, i32) {
    %c0_i32 = arith.constant 0 : i32
    %c0_i32_0 = arith.constant 0 : i32
    %c0_i32_1 = arith.constant 0 : i32
    return %arg0, %c0_i32, %c0_i32_0 : i32, i32, i32
  }
  func.func @transform_1(%arg0: i32) -> (i32, i32, i32) {
    %c0_i32 = arith.constant 0 : i32
    %c0_i32_0 = arith.constant 0 : i32
    %c0_i32_1 = arith.constant 0 : i32
    return %arg0, %c0_i32, %c0_i32_0 : i32, i32, i32
  }
  func.func @transform_2(%arg0: i32) -> (i32, i32) {
    %c0_i32 = arith.constant 0 : i32
    %c0_i32_0 = arith.constant 0 : i32
    %c0_i32_1 = arith.constant 0 : i32
    return %c0_i32, %c0_i32_0 : i32, i32
  }
  func.func @transform_3(%arg0: i32) -> (i32, i32) {
    %c0_i32 = arith.constant 0 : i32
    %c0_i32_0 = arith.constant 0 : i32
    %c0_i32_1 = arith.constant 0 : i32
    return %c0_i32, %c0_i32_0 : i32, i32
  }
  func.func @transform_4(%arg0: i32) -> (i32, i32) {
    %c0_i32 = arith.constant 0 : i32
    %c0_i32_0 = arith.constant 0 : i32
    %c0_i32_1 = arith.constant 0 : i32
    return %c0_i32, %c0_i32_0 : i32, i32
  }
  func.func @transform_5(%arg0: i32) -> (i32, i32) {
    %c0_i32 = arith.constant 0 : i32
    %c0_i32_0 = arith.constant 0 : i32
    %c0_i32_1 = arith.constant 0 : i32
    return %c0_i32, %c0_i32_0 : i32, i32
  }
  func.func @transform_6(%arg0: i32) -> (i32, i32) {
    %c0_i32 = arith.constant 0 : i32
    %c0_i32_0 = arith.constant 0 : i32
    %c0_i32_1 = arith.constant 0 : i32
    return %c0_i32, %c0_i32_0 : i32, i32
  }
  func.func @transform_7(%arg0: i32) -> (i32, i32) {
    %c0_i32 = arith.constant 0 : i32
    %c0_i32_0 = arith.constant 0 : i32
    %c0_i32_1 = arith.constant 0 : i32
    return %c0_i32, %c0_i32_0 : i32, i32
  }
  func.func @transform_8(%arg0: i32) -> (i32, i32) {
    %c0_i32 = arith.constant 0 : i32
    %c0_i32_0 = arith.constant 0 : i32
    %c0_i32_1 = arith.constant 0 : i32
    return %c0_i32, %c0_i32_0 : i32, i32
  }
  func.func @transform_9(%arg0: i32) -> (i32, i32) {
    %c0_i32 = arith.constant 0 : i32
    %c0_i32_0 = arith.constant 0 : i32
    %c0_i32_1 = arith.constant 0 : i32
    return %c0_i32, %c0_i32_0 : i32, i32
  }
  func.func @transform_10(%arg0: i32) -> (i32, i32) {
    %c0_i32 = arith.constant 0 : i32
    %c0_i32_0 = arith.constant 0 : i32
    %c0_i32_1 = arith.constant 0 : i32
    return %c0_i32, %c0_i32_0 : i32, i32
  }
  func.func @transform_11(%arg0: i32) -> (i32, i32) {
    %c0_i32 = arith.constant 0 : i32
    %c0_i32_0 = arith.constant 0 : i32
    %c0_i32_1 = arith.constant 0 : i32
    return %c0_i32, %c0_i32_0 : i32, i32
  }
  func.func @transform_12(%arg0: i32) -> (i32, i32) {
    %c0_i32 = arith.constant 0 : i32
    %c0_i32_0 = arith.constant 0 : i32
    %c0_i32_1 = arith.constant 0 : i32
    return %c0_i32, %c0_i32_0 : i32, i32
  }
  func.func @transform_13(%arg0: i32) -> (i32, i32) {
    %c0_i32 = arith.constant 0 : i32
    %c0_i32_0 = arith.constant 0 : i32
    %c0_i32_1 = arith.constant 0 : i32
    return %c0_i32, %c0_i32_0 : i32, i32
  }
  func.func @transform_14(%arg0: i32) -> (i32, i32) {
    %c0_i32 = arith.constant 0 : i32
    %c0_i32_0 = arith.constant 0 : i32
    %c0_i32_1 = arith.constant 0 : i32
    return %c0_i32, %c0_i32_0 : i32, i32
  }
  func.func @transform_15(%arg0: i32) -> (i32, i32, i32) {
    %c0_i32 = arith.constant 0 : i32
    %c0_i32_0 = arith.constant 0 : i32
    %c0_i32_1 = arith.constant 0 : i32
    return %arg0, %c0_i32, %c0_i32_0 : i32, i32, i32
  }
}

</mosaic_0001>

<bundles_post_ra>
// kernel: tpu_custom_call.1
= control target key start
LH: loop header
LB: loop body
LE: loop exit
PB: predicated region body
PF: predicated region fallthrough
CT: control target
= control target key end

     0   :  { %s6668_s0 = inlined_call_operand.vmem [shape: f32[4,8,32], index: 0, kind: input, shape index: {}]   ;;  %s6669_s1 = inlined_call_operand.vmem [shape: f32[4,16,32], index: 1, kind: input, shape index: {}]   ;;  %s6670_s2 = inlined_call_operand.hbm [shape: f32[8,8], index: 2, kind: input, shape index: {}]   ;;  %s6671_s3 = inlined_call_operand.hbm [shape: f32[32,96], index: 3, kind: input, shape index: {}]   ;;  %s6672_s4 = inlined_call_operand.vmem [shape: f32[1,96], index: 4, kind: input, shape index: {}]   ;;  %s6673_s5 = inlined_call_operand.hbm [shape: f32[32,32], index: 5, kind: input, shape index: {}]   ;;  %s6674_s6 = inlined_call_operand.hbm [shape: f32[32,32], index: 6, kind: input, shape index: {}]   ;;  %s6675_s7 = inlined_call_operand.hbm [shape: f32[1,32], index: 7, kind: input, shape index: {}]   ;;  %s6676_s8 = inlined_call_operand.hbm [shape: f32[32,64], index: 8, kind: input, shape index: {}]   ;;  %s6677_s9 = inlined_call_operand.hbm [shape: f32[1,64], index: 9, kind: input, shape index: {}]   ;;  %s6678_s10 = inlined_call_operand.hbm [shape: f32[32,32], index: 10, kind: input, shape index: {}]   ;;  %s6679_s11 = inlined_call_operand.hbm [shape: f32[32,64], index: 11, kind: input, shape index: {}]   ;;  %s6680_s12 = inlined_call_operand.hbm [shape: f32[1,64], index: 12, kind: input, shape index: {}]   ;;  %s6681_s13 = inlined_call_operand.vmem [shape: f32[64,32], index: 13, kind: input, shape index: {}]   ;;  %s6682_s14 = inlined_call_operand.vmem [shape: f32[9,32], index: 14, kind: input, shape index: {}]   ;;  %s6683_s15 = inlined_call_operand.hbm [shape: f32[4,8,32], index: 15, kind: output, shape index: {}]  }
   0x1   :  { %6698 = sst [smem:[#allocation36_spill]] %s6669_s1 }
   0x2   :  { %6699 = sst [smem:[#allocation37_spill]] %s6671_s3 }
   0x3   :  { %6700 = sst [smem:[#allocation38_spill]] %s6681_s13 }
   0x4   :  { %6701 = sst [smem:[#allocation39_spill]] %s6683_s15 }
   0x5   :  { %20 = vsyncpa [#allocation4], 0 }
   0x6   :  { %21 = vsyncpa [#allocation7], 0 }
   0x7   :  { %22 = vsyncpa [#allocation10], 0 }
   0x8   :  { %23 = vsyncpa [#allocation13], 0 }
   0x9   :  { %24 = vsyncpa [#allocation16], 0 }
   0xa   :  { %25 = vsyncpa [#allocation19], 0 }
   0xb   :  { %26 = vsyncpa [#allocation5], 0 }
   0xc   :  { %28 = vsyncpa [#allocation5 + $0x1], 0  ;;  %s5829_s18 = smov 0   ;;  %s5831_s19 = smov 0  }
   0xd   :  { %s5833_s20 = smov 0   ;;  %s5835_s21 = smov 0  }
   0xe LB: > { %6702 = sst [smem:[#allocation28_spill]] %s5703_s18  ;;  %s5850_s22 = sadd.s32 4294967295, %s5715_s21   ;;  %s5715_s21 = sphi %s5835_s21, %s6742_s21   ;;  %s5711_s20 = sphi %s5833_s20, %s6745_s20   ;;  %s5707_s19 = sphi %s5831_s19, %s6744_s19   ;;  %s5703_s18 = sphi %s5829_s18, %s6743_s18  }
   0xf   : > { %6703 = sst [smem:[#allocation29_spill]] %s5707_s19  ;;  %s4399_s23 = sadd.s32 4294967294, %s5715_s21  }
  0x10   : > { %6704 = sst [smem:[#allocation30_spill]] %s5711_s20  ;;  %s5854_s24 = sadd.s32 1, %s5715_s21  }
  0x11   : > { %6705 = sst [smem:[#allocation31_spill]] %s5715_s21  ;;  %s366_s25 = sadd.s32 1, %s5711_s20 }
  0x12   : > { %6706 = sst [smem:[#allocation32_spill]] %s5854_s24  ;;  %s363_s26 = ssub.s32 %s5715_s21, %s5854_s24 }
  0x13   : > { %p376_p0 = scmp.ne.s32.totalorder %s5711_s20, %s5707_s19  ;;  %p364_p1 = scmp.eq.s32.totalorder %s363_s26, 0 }
  0x14   : > { %p377_p2 = scmp.eq.s32.totalorder %s5850_s22, 1  ;;  %p382_p3 = scmp.ne.s32.totalorder %s5707_s19, %s5703_s18 }
  0x15   : > { %p383_p4 = scmp.eq.s32.totalorder %s4399_s23, 1  ;;  %p4400_p7 = scmp.ge.s32.totalorder %s5715_s21, 1 }
  0x16   : > { %s5865_s27 = scalar_select %p364_p1, %s5711_s20, %s366_s25  }
  0x17   : > { %p5867_p5 = por %p377_p2, %p376_p0  ;;  %p5871_p6 = por %p383_p4, %p382_p3 }
  0x18   : > { %6707 = sst [smem:[#allocation33_spill]] %s5865_s27  ;;  %p390_p8 = scmp.lt.s32.totalorder %s5715_s21, 3 }
  0x19   : > { %s6708_s28 = scalar_select %p5867_p5, 1, 0 }
  0x1a   : > { %s6710_s29 = scalar_select %p5871_p6, 1, 0 }
  0x1b   : > { %6709 = sst [smem:[#allocation34_spill]] %s6708_s28  ;;  %p6691_p9 = scmp.eq.s32.totalorder %s5850_s22, 0 }
  0x1c   : > { %6711 = sst [smem:[#allocation35_spill]] %s6710_s29  ;;  %p5878_p10 = pnand %p4400_p7, %p390_p8 }
  0x1d   : > { %s5717_s16 = smov [#allocation6]   ;;  %s5718_s25 = smov [#allocation9]  }
  0x1e   : > { %s6712_s30 = scalar_select %p5878_p10, 1, 0 }
  0x1f   : > { %s413_s17 = sshll.u32 %s5717_s16, 4  ;;  %p5083_p11 = pneg %p5878_p10  ;;  %s5884_s17 = int_to_ptr.vmem [resolvable:$true] %s413_s17 }
  0x20   : > { %s442_s26 = sshll.u32 %s5718_s25, 4  ;;  %s5719_s27 = smov [#allocation12]   ;;  %s5892_s26 = int_to_ptr.vmem [resolvable:$true] %s442_s26 }
  0x21   : > { %p5888_p12 = pnand %p6691_p9, %p5083_p11  ;;  %s5894_s20 = sshll.u32 %s5719_s27, 4  ;;  %s467_s20 = int_to_ptr.vmem [resolvable:$true] %s5894_s20 }
  0x22   : > { %s6714_s3 = sld [smem:[#allocation37_spill]] }
  0x23   : > { %p5904_p0 = pneg %p5888_p12 }
  0x28   : > { %s5349_s16 = scalar_lea.hbm %s6714_s3, 512 }
  0x29   : > { %p5350_p13 = scmp.ne.s32.totalorder %s6714_s3, %s5349_s16  ;;  %p5356_p3 = scmp.lt.u32.totalorder %s5349_s16, %s6714_s3 }
  0x2b   : > { %p5352_p1 = pnand %p5904_p0, %p5350_p13 }
  0x2d   : > { %p5353_p2 = pneg %p5352_p1 }
  0x2f   : > { %p5358_p4 = pnand %p5356_p3, %p5353_p2 }
  0x31   : > { %5361 = shalt.err (!%p5358_p4)
}
  0x32   : > { %s5362_s18 = scalar_lea.vmem %s5884_s17, 512  ;;  %p5370_p9 = scmp.lt.s32.totalorder %s5884_s17, %s5884_s17 }
  0x33   : > { %p5363_p7 = scmp.ne.s32.totalorder %s5884_s17, %s5362_s18  ;;  %p5371_p6 = scmp.lt.s32.totalorder %s5362_s18, %s5362_s18 }
  0x35   : > { %p5365_p8 = pnand %p5363_p7, %p5904_p0  ;;  %p5372_p13 = por %p5371_p6, %p5370_p9 }
  0x37   : > { %p5366_p11 = pneg %p5365_p8 }
  0x39   : > { %p5373_p1 = pnand %p5372_p13, %p5366_p11 }
  0x3b   : > { %5376 = shalt.err (!%p5373_p1)
}
  0x3c   : > { %s5720_s21 = smov 128   ;;  %s5721_s24 = smov 8  }
  0x3d   : > { %5089 = dma.hbm_to_vmem [thread:$0]  (!%p5888_p12), %s6714_s3, 512, %s5884_s17, [#allocation7], %s5720_s21, %s5720_s21, %s5721_s24  }
  0x3e   : > { %s5377_s18 = scalar_lea.hbm %s6674_s6, 512 }
  0x3f   : > { %p5378_p6 = scmp.ne.s32.totalorder %s6674_s6, %s5377_s18  ;;  %p5384_p3 = scmp.lt.u32.totalorder %s5377_s18, %s6674_s6 }
  0x41   : > { %p5380_p9 = pnand %p5378_p6, %p5904_p0 }
  0x43   : > { %p5381_p2 = pneg %p5380_p9 }
  0x45   : > { %p5386_p4 = pnand %p5384_p3, %p5381_p2 }
  0x47   : > { %5389 = shalt.err (!%p5386_p4)
}
  0x48   : > { %s5390_s17 = scalar_lea.vmem %s5892_s26, 512  ;;  %p5398_p13 = scmp.lt.s32.totalorder %s5892_s26, %s5892_s26 }
  0x49   : > { %p5391_p7 = scmp.ne.s32.totalorder %s5892_s26, %s5390_s17  ;;  %p5399_p1 = scmp.lt.s32.totalorder %s5390_s17, %s5390_s17 }
  0x4b   : > { %p5393_p8 = pnand %p5391_p7, %p5904_p0  ;;  %p5400_p6 = por %p5399_p1, %p5398_p13 }
  0x4d   : > { %p5394_p11 = pneg %p5393_p8 }
  0x4f   : > { %p5401_p9 = pnand %p5400_p6, %p5394_p11 }
  0x51   : > { %5404 = shalt.err (!%p5401_p9)
}
  0x52   : > { %5095 = dma.hbm_to_vmem [thread:$0]  (!%p5888_p12), %s6674_s6, 512, %s5892_s26, [#allocation10], %s5720_s21, %s5720_s21, %s5721_s24  }
  0x53   : > { %s5405_s29 = scalar_lea.hbm %s6676_s8, 512 }
  0x54   : > { %p5406_p2 = scmp.ne.s32.totalorder %s6676_s8, %s5405_s29  ;;  %p5412_p7 = scmp.lt.u32.totalorder %s5405_s29, %s6676_s8 }
  0x56   : > { %p5408_p3 = pnand %p5406_p2, %p5904_p0 }
  0x58   : > { %p5409_p4 = pneg %p5408_p3 }
  0x5a   : > { %p5414_p8 = pnand %p5412_p7, %p5409_p4 }
  0x5c   : > { %5417 = shalt.err (!%p5414_p8)
}
  0x5d   : > { %s5418_s17 = scalar_lea.vmem %s467_s20, 512  ;;  %p5426_p6 = scmp.lt.s32.totalorder %s467_s20, %s467_s20 }
  0x5e   : > { %p5419_p11 = scmp.ne.s32.totalorder %s467_s20, %s5418_s17  ;;  %p5427_p9 = scmp.lt.s32.totalorder %s5418_s17, %s5418_s17 }
  0x60   : > { %p5421_p13 = pnand %p5419_p11, %p5904_p0  ;;  %p5428_p5 = por %p5427_p9, %p5426_p6 }
  0x62   : > { %p5422_p1 = pneg %p5421_p13 }
  0x64   : > { %p5429_p10 = pnand %p5428_p5, %p5422_p1 }
  0x66   : > { %5432 = shalt.err (!%p5429_p10)
}
  0x67   : > { %5101 = dma.hbm_to_vmem [thread:$0]  (!%p5888_p12), %s6676_s8, 512, %s467_s20, [#allocation13], %s5720_s21, %s5720_s21, %s5721_s24  }
  0x68   : > { %s5722_s13 = smov [#allocation15]   ;;  %s5723_s28 = smov [#allocation3]  }
  0x69   : > { %s490_s19 = sshll.u32 %s5722_s13, 4  ;;  %s403_s29 = sshll.u32 %s5723_s28, 4  ;;  %s491_s19 = int_to_ptr.vmem [resolvable:$true] %s490_s19  ;;  %s404_s29 = int_to_ptr.vmem [resolvable:$true] %s403_s29 }
  0x6a   : > { %s5433_s27 = scalar_lea.hbm %s6678_s10, 512 }
  0x6b   : > { %p5434_p5 = scmp.ne.s32.totalorder %s6678_s10, %s5433_s27  ;;  %p5440_p3 = scmp.lt.u32.totalorder %s5433_s27, %s6678_s10 }
  0x6d   : > { %p5436_p10 = pnand %p5434_p5, %p5904_p0 }
  0x6f   : > { %p5437_p2 = pneg %p5436_p10 }
  0x71   : > { %p5442_p4 = pnand %p5440_p3, %p5437_p2 }
  0x73   : > { %5445 = shalt.err (!%p5442_p4)
}
  0x74   : > { %s5446_s20 = scalar_lea.vmem %s491_s19, 512  ;;  %p5454_p13 = scmp.lt.s32.totalorder %s491_s19, %s491_s19 }
  0x75   : > { %p5447_p7 = scmp.ne.s32.totalorder %s491_s19, %s5446_s20  ;;  %p5455_p1 = scmp.lt.s32.totalorder %s5446_s20, %s5446_s20 }
  0x77   : > { %p5449_p8 = pnand %p5447_p7, %p5904_p0  ;;  %p5456_p6 = por %p5455_p1, %p5454_p13 }
  0x79   : > { %p5450_p11 = pneg %p5449_p8 }
  0x7b   : > { %p5457_p9 = pnand %p5456_p6, %p5450_p11 }
  0x7d   : > { %5460 = shalt.err (!%p5457_p9)
}
  0x7e   : > { %5107 = dma.hbm_to_vmem [thread:$0]  (!%p5888_p12), %s6678_s10, 512, %s491_s19, [#allocation16], %s5720_s21, %s5720_s21, %s5721_s24  }
  0x7f   : > { %s5461_s16 = scalar_lea.hbm %s6670_s2, 128 }
  0x80   : > { %p5462_p5 = scmp.ne.s32.totalorder %s6670_s2, %s5461_s16  ;;  %p5468_p3 = scmp.lt.u32.totalorder %s5461_s16, %s6670_s2 }
  0x82   : > { %p5464_p10 = pnand %p5462_p5, %p5904_p0 }
  0x84   : > { %p5465_p2 = pneg %p5464_p10 }
  0x86   : > { %p5470_p4 = pnand %p5468_p3, %p5465_p2 }
  0x88   : > { %5473 = shalt.err (!%p5470_p4)
}
  0x89   : > { %s5474_s26 = scalar_lea.vmem %s404_s29, 128  ;;  %p5482_p13 = scmp.lt.s32.totalorder %s404_s29, %s404_s29 }
  0x8a   : > { %p5475_p7 = scmp.ne.s32.totalorder %s404_s29, %s5474_s26  ;;  %p5483_p1 = scmp.lt.s32.totalorder %s5474_s26, %s5474_s26 }
  0x8c   : > { %p5477_p8 = pnand %p5475_p7, %p5904_p0  ;;  %p5484_p6 = por %p5483_p1, %p5482_p13 }
  0x8e   : > { %p5478_p11 = pneg %p5477_p8 }
  0x90   : > { %p5485_p9 = pnand %p5484_p6, %p5478_p11 }
  0x92   : > { %5488 = shalt.err (!%p5485_p9)
}
  0x93   : > { %5086 = dma.hbm_to_vmem [thread:$0]  (!%p5888_p12), %s6670_s2, 128, %s404_s29, [#allocation4]  }
  0x94   : > { %s5724_s3 = smov [#allocation8]   ;;  %s5725_s13 = smov [#allocation11]  }
  0x95   : > { %s429_s1 = sshll.u32 %s5724_s3, 4  ;;  %s456_s28 = sshll.u32 %s5725_s13, 4  ;;  %s430_s1 = int_to_ptr.vmem [resolvable:$true] %s429_s1  ;;  %s457_s28 = int_to_ptr.vmem [resolvable:$true] %s456_s28 }
  0x96   : > { %s5489_s27 = scalar_lea.hbm %s6673_s5, 512 }
  0x97   : > { %p5490_p5 = scmp.ne.s32.totalorder %s6673_s5, %s5489_s27  ;;  %p5496_p3 = scmp.lt.u32.totalorder %s5489_s27, %s6673_s5 }
  0x99   : > { %p5492_p10 = pnand %p5490_p5, %p5904_p0 }
  0x9b   : > { %p5493_p2 = pneg %p5492_p10 }
  0x9d   : > { %p5498_p4 = pnand %p5496_p3, %p5493_p2 }
  0x9f   : > { %5501 = shalt.err (!%p5498_p4)
}
  0xa0   : > { %s5502_s29 = scalar_lea.vmem %s430_s1, 512  ;;  %p5510_p13 = scmp.lt.s32.totalorder %s430_s1, %s430_s1 }
  0xa1   : > { %p5503_p7 = scmp.ne.s32.totalorder %s430_s1, %s5502_s29  ;;  %p5511_p1 = scmp.lt.s32.totalorder %s5502_s29, %s5502_s29 }
  0xa3   : > { %p5505_p8 = pnand %p5503_p7, %p5904_p0  ;;  %p5512_p6 = por %p5511_p1, %p5510_p13 }
  0xa5   : > { %p5506_p11 = pneg %p5505_p8 }
  0xa7   : > { %p5513_p9 = pnand %p5512_p6, %p5506_p11 }
  0xa9   : > { %5516 = shalt.err (!%p5513_p9)
}
  0xaa   : > { %5092 = dma.hbm_to_vmem [thread:$0]  (!%p5888_p12), %s6673_s5, 512, %s430_s1, [#allocation7], %s5720_s21, %s5720_s21, %s5721_s24  }
  0xab   : > { %s5517_s25 = scalar_lea.hbm %s6675_s7, 16 }
  0xac   : > { %p5518_p5 = scmp.ne.s32.totalorder %s6675_s7, %s5517_s25  ;;  %p5524_p3 = scmp.lt.u32.totalorder %s5517_s25, %s6675_s7 }
  0xae   : > { %p5520_p10 = pnand %p5518_p5, %p5904_p0 }
  0xb0   : > { %p5521_p2 = pneg %p5520_p10 }
  0xb2   : > { %p5526_p4 = pnand %p5524_p3, %p5521_p2 }
  0xb4   : > { %5529 = shalt.err (!%p5526_p4)
}
  0xb5   : > { %s5530_s19 = scalar_lea.vmem %s457_s28, 16  ;;  %s5537_s1 = scalar_lea.vmem %s457_s28, 32 }
  0xb6   : > { %p5531_p7 = scmp.ne.s32.totalorder %s457_s28, %s5530_s19  ;;  %p5538_p13 = scmp.lt.s32.totalorder %s457_s28, %s457_s28 }
  0xb7   : > { %p5539_p1 = scmp.lt.s32.totalorder %s5537_s1, %s5530_s19 }
  0xb8   : > { %p5533_p8 = pnand %p5531_p7, %p5904_p0 }
  0xb9   : > { %p5540_p6 = por %p5539_p1, %p5538_p13 }
  0xba   : > { %p5534_p11 = pneg %p5533_p8 }
  0xbc   : > { %p5541_p9 = pnand %p5540_p6, %p5534_p11 }
  0xbe   : > { %5544 = shalt.err (!%p5541_p9)
}
  0xbf   : > { %5098 = dma.hbm_to_vmem [thread:$0]  (!%p5888_p12), %s6675_s7, 16, %s457_s28, [#allocation10]  }
  0xc0   : > { %s5726_s3 = smov [#allocation14]   ;;  %s5727_s16 = smov [#allocation17]  }
  0xc1   : > { %s480_s13 = sshll.u32 %s5726_s3, 4  ;;  %s503_s25 = sshll.u32 %s5727_s16, 4  ;;  %s481_s13 = int_to_ptr.vmem [resolvable:$true] %s480_s13  ;;  %s504_s25 = int_to_ptr.vmem [resolvable:$true] %s503_s25 }
  0xc2   : > { %s5545_s17 = scalar_lea.hbm %s6677_s9, 16 }
  0xc3   : > { %p5546_p5 = scmp.ne.s32.totalorder %s6677_s9, %s5545_s17  ;;  %p5552_p3 = scmp.lt.u32.totalorder %s5545_s17, %s6677_s9 }
  0xc5   : > { %p5548_p10 = pnand %p5546_p5, %p5904_p0 }
  0xc7   : > { %p5549_p2 = pneg %p5548_p10 }
  0xc9   : > { %p5554_p4 = pnand %p5552_p3, %p5549_p2 }
  0xcb   : > { %5557 = shalt.err (!%p5554_p4)
}
  0xcc   : > { %s5558_s28 = scalar_lea.vmem %s481_s13, 16  ;;  %s5565_s20 = scalar_lea.vmem %s481_s13, 32 }
  0xcd   : > { %p5559_p7 = scmp.ne.s32.totalorder %s481_s13, %s5558_s28  ;;  %p5566_p13 = scmp.lt.s32.totalorder %s481_s13, %s481_s13 }
  0xce   : > { %p5567_p1 = scmp.lt.s32.totalorder %s5565_s20, %s5558_s28 }
  0xcf   : > { %p5561_p8 = pnand %p5559_p7, %p5904_p0 }
  0xd0   : > { %p5568_p6 = por %p5567_p1, %p5566_p13 }
  0xd1   : > { %p5562_p11 = pneg %p5561_p8 }
  0xd3   : > { %p5569_p9 = pnand %p5568_p6, %p5562_p11 }
  0xd5   : > { %5572 = shalt.err (!%p5569_p9)
}
  0xd6   : > { %5104 = dma.hbm_to_vmem [thread:$0]  (!%p5888_p12), %s6677_s9, 16, %s481_s13, [#allocation13]  }
  0xd7   : > { %s5573_s17 = scalar_lea.hbm %s6679_s11, 512 }
  0xd8   : > { %p5574_p5 = scmp.ne.s32.totalorder %s6679_s11, %s5573_s17  ;;  %p5580_p3 = scmp.lt.u32.totalorder %s5573_s17, %s6679_s11 }
  0xda   : > { %p5576_p10 = pnand %p5574_p5, %p5904_p0 }
  0xdc   : > { %p5577_p2 = pneg %p5576_p10 }
  0xde   : > { %p5582_p4 = pnand %p5580_p3, %p5577_p2 }
  0xe0   : > { %5585 = shalt.err (!%p5582_p4)
}
  0xe1   : > { %s5586_s28 = scalar_lea.vmem %s504_s25, 512  ;;  %p5594_p13 = scmp.lt.s32.totalorder %s504_s25, %s504_s25 }
  0xe2   : > { %p5587_p7 = scmp.ne.s32.totalorder %s504_s25, %s5586_s28  ;;  %p5595_p1 = scmp.lt.s32.totalorder %s5586_s28, %s5586_s28 }
  0xe4   : > { %p5589_p8 = pnand %p5587_p7, %p5904_p0  ;;  %p5596_p6 = por %p5595_p1, %p5594_p13 }
  0xe6   : > { %p5590_p11 = pneg %p5589_p8 }
  0xe8   : > { %p5597_p9 = pnand %p5596_p6, %p5590_p11 }
  0xea   : > { %5600 = shalt.err (!%p5597_p9)
}
  0xeb   : > { %5110 = dma.hbm_to_vmem [thread:$0]  (!%p5888_p12), %s6679_s11, 512, %s504_s25, [#allocation16], %s5720_s21, %s5720_s21, %s5721_s24  }
  0xec   : > { %s5728_s3 = smov [#allocation18]   ;;  %s5601_s17 = scalar_lea.hbm %s6680_s12, 16 }
  0xed   : > { %s517_s16 = sshll.u32 %s5728_s3, 4  ;;  %p5602_p5 = scmp.ne.s32.totalorder %s6680_s12, %s5601_s17  ;;  %s518_s16 = int_to_ptr.vmem [resolvable:$true] %s517_s16 }
  0xee   : > { %p5608_p3 = scmp.lt.u32.totalorder %s5601_s17, %s6680_s12 }
  0xef   : > { %p5604_p10 = pnand %p5602_p5, %p5904_p0 }
  0xf1   : > { %p5605_p2 = pneg %p5604_p10 }
  0xf3   : > { %p5610_p4 = pnand %p5608_p3, %p5605_p2 }
  0xf5   : > { %5613 = shalt.err (!%p5610_p4)
}
  0xf6   : > { %s5614_s21 = scalar_lea.vmem %s518_s16, 16  ;;  %s5621_s24 = scalar_lea.vmem %s518_s16, 32 }
  0xf7   : > { %p5615_p7 = scmp.ne.s32.totalorder %s518_s16, %s5614_s21  ;;  %p5622_p13 = scmp.lt.s32.totalorder %s518_s16, %s518_s16 }
  0xf8   : > { %p5623_p1 = scmp.lt.s32.totalorder %s5621_s24, %s5614_s21 }
  0xf9   : > { %p5617_p8 = pnand %p5615_p7, %p5904_p0 }
  0xfa   : > { %p5624_p6 = por %p5623_p1, %p5622_p13 }
  0xfb   : > { %p5618_p11 = pneg %p5617_p8 }
  0xfd   : > { %p5625_p9 = pnand %p5624_p6, %p5618_p11 }
  0xff   : > { %5628 = shalt.err (!%p5625_p9)
}
 0x100   : > { %5113 = dma.hbm_to_vmem [thread:$0]  (!%p5888_p12), %s6680_s12, 16, %s518_s16, [#allocation19]  }
 0x101   : > { %p6716_p5 = scmp.ne.s32.totalorder %s6712_s30, 0 }
 0x102   : > { %p6717_p10 = scmp.eq.s32.totalorder (!%p6716_p5), %s5850_s22, 0 }
 0x103   : > { %555 = sbr.rel (%p6716_p5) target bundleno = 7279 (0x1c6f), region = 80 }
 0x10a   : > { %5674 = dma.done.wait (%p6717_p10), [#allocation4], 128   ;;  %p6718_p0 = pmov %p6717_p10 }
 0x10c   : > { %5676 = vsyncadd (%p6718_p0), [#allocation4], 4294967168  ;;  %p6719_p2 = pmov %p6718_p0 }
 0x10d   : > { %p6720_p3 = pmov %p6718_p0 }
 0x10e   : > { %5678 = dma.done.wait (%p6719_p2), [#allocation7], 1024  }
 0x10f   : > { %5680 = vsyncadd (%p6720_p3), [#allocation7], 4294966272  ;;  %p6721_p4 = pmov %p6718_p0 }
 0x110   : > { %p6722_p12 = pmov %p6718_p0 }
 0x111   : > { %5682 = dma.done.wait (%p6721_p4), [#allocation10], 528  }
 0x112   : > { %5684 = vsyncadd (%p6722_p12), [#allocation10], 4294966768  ;;  %p6723_p7 = pmov %p6718_p0 }
 0x113   : > { %p6724_p8 = pmov %p6718_p0 }
 0x114   : > { %5686 = dma.done.wait (%p6723_p7), [#allocation13], 528  }
 0x115   : > { %5688 = vsyncadd (%p6724_p8), [#allocation13], 4294966768  ;;  %p6725_p11 = pmov %p6718_p0 }
 0x116   : > { %p6726_p13 = pmov %p6718_p0 }
 0x117   : > { %5690 = dma.done.wait (%p6725_p11), [#allocation16], 1024  }
 0x118   : > { %5692 = vsyncadd (%p6726_p13), [#allocation16], 4294966272  ;;  %p6727_p1 = pmov %p6718_p0 }
 0x119   : > { %p6728_p6 = pmov %p6718_p0 }
 0x11a   : > { %5694 = dma.done.wait (%p6727_p1), [#allocation19], 16  }
 0x11b   : > { %5696 = vsyncadd (%p6728_p6), [#allocation19], 4294967280  ;;  %s4424_s15 = sshll.u32 %s5850_s22, 1  ;;  %vm681_vm0 = vcmask 261120   ;;  %v670_v0 = vld [vmem:[#allocation6] sm:$0xff]  ;;  %v671_v1 = vld [vmem:[#allocation6 + $0x8] sm:$0xff] }
 0x11c   : > { %p646_p9 = scmp.lt.s32.totalorder %s4424_s15, 3  ;;  %v672_v2 = vld [vmem:[#allocation6 + $0x10] sm:$0xff]  ;;  %v4921_v3 = vpack.c.bf16 %v671_v1, %v670_v0  ;;  %v673_v4 = vld [vmem:[#allocation6 + $0x18] sm:$0xff]  ;;  %v5729_v8 = vmov 0.0   ;;  %vm5730_vm1 = vmmov 0   ;;  %s5731_s27 = smov 120  }
 0x11d   : > { %v4925_v6 = vpack.c.bf16 %v673_v4, %v672_v2  ;;  %4662 = vmatprep.subr.mxu0 %v5729_v8  ;;  %4664 = vmatprep.mubr.msk.f32.mxu0 %vm5730_vm1, %v5729_v8  ;;  %v4429_v9 = vld [vmem:[%s6672_s4] ss:$0 sm:$0xff]  ;;  %s5732_s18 = smov 96   ;;  %s5733_s17 = smov 80   ;;  %vm770_vm2 = vcmask 64512   ;;  %v665_v29 = vld [vmem:[#allocation3] sm:$0xff] }
 0x11e   : > { %s6747_s15 = smov (!%p646_p9, %s4424_s15), 3  ;;  %4922 = vmatprep.subr.bf16.mxu1 %v4921_v3  ;;  %s5734_s26 = smov 88   ;;  %vm666_vm3 = vcmp.gt.f32.partialorder %v665_v29, 0.0  ;;  %v5740_v30 = vmov -1e+09   ;;  %vm1102_vm4 = vcmask 130112   ;;  %vm6371_vm7 = vmpackc.low %vm770_vm2, %vm770_vm2 }
 0x11f   : > { %s4425_s30 = sshll.u32 %s6747_s15, 3  ;;  %4924 = vmatpush3.bf16.msra.mxu1 %v4921_v3  ;;  %s5735_s19 = smov 72   ;;  %v667_v31 = vsel %vm666_vm3, 0.0, %v5740_v30  ;;  %vm1273_vm5 = vcmask 195712   ;;  %vm1444_vm6 = vcmask 261312   ;;  %vm2532_vm8 = vcmask 130048  }
 0x120   : > { %s649_s20 = scalar_lea.vmem %s6668_s0, %s4425_s30  ;;  %4926 = vmatprep.subr.bf16.mxu1 %v4925_v6  ;;  %s5736_s1 = smov 112   ;;  %vm4089_vm9 = vcmask 523264  }
 0x121   : > { %v6144_v5 = vld [vmem:[%s649_s20] sm:$0xff]  ;;  %v6148_v7 = vld [vmem:[%s649_s20 + $0x8] sm:$0xff]  ;;  %s5737_s29 = smov 104   ;;  %s5738_s21 = smov 56  }
 0x122   : > { %4649 = vmatprep.mubr.msk.f32.mxu1 %vm681_vm0, %v6144_v5  ;;  %s5739_s24 = smov 64   ;;  %s5741_s25 = smov 40  }
 0x123   : > { %4928 = vmatpush3.bf16.msra.mxu1 %v4925_v6  ;;  %s5742_s28 = smov 48   ;;  %s5743_s30 = smov 8  }
 0x124   : > { %4652 = vmatprep.subr.mxu1 %v5729_v8  ;;  %s5744_s23 = smov 16   ;;  %s5745_s13 = smov 24  }
 0x125   : > { %s4511_s16 = sshll.u32 %s6747_s15, 4  ;;  %s4512_s20 = sshll.u32 %s5850_s22, 8 }
 0x126   : > { %4650 = vmatmul.mubr.msk.f32.vlgmr.msra.gmra.mrb[0].mxu1 %vm681_vm0, %v6148_v7 }
 0x127   : > { %4654 = vmatprep.mubr.msk.f32.mxu1 %vm5730_vm1, %v5729_v8 }
 0x1f9   : > { %v4651_v10 = vpop.f32.mrb[0].mxu1 }
 0x1fa   : > { %v754_v11 = vpop.f32.mrb[1].mxu1  ;;  %v6175_v13 = vadd.f32 %v4651_v10, %v4429_v9 }
 0x1fb   : > { %v6161_v12 = vadd.f32 %v4429_v9, %v754_v11 }
 0x1fd   : > { %933 = vrot.lane.b32.xlu1 %v6161_v12, %s5731_s27  ;;  %768 = vrot.lane.b32.xlu0 %v6161_v12, %s5732_s18 }
 0x201   : > { %1106 = vrot.lane.b32.xlu1 %v6161_v12, %s5733_s17  ;;  %935 = vrot.lane.b32.xlu0 %v6161_v12, %s5734_s26 }
 0x205   : > { %1277 = vrot.lane.b32.xlu1 %v6161_v12, %s5735_s19  ;;  %1104 = vrot.lane.b32.xlu0 %v6161_v12, %s5736_s1 }
 0x209   : > { %1447 = vrot.lane.b32.xlu1 %v6175_v13, %s5732_s18  ;;  %1275 = vrot.lane.b32.xlu0 %v6161_v12, %s5737_s29 }
 0x20d   : > { %1611 = vrot.lane.b32.xlu1 %v6175_v13, %s5731_s27  ;;  %1613 = vrot.lane.b32.xlu0 %v6175_v13, %s5734_s26 }
 0x211   : > { %1781 = vrot.lane.b32.xlu1 %v6175_v13, %s5736_s1  ;;  %1783 = vrot.lane.b32.xlu0 %v6175_v13, %s5733_s17 }
 0x215   : > { %1951 = vrot.lane.b32.xlu1 %v6175_v13, %s5737_s29  ;;  %1953 = vrot.lane.b32.xlu0 %v6175_v13, %s5735_s19 }
 0x219   : > { %1022 = vrot.lane.b32.xlu1 %v6161_v12, %s5738_s21  ;;  %856 = vrot.lane.b32.xlu0 %v6161_v12, %s5739_s24 }
 0x26f   : > { %v934_v14 = vpop.permute.xlu1 %933  ;;  %v769_v15 = vpop.permute.xlu0 %768 }
 0x270   : > { %4653 = vmatpush3.xpose.msk.msra.mxu1 %vm770_vm2, %v769_v15 }
 0x271   : > { %4657 = vmatprep.subr.mxu1 %v5729_v8 }
 0x273   : > { %v1107_v16 = vpop.permute.xlu1 %1106  ;;  %4655 = vmatmul.mubr.msk.f32.vlgmr.msra.gmra.mrb[2].mxu1 %vm770_vm2, %v6161_v12  ;;  %v936_v17 = vpop.permute.xlu0 %935 }
 0x274   : > { %4663 = vmatpush3.xpose.msk.msra.mxu0 %vm770_vm2, %v936_v17  ;;  %4659 = vmatprep.mubr.msk.f32.mxu1 %vm5730_vm1, %v5729_v8 }
 0x275   : > { %4672 = vmatprep.subr.mxu0 %v5729_v8 }
 0x277   : > { %v1278_v18 = vpop.permute.xlu1 %1277  ;;  %4665 = vmatmul.mubr.msk.f32.vlgmr.msra.gmra.mrb[0].mxu0 %vm770_vm2, %v934_v14  ;;  %v1105_v19 = vpop.permute.xlu0 %1104 }
 0x278   : > { %4673 = vmatpush3.xpose.msk.msra.mxu0 %vm770_vm2, %v1107_v16  ;;  %4674 = vmatprep.mubr.msk.f32.mxu0 %vm5730_vm1, %v5729_v8 }
 0x279   : > { %4682 = vmatprep.subr.mxu0 %v5729_v8 }
 0x27b   : > { %4675 = vmatmul.mubr.msk.f32.vlgmr.msra.gmra.mrb[2].mxu0 %vm770_vm2, %v1105_v19  ;;  %v1276_v20 = vpop.permute.xlu0 %1275  ;;  %v1448_v21 = vpop.permute.xlu1 %1447 }
 0x27c   : > { %4683 = vmatpush3.xpose.msk.msra.mxu0 %vm770_vm2, %v1278_v18  ;;  %4684 = vmatprep.mubr.msk.f32.mxu0 %vm5730_vm1, %v5729_v8 }
 0x27d   : > { %4692 = vmatprep.subr.mxu0 %v5729_v8 }
 0x27f   : > { %4685 = vmatmul.mubr.msk.f32.vlgmr.msra.gmra.mrb[4].mxu0 %vm770_vm2, %v1276_v20  ;;  %v1614_v22 = vpop.permute.xlu0 %1613  ;;  %v1612_v23 = vpop.permute.xlu1 %1611 }
 0x280   : > { %4693 = vmatpush3.xpose.msk.msra.mxu0 %vm770_vm2, %v1448_v21  ;;  %4694 = vmatprep.mubr.msk.f32.mxu0 %vm5730_vm1, %v5729_v8 }
 0x281   : > { %4702 = vmatprep.subr.mxu0 %v5729_v8 }
 0x283   : > { %4695 = vmatmul.mubr.msk.f32.vlgmr.msra.gmra.mrb[6].mxu0 %vm770_vm2, %v6175_v13  ;;  %v1784_v24 = vpop.permute.xlu0 %1783  ;;  %v1782_v26 = vpop.permute.xlu1 %1781 }
 0x284   : > { %4703 = vmatpush3.xpose.msk.msra.mxu0 %vm770_vm2, %v1614_v22  ;;  %4704 = vmatprep.mubr.msk.f32.mxu0 %vm5730_vm1, %v5729_v8 }
 0x285   : > { %4712 = vmatprep.subr.mxu0 %v5729_v8 }
 0x287   : > { %4705 = vmatmul.mubr.msk.f32.vlgmr.msra.gmra.mrb[8].mxu0 %vm770_vm2, %v1612_v23  ;;  %v1954_v25 = vpop.permute.xlu0 %1953  ;;  %v1952_v28 = vpop.permute.xlu1 %1951 }
 0x288   : > { %4713 = vmatpush3.xpose.msk.msra.mxu0 %vm770_vm2, %v1784_v24  ;;  %4714 = vmatprep.mubr.msk.f32.mxu0 %vm5730_vm1, %v5729_v8 }
 0x289   : > { %4722 = vmatprep.subr.mxu0 %v5729_v8 }
 0x28b   : > { %4715 = vmatmul.mubr.msk.f32.vlgmr.msra.gmra.mrb[10].mxu0 %vm770_vm2, %v1782_v26  ;;  %v857_v27 = vpop.permute.xlu0 %856  ;;  %v6249_v0 = vpop.permute.xlu1 %1022 }
 0x28c   : > { %4658 = vmatpush3.msra.mxu1 %v857_v27  ;;  %4723 = vmatpush3.xpose.msk.msra.mxu0 %vm770_vm2, %v1954_v25 }
 0x28d   : > { %4724 = vmatprep.mubr.msk.f32.mxu0 %vm5730_vm1, %v5729_v8  ;;  %4667 = vmatprep.subr.mxu1 %v5729_v8 }
 0x28f   : > { %4725 = vmatmul.mubr.msk.f32.vlgmr.msra.gmra.mrb[12].mxu0 %vm770_vm2, %v1952_v28 }
 0x346   : > { %v841_v32 = vpop.f32.mrb[2].mxu1 }
 0x347   : > { %v842_v33 = vadd.f32 %v841_v32, %v667_v31  ;;  %v4656_v34 = vpop.f32.mrb[3].mxu1 }
 0x349   : > { %v845_v35 = vsel %vm770_vm2, %v842_v33, -inf }
 0x34a   : > { %846 = vmax.xlane.f32.xlu0 %v845_v35  ;;  %v1007_v36 = vpop.f32.mrb[0].mxu0 }
 0x34b   : > { %v1008_v37 = vadd.f32 %v1007_v36, %v667_v31  ;;  %v4666_v38 = vpop.f32.mrb[1].mxu0 }
 0x34d   : > { %v1011_v39 = vsel %vm770_vm2, %v1008_v37, -inf }
 0x34e   : > { %1012 = vmax.xlane.f32.xlu1 %v1011_v39  ;;  %v1178_v40 = vpop.f32.mrb[2].mxu0 }
 0x34f   : > { %v1179_v41 = vadd.f32 %v1178_v40, %v667_v31  ;;  %v4676_v42 = vpop.f32.mrb[3].mxu0 }
 0x351   : > { %v1182_v43 = vsel %vm770_vm2, %v1179_v41, -inf }
 0x352   : > { %1183 = vmax.xlane.f32.xlu0 %v1182_v43  ;;  %v1349_v44 = vpop.f32.mrb[4].mxu0 }
 0x353   : > { %v1350_v45 = vadd.f32 %v1349_v44, %v667_v31  ;;  %v4686_v46 = vpop.f32.mrb[5].mxu0 }
 0x355   : > { %v1353_v47 = vsel %vm770_vm2, %v1350_v45, -inf }
 0x356   : > { %1354 = vmax.xlane.f32.xlu0 %v1353_v47  ;;  %v1519_v48 = vpop.f32.mrb[6].mxu0 }
 0x357   : > { %v1520_v49 = vadd.f32 %v1519_v48, %v667_v31  ;;  %v4696_v50 = vpop.f32.mrb[7].mxu0 }
 0x359   : > { %v1523_v51 = vsel %vm770_vm2, %v1520_v49, -inf }
 0x35a   : > { %1524 = vmax.xlane.f32.xlu1 %v1523_v51  ;;  %v1685_v52 = vpop.f32.mrb[8].mxu0 }
 0x35b   : > { %v1686_v53 = vadd.f32 %v1685_v52, %v667_v31  ;;  %v4706_v54 = vpop.f32.mrb[9].mxu0 }
 0x35d   : > { %v1689_v55 = vsel %vm770_vm2, %v1686_v53, -inf }
 0x35e   : > { %1690 = vmax.xlane.f32.xlu0 %v1689_v55  ;;  %v1855_v56 = vpop.f32.mrb[10].mxu0 }
 0x35f   : > { %v1856_v57 = vadd.f32 %v1855_v56, %v667_v31  ;;  %v4716_v58 = vpop.f32.mrb[11].mxu0 }
 0x361   : > { %v1859_v59 = vsel %vm770_vm2, %v1856_v57, -inf }
 0x362   : > { %1860 = vmax.xlane.f32.xlu1 %v1859_v59  ;;  %v2025_v60 = vpop.f32.mrb[12].mxu0 }
 0x363   : > { %v2026_v61 = vadd.f32 %v2025_v60, %v667_v31  ;;  %v4726_v62 = vpop.f32.mrb[13].mxu0 }
 0x365   : > { %v2029_v63 = vsel %vm770_vm2, %v2026_v61, -inf }
 0x366   : > { %2030 = vmax.xlane.f32.xlu0 %v2029_v63 }
 0x373   : > { %1364 = vrot.lane.b32.xlu1 %v6161_v12, %s5741_s25 }
 0x37c   : > { %1193 = vrot.lane.b32.xlu0 %v6161_v12, %s5742_s28 }
 0x3d7   : > { %v847_v1 = vpop.xlane.xlu0 %846 }
 0x3d8   : > { %v848_v2 = vsub.f32 %v842_v33, %v847_v1 }
 0x3da   : > { %v849_v3 = vmul.f32 1.442695, %v848_v2 }
 0x3db   : > { %v1013_v4 = vpop.xlane.xlu1 %1012 }
 0x3dc   : > { %5272 = vpow2.f32 %v849_v3  ;;  %v1014_v6 = vsub.f32 %v1008_v37, %v1013_v4 }
 0x3de   : > { %v1015_v9 = vmul.f32 1.442695, %v1014_v6 }
 0x3df   : > { %v1184_v10 = vpop.xlane.xlu0 %1183 }
 0x3e0   : > { %5274 = vpow2.f32 %v1015_v9  ;;  %v1185_v11 = vsub.f32 %v1179_v41, %v1184_v10 }
 0x3e2   : > { %v1186_v14 = vmul.f32 1.442695, %v1185_v11 }
 0x3e3   : > { %v1355_v15 = vpop.xlane.xlu0 %1354 }
 0x3e4   : > { %5276 = vpow2.f32 %v1186_v14  ;;  %v1356_v16 = vsub.f32 %v1350_v45, %v1355_v15 }
 0x3e6   : > { %v5273_v17 = vpop.eup %5272  ;;  %v1357_v18 = vmul.f32 1.442695, %v1356_v16 }
 0x3e7   : > { %v851_v12 = vsel %vm770_vm2, %v5273_v17, 0.0  ;;  %v1525_v25 = vpop.xlane.xlu1 %1524 }
 0x3e8   : > { %5278 = vpow2.f32 %v1357_v18  ;;  %852 = vadd.xlane.f32.xlu1 %v851_v12  ;;  %v1526_v26 = vsub.f32 %v1520_v49, %v1525_v25 }
 0x3ea   : > { %v5275_v19 = vpop.eup %5274  ;;  %v1527_v30 = vmul.f32 1.442695, %v1526_v26 }
 0x3eb   : > { %v1017_v20 = vsel %vm770_vm2, %v5275_v19, 0.0  ;;  %v1691_v27 = vpop.xlane.xlu0 %1690 }
 0x3ec   : > { %1018 = vadd.xlane.f32.xlu0 %v1017_v20  ;;  %v1692_v29 = vsub.f32 %v1686_v53, %v1691_v27  ;;  %5280 = vpow2.f32 %v1527_v30  ;;  %v765_v27 = vld [vmem:[#allocation8 + $0x10] sm:$0xff] }
 0x3ee   : > { %v5277_v21 = vpop.eup %5276  ;;  %v1693_v33 = vmul.f32 1.442695, %v1692_v29 }
 0x3ef   : > { %v1188_v22 = vsel %vm770_vm2, %v5277_v21, 0.0  ;;  %v1861_v28 = vpop.xlane.xlu1 %1860 }
 0x3f0   : > { %1189 = vadd.xlane.f32.xlu1 %v1188_v22  ;;  %v1862_v31 = vsub.f32 %v1856_v57, %v1861_v28  ;;  %5282 = vpow2.f32 %v1693_v33  ;;  %v763_v22 = vld [vmem:[#allocation8] sm:$0xff]  ;;  %v766_v28 = vld [vmem:[#allocation8 + $0x18] sm:$0xff] }
 0x3f1   : > { %v4933_v29 = vpack.c.bf16 %v766_v28, %v765_v27 }
 0x3f2   : > { %v6254_v23 = vpop.eup %5278  ;;  %v1863_v34 = vmul.f32 1.442695, %v1862_v31 }
 0x3f3   : > { %v1359_v24 = vsel %vm770_vm2, %v6254_v23, 0.0  ;;  %v2031_v32 = vpop.xlane.xlu0 %2030  ;;  %v1365_v45 = vpop.permute.xlu1 %1364 }
 0x3f4   : > { %1360 = vadd.xlane.f32.xlu0 %v1359_v24  ;;  %v2032_v35 = vsub.f32 %v2026_v61, %v2031_v32  ;;  %5284 = vpow2.f32 %v1863_v34 }
 0x3f6   : > { %v2033_v36 = vmul.f32 1.442695, %v2032_v35  ;;  %v5281_v37 = vpop.eup %5280 }
 0x3f7   : > { %v1529_v39 = vsel %vm770_vm2, %v5281_v37, 0.0  ;;  %v1194_v46 = vpop.permute.xlu0 %1193 }
 0x3f8   : > { %5286 = vpow2.f32 %v2033_v36 }
 0x3fa   : > { %v6262_v38 = vpop.eup %5282 }
 0x3fb   : > { %v1695_v42 = vsel %vm770_vm2, %v6262_v38, 0.0 }
 0x3fe   : > { %v6265_v40 = vpop.eup %5284 }
 0x3ff   : > { %v1865_v41 = vsel %vm770_vm2, %v6265_v40, 0.0 }
 0x401   : > { %1700 = vrot.lane.b32.xlu1 %v6175_v13, %s5738_s21 }
 0x402   : > { %v6271_v43 = vpop.eup %5286 }
 0x403   : > { %v2035_v44 = vsel %vm770_vm2, %v6271_v43, 0.0 }
 0x40a   : > { %1534 = vrot.lane.b32.xlu0 %v6175_v13, %s5739_s24 }
 0x425   : > { %1530 = vadd.xlane.f32.xlu1 %v1529_v39 }
 0x429   : > { %1866 = vadd.xlane.f32.xlu1 %v1865_v41  ;;  %1696 = vadd.xlane.f32.xlu0 %v1695_v42 }
 0x42d   : > { %2036 = vadd.xlane.f32.xlu1 %v2035_v44  ;;  %v2123_v44 = vlaneseq }
 0x43e   : > { %2040 = vrot.lane.b32.xlu1 %v6175_v13, %s5741_s25  ;;  %s6729_s25 = sld [smem:[#allocation36_spill]] }
 0x43f   : > { %1870 = vrot.lane.b32.xlu0 %v6175_v13, %s5742_s28 }
 0x444   : > { %s6345_s28 = scalar_lea.vmem %s6729_s25, %s4511_s16  ;;  %s6736_s25 = sld [smem:[#allocation39_spill]] }
 0x475   : > { %v853_v47 = vpop.xlane.xlu1 %852 }
 0x476   : > { %5288 = vrcp.f32 %v853_v47  ;;  %v6334_v47 = vld [vmem:[%s6682_s14] sm:$0xff] }
 0x479   : > { %v1019_v48 = vpop.xlane.xlu0 %1018 }
 0x47a   : > { %5290 = vrcp.f32 %v1019_v48 }
 0x47d   : > { %v1190_v49 = vpop.xlane.xlu1 %1189 }
 0x47e   : > { %5292 = vrcp.f32 %v1190_v49 }
 0x480   : > { %v5289_v50 = vpop.eup %5288 }
 0x481   : > { %v855_v51 = vmul.f32 %v5289_v50, %v5273_v17  ;;  %v1361_v52 = vpop.xlane.xlu0 %1360  ;;  %v1701_v59 = vpop.permute.xlu1 %1700 }
 0x482   : > { %5294 = vrcp.f32 %v1361_v52 }
 0x483   : > { %4660 = vmatmul.mubr.msk.f32.vlgmr.msra.gmra.mrb[4].mxu1 %vm770_vm2, %v855_v51 }
 0x484   : > { %v5291_v53 = vpop.eup %5290  ;;  %4668 = vmatpush3.msra.mxu1 %v6249_v0  ;;  %4669 = vmatprep.mubr.msk.f32.mxu1 %vm5730_vm1, %v5729_v8 }
 0x485   : > { %v1021_v13 = vmul.f32 %v5291_v53, %v5275_v19  ;;  %4677 = vmatprep.subr.mxu1 %v5729_v8  ;;  %v1535_v58 = vpop.permute.xlu0 %1534 }
 0x487   : > { %4670 = vmatmul.mubr.msk.f32.vlgmr.msra.gmra.mrb[6].mxu1 %vm770_vm2, %v1021_v13 }
 0x488   : > { %v5293_v54 = vpop.eup %5292  ;;  %4678 = vmatpush3.msra.mxu1 %v1194_v46  ;;  %4679 = vmatprep.mubr.msk.f32.mxu1 %vm5730_vm1, %v5729_v8 }
 0x489   : > { %v1192_v55 = vmul.f32 %v5293_v54, %v5277_v21  ;;  %4687 = vmatprep.subr.mxu1 %v5729_v8 }
 0x48b   : > { %4680 = vmatmul.mubr.msk.f32.vlgmr.msra.gmra.mrb[8].mxu1 %vm770_vm2, %v1192_v55 }
 0x48c   : > { %v5295_v56 = vpop.eup %5294  ;;  %4688 = vmatpush3.msra.mxu1 %v1365_v45  ;;  %4689 = vmatprep.mubr.msk.f32.mxu1 %vm5730_vm1, %v5729_v8  ;;  %v6328_v45 = vshrl.u32 %v2123_v44, 7 }
 0x48d   : > { %v1363_v57 = vmul.f32 %v5295_v56, %v6254_v23  ;;  %4697 = vmatprep.subr.mxu1 %v5729_v8  ;;  %v764_v23 = vld [vmem:[#allocation8 + $0x8] sm:$0xff] }
 0x48e   : > { %v4929_v25 = vpack.c.bf16 %v764_v23, %v763_v22  ;;  %v2125_v46 = vsub.s32 0, %v6328_v45 }
 0x48f   : > { %4690 = vmatmul.mubr.msk.f32.vlgmr.msra.gmra.mrb[10].mxu1 %vm770_vm2, %v1363_v57 }
 0x490   : > { %4698 = vmatpush3.msra.mxu1 %v1535_v58  ;;  %4699 = vmatprep.mubr.msk.f32.mxu1 %vm5730_vm1, %v5729_v8  ;;  %v2126_v48 = vrot.slane %v6334_v47, %v2125_v46  ;;  %v663_v46 = vld [vmem:[%s6345_s28 + $0x10] sm:$0xff] }
 0x491   : > { %4707 = vmatprep.subr.mxu1 %v5729_v8  ;;  %4930 = vmatprep.subr.bf16.mxu0 %v4929_v25 }
 0x492   : > { %4932 = vmatpush3.bf16.msra.mxu0 %v4929_v25  ;;  %v2237_v25 = vsub.s32 1, %v6328_v45 }
 0x493   : > { %4934 = vmatprep.subr.bf16.mxu0 %v4933_v29 }
 0x494   : > { %v2238_v27 = vrot.slane %v6334_v47, %v2237_v25 }
 0x496   : > { %4936 = vmatpush3.bf16.msra.mxu0 %v4933_v29 }
 0x4b2   : > { %v1531_v60 = vpop.xlane.xlu1 %1530 }
 0x4b3   : > { %5296 = vrcp.f32 %v1531_v60 }
 0x4b6   : > { %v1867_v61 = vpop.xlane.xlu1 %1866  ;;  %v1697_v62 = vpop.xlane.xlu0 %1696 }
 0x4b7   : > { %5298 = vrcp.f32 %v1697_v62 }
 0x4b8   : > { %5300 = vrcp.f32 %v1867_v61 }
 0x4ba   : > { %v2037_v63 = vpop.xlane.xlu1 %2036  ;;  %v1871_v6 = vpop.permute.xlu0 %1870 }
 0x4bb   : > { %5302 = vrcp.f32 %v2037_v63 }
 0x4bd   : > { %v5297_v0 = vpop.eup %5296 }
 0x4be   : > { %v1533_v1 = vmul.f32 %v5297_v0, %v5281_v37  ;;  %v2041_v11 = vpop.permute.xlu1 %2040  ;;  %v2341_v0 = vld [vmem:[#allocation12] sm:$0xff] }
 0x4c0   : > { %4700 = vmatmul.mubr.msk.f32.vlgmr.msra.gmra.mrb[12].mxu1 %vm770_vm2, %v1533_v1  ;;  %v2342_v1 = vld [vmem:[#allocation12 + $0x8] sm:$0xff] }
 0x4c1   : > { %4708 = vmatpush3.msra.mxu1 %v1701_v59  ;;  %4709 = vmatprep.mubr.msk.f32.mxu1 %vm5730_vm1, %v5729_v8  ;;  %v5299_v2 = vpop.eup %5298 }
 0x4c2   : > { %4717 = vmatprep.subr.mxu1 %v5729_v8  ;;  %v1699_v3 = vmul.f32 %v5299_v2, %v6262_v38  ;;  %v5301_v4 = vpop.eup %5300  ;;  %v4945_v2 = vpack.c.bf16 %v2342_v1, %v2341_v0 }
 0x4c3   : > { %v1869_v9 = vmul.f32 %v5301_v4, %v6265_v40  ;;  %v2344_v4 = vld [vmem:[#allocation12 + $0x18] sm:$0xff] }
 0x4c4   : > { %4710 = vmatmul.mubr.msk.f32.vlgmr.msra.gmra.mrb[14].mxu1 %vm770_vm2, %v1699_v3  ;;  %4946 = vmatprep.subr.bf16.mxu0 %v4945_v2  ;;  %v2343_v3 = vld [vmem:[#allocation12 + $0x10] sm:$0xff] }
 0x4c5   : > { %4718 = vmatpush3.msra.mxu1 %v1871_v6  ;;  %4719 = vmatprep.mubr.msk.f32.mxu1 %vm5730_vm1, %v5729_v8  ;;  %v5303_v10 = vpop.eup %5302  ;;  %v4949_v6 = vpack.c.bf16 %v2344_v4, %v2343_v3 }
 0x4c6   : > { %4727 = vmatprep.subr.mxu1 %v5729_v8  ;;  %v2039_v14 = vmul.f32 %v5303_v10, %v6271_v43  ;;  %v662_v10 = vld [vmem:[%s6345_s28 + $0x8] sm:$0xff] }
 0x4c8   : > { %4720 = vmatmul.mubr.msk.f32.vlgmr.msra.gmra.mrb[16].mxu1 %vm770_vm2, %v1869_v9  ;;  %v661_v9 = vld [vmem:[%s6345_s28] sm:$0xff] }
 0x4c9   : > { %4728 = vmatpush3.msra.mxu1 %v2041_v11  ;;  %4729 = vmatprep.mubr.msk.f32.mxu1 %vm5730_vm1, %v5729_v8  ;;  %v2249_v11 = vld [vmem:[#allocation9] sm:$0xff] }
 0x4cc   : > { %4730 = vmatmul.mubr.msk.f32.vlgmr.msra.gmra.mrb[18].mxu1 %vm770_vm2, %v2039_v14  ;;  %v2250_v14 = vld [vmem:[#allocation9 + $0x8] sm:$0xff] }
 0x556   : > { %v928_v15 = vpop.f32.mrb[4].mxu1 }
 0x557   : > { %932 = vst.msk [vmem:[#allocation2] sm:$0xff] %vm770_vm2, %v928_v15  ;;  %v4661_v16 = vpop.f32.mrb[5].mxu1  ;;  %v4937_v15 = vpack.c.bf16 %v2250_v14, %v2249_v11 }
 0x558   : > { %v2251_v16 = vld [vmem:[#allocation9 + $0x10] sm:$0xff] }
 0x559   : > { %4938 = vmatprep.subr.bf16.mxu1 %v4937_v15 }
 0x55a   : > { %v1094_v17 = vpop.f32.mrb[6].mxu1  ;;  %4940 = vmatpush3.bf16.msra.mxu1 %v4937_v15 }
 0x55b   : > { %1099 = vrot.lane.b32.xlu0 %v1094_v17, %s5743_s30  ;;  %v4671_v18 = vpop.f32.mrb[7].mxu1  ;;  %v2252_v17 = vld [vmem:[#allocation9 + $0x18] sm:$0xff] }
 0x55c   : > { %v4941_v18 = vpack.c.bf16 %v2252_v17, %v2251_v16 }
 0x55e   : > { %v1265_v12 = vpop.f32.mrb[8].mxu1  ;;  %4942 = vmatprep.subr.bf16.mxu1 %v4941_v18 }
 0x55f   : > { %1270 = vrot.lane.b32.xlu1 %v1265_v12, %s5744_s23  ;;  %v4681_v19 = vpop.f32.mrb[9].mxu1  ;;  %4944 = vmatpush3.bf16.msra.mxu1 %v4941_v18  ;;  %v5746_v12 = vmov 0.0|0.0  }
 0x560   : > { %4953 = vmatprep.subr.bf16.mxu1 %v5746_v12 }
 0x562   : > { %v1436_v20 = vpop.f32.mrb[10].mxu1 }
 0x563   : > { %1441 = vrot.lane.b32.xlu1 %v1436_v20, %s5745_s13  ;;  %v4691_v21 = vpop.f32.mrb[11].mxu1 }
 0x593   : > { %v1606_v24 = vpop.f32.mrb[12].mxu1 }
 0x594   : > { %1610 = vst.msk [vmem:[#allocation2 + $0x8] sm:$0xff] %vm770_vm2, %v1606_v24  ;;  %v4701_v26 = vpop.f32.mrb[13].mxu1 }
 0x595   : > { %v2243_v26 = vsub.s32 2, %v6328_v45 }
 0x597   : > { %v1772_v30 = vpop.f32.mrb[14].mxu1 }
 0x598   : > { %1777 = vrot.lane.b32.xlu0 %v1772_v30, %s5743_s30  ;;  %v4711_v31 = vpop.f32.mrb[15].mxu1  ;;  %v2244_v30 = vrot.slane %v6334_v47, %v2243_v26 }
 0x59b   : > { %v1942_v32 = vpop.f32.mrb[16].mxu1 }
 0x59c   : > { %1947 = vrot.lane.b32.xlu0 %v1942_v32, %s5744_s23  ;;  %v4721_v33 = vpop.f32.mrb[17].mxu1 }
 0x59f   : > { %v2112_v34 = vpop.f32.mrb[18].mxu1 }
 0x5a0   : > { %2117 = vrot.lane.b32.xlu1 %v2112_v34, %s5745_s13  ;;  %v4731_v35 = vpop.f32.mrb[19].mxu1 }
 0x5cd   : > { %v1100_v36 = vpop.permute.xlu0 %1099 }
 0x5ce   : > { %1103 = vst.msk [vmem:[#allocation2] sm:$0xff] %vm1102_vm4, %v1100_v36 }
 0x5d1   : > { %v1271_v37 = vpop.permute.xlu1 %1270 }
 0x5d2   : > { %1274 = vst.msk [vmem:[#allocation2] sm:$0xff] %vm1273_vm5, %v1271_v37 }
 0x5d5   : > { %v1442_v38 = vpop.permute.xlu1 %1441 }
 0x5d6   : > { %1445 = vst.msk [vmem:[#allocation2] sm:$0xff] %vm1444_vm6, %v1442_v38 }
 0x5dd   : > { %v2121_v39 = vld [vmem:[#allocation2] sm:$0xff] }
 0x5de   : > { %4740 = vmatprep.mubr.msk.f32.mxu0 %vm681_vm0, %v2121_v39  ;;  %v4461_v39 = vld [vmem:[#allocation14] ss:$0 sm:$0xff] }
 0x60a   : > { %v1778_v40 = vpop.permute.xlu0 %1777 }
 0x60b   : > { %1780 = vst.msk [vmem:[#allocation2 + $0x8] sm:$0xff] %vm1102_vm4, %v1778_v40 }
 0x60e   : > { %v1948_v41 = vpop.permute.xlu0 %1947 }
 0x60f   : > { %1950 = vst.msk [vmem:[#allocation2 + $0x8] sm:$0xff] %vm1273_vm5, %v1948_v41 }
 0x612   : > { %v2118_v42 = vpop.permute.xlu1 %2117 }
 0x613   : > { %2120 = vst.msk [vmem:[#allocation2 + $0x8] sm:$0xff] %vm1444_vm6, %v2118_v42 }
 0x61a   : > { %v2122_v43 = vld [vmem:[#allocation2 + $0x8] sm:$0xff] }
 0x61b   : > { %4741 = vmatmul.mubr.msk.f32.vlgmr.msra.gmra.mrb[14].mxu0 %vm681_vm0, %v2122_v43 }
 0x61c   : > { %4948 = vmatpush3.bf16.msra.mxu0 %v4945_v2  ;;  %4762 = vmatprep.mubr.msk.f32.mxu0 %vm681_vm0, %v661_v9 }
 0x61d   : > { %4950 = vmatprep.subr.bf16.mxu0 %v4949_v6 }
 0x620   : > { %4952 = vmatpush3.bf16.msra.mxu0 %v4949_v6 }
 0x621   : > { %4960 = vmatprep.subr.bf16.mxu0 %v5746_v12 }
 0x623   : > { %4763 = vmatmul.mubr.msk.f32.vlgmr.msra.gmra.mrb[16].mxu0 %vm681_vm0, %v662_v10 }
 0x624   : > { %4765 = vmatprep.mubr.msk.f32.mxu0 %vm681_vm0, %v663_v46 }
 0x6ee   : > { %v4742_v49 = vpop.f32.mrb[14].mxu0 }
 0x6ef   : > { %v2205_v50 = vadd.f32 %v4742_v49, %v2126_v48  ;;  %v2199_v51 = vpop.f32.mrb[15].mxu0 }
 0x6f0   : > { %v2200_v52 = vadd.f32 %v2199_v51, %v2126_v48  ;;  %v664_v48 = vld [vmem:[%s6345_s28 + $0x18] sm:$0xff]  ;;  %s6619_s28 = scalar_lea.hbm %s6736_s25, %s4512_s20 }
 0x6f1   : > { %v2211_v53 = vsel %vm681_vm0, %v2205_v50, 0.0  ;;  %4766 = vmatmul.mubr.msk.f32.gmra.mrb[18].mxu0 %vm681_vm0, %v664_v48 }
 0x6f2   : > { %2212 = vadd.xlane.f32.xlu1 %v2211_v53  ;;  %v2208_v13 = vsel %vm681_vm0, %v2200_v52, 0.0  ;;  %4786 = vmatprep.mubr.msk.f32.mxu0 %vm5730_vm1, %v5729_v8  ;;  %v4458_v53 = vld [vmem:[#allocation11] ss:$0 sm:$0xff] }
 0x6f3   : > { %2209 = vadd.xlane.f32.xlu0 %v2208_v13 }
 0x6f6   : > { %v4764_v40 = vpop.f32.mrb[16].mxu0 }
 0x6f7   : > { %v2436_v41 = vadd.f32 %v4764_v40, %v4461_v39 }
 0x77f   : > { %v2213_v54 = vpop.xlane.xlu1 %2212 }
 0x780   : > { %v2216_v55 = vmul.f32 0.03125, %v2213_v54  ;;  %v2210_v56 = vpop.xlane.xlu0 %2209 }
 0x781   : > { %v2215_v57 = vmul.f32 0.03125, %v2210_v56 }
 0x782   : > { %v2218_v58 = vsub.f32 %v2205_v50, %v2216_v55 }
 0x783   : > { %v2217_v59 = vsub.f32 %v2200_v52, %v2215_v57 }
 0x784   : > { %v2220_v62 = vmul.f32 %v2218_v58, %v2218_v58 }
 0x785   : > { %v2219_v60 = vmul.f32 %v2217_v59, %v2217_v59 }
 0x786   : > { %v2224_v63 = vsel %vm681_vm0, %v2220_v62, 0.0 }
 0x787   : > { %v2221_v61 = vsel %vm681_vm0, %v2219_v60, 0.0 }
 0x788   : > { %2222 = vadd.xlane.f32.xlu0 %v2221_v61 }
 0x78c   : > { %2225 = vadd.xlane.f32.xlu0 %v2224_v63 }
 0x815   : > { %v2223_v19 = vpop.xlane.xlu0 %2222 }
 0x816   : > { %v2227_v20 = vmul.f32 0.03125, %v2223_v19 }
 0x818   : > { %v2229_v21 = vadd.f32 1e-05, %v2227_v20 }
 0x819   : > { %v2226_v22 = vpop.xlane.xlu0 %2225 }
 0x81a   : > { %5304 = vrsqrt.f32 %v2229_v21  ;;  %v2228_v23 = vmul.f32 0.03125, %v2226_v22 }
 0x81c   : > { %v2230_v24 = vadd.f32 1e-05, %v2228_v23 }
 0x81e   : > { %5306 = vrsqrt.f32 %v2230_v24 }
 0x824   : > { %v5305_v28 = vpop.eup %5304 }
 0x825   : > { %v2233_v29 = vmul.f32 %v5305_v28, %v2217_v59 }
 0x827   : > { %v2239_v31 = vmul.f32 %v2238_v27, %v2233_v29 }
 0x828   : > { %v5307_v32 = vpop.eup %5306 }
 0x829   : > { %v2234_v33 = vmul.f32 %v5307_v32, %v2218_v58  ;;  %v2245_v34 = vadd.f32 %v2244_v30, %v2239_v31 }
 0x82b   : > { %v2240_v35 = vmul.f32 %v2238_v27, %v2234_v33  ;;  %v6358_v36 = vadd.f32 %v2245_v34, %v6144_v5  ;;  %v2430_v5 = vpop.f32.mrb[17].mxu0 }
 0x82c   : > { %v2431_v42 = vadd.f32 %v4461_v39, %v2430_v5  ;;  %v4767_v57 = vpop.f32.mrb[18].mxu0 }
 0x82d   : > { %v2246_v37 = vadd.f32 %v2244_v30, %v2240_v35  ;;  %4751 = vmatprep.mubr.msk.f32.mxu1 %vm681_vm0, %v6358_v36  ;;  %v2440_v58 = vpop.f32.mrb[19].mxu0  ;;  %v6414_v1 = vadd.f32 %v4767_v57, %v4461_v39 }
 0x82e   : > { %v4954_v44 = vpack.c.bf16 %v2436_v41, %v2431_v42  ;;  %v6416_v2 = vadd.f32 %v4461_v39, %v2440_v58 }
 0x82f   : > { %v6363_v38 = vadd.f32 %v2246_v37, %v6148_v7  ;;  %v6375_v7 = vpack.i.bf16 %v2436_v41, %v2431_v42 }
 0x830   : > { %v6420_v3 = vpack.i.bf16 %v6414_v1, %v6416_v2  ;;  %v4982_v4 = vpack.c.bf16 %v6414_v1, %v6416_v2 }
 0x831   : > { %4752 = vmatmul.mubr.msk.f32.vlgmr.msra.gmra.mrb[20].mxu1 %vm681_vm0, %v6363_v38  ;;  %5203 = vrot.lane.b32.xlu1 %v6375_v7, %s5731_s27 }
 0x832   : > { %4772 = vmatprep.mubr.msk.f32.mxu1 %vm5730_vm1, %v5729_v8  ;;  %4956 = vmatpush3.bf16.xpose.msk.msra.mxu1 %vm6371_vm7, %v4954_v44 }
 0x833   : > { %4957 = vmatprep.subr.bf16.mxu1 %v5746_v12 }
 0x835   : > { %5208 = vrot.lane.b32.xlu1 %v6375_v7, %s5736_s1 }
 0x8a3   : > { %v5204_v49 = vpop.permute.xlu1 %5203 }
 0x8a4   : > { %v5206_v50 = vunpack.i.h.bf16 %v5204_v49  ;;  %v5205_v51 = vunpack.i.l.bf16 %v5204_v49 }
 0x8a6   : > { %v4961_v52 = vpack.c.bf16 %v5206_v50, %v5205_v51 }
 0x8a7   : > { %v5209_v59 = vpop.permute.xlu1 %5208 }
 0x8a8   : > { %4963 = vmatpush3.bf16.xpose.msk.msra.mxu0 %vm6371_vm7, %v4961_v52  ;;  %v5211_v60 = vunpack.i.h.bf16 %v5209_v59  ;;  %v5210_v61 = vunpack.i.l.bf16 %v5209_v59 }
 0x8a9   : > { %4967 = vmatprep.subr.bf16.mxu0 %v5746_v12 }
 0x8aa   : > { %v4968_v62 = vpack.c.bf16 %v5211_v60, %v5210_v61 }
 0x904   : > { %v4753_v13 = vpop.f32.mrb[20].mxu1 }
 0x905   : > { %v6393_v54 = vadd.f32 %v4753_v13, %v4458_v53  ;;  %v2332_v55 = vpop.f32.mrb[21].mxu1 }
 0x906   : > { %v6395_v56 = vadd.f32 %v4458_v53, %v2332_v55 }
 0x908   : > { %2801 = vrot.lane.b32.xlu1 %v6395_v56, %s5736_s1  ;;  %2624 = vrot.lane.b32.xlu0 %v6395_v56, %s5731_s27 }
 0x909   : > { %4773 = vmatmul.mubr.msk.f32.vlgmr.msra.gmra.mrb[22].mxu1 %vm770_vm2, %v6395_v56 }
 0x90a   : > { %4779 = vmatprep.mubr.msk.f32.mxu1 %vm5730_vm1, %v5729_v8 }
 0x97a   : > { %v2625_v63 = vpop.permute.xlu0 %2624  ;;  %v2802_v0 = vpop.permute.xlu1 %2801 }
 0x97b   : > { %4787 = vmatmul.mubr.msk.f32.vlgmr.msra.gmra.mrb[20].mxu0 %vm770_vm2, %v2625_v63 }
 0x97c   : > { %4970 = vmatpush3.bf16.xpose.msk.msra.mxu0 %vm6371_vm7, %v4968_v62  ;;  %4800 = vmatprep.mubr.msk.f32.mxu0 %vm5730_vm1, %v5729_v8 }
 0x97d   : > { %4978 = vmatprep.subr.bf16.mxu0 %v5746_v12 }
 0x983   : > { %4801 = vmatmul.mubr.msk.f32.vlgmr.msra.gmra.mrb[22].mxu0 %vm770_vm2, %v2802_v0 }
 0x984   : > { %4821 = vmatprep.mubr.msk.f32.mxu0 %vm5730_vm1, %v5729_v8 }
 0x9dc   : > { %v2528_v6 = vpop.f32.mrb[22].mxu1 }
 0x9dd   : > { %v4774_v9 = vpop.f32.mrb[23].mxu1  ;;  %v2533_v10 = vsel %vm2532_vm8, %v2528_v6, -inf }
 0x9de   : > { %2534 = vmax.xlane.f32.xlu0 %v2533_v10 }
 0xa4e   : > { %v2702_v11 = vpop.f32.mrb[20].mxu0 }
 0xa4f   : > { %v4788_v14 = vpop.f32.mrb[21].mxu0  ;;  %v2706_v15 = vsel %vm2532_vm8, %v2702_v11, -inf }
 0xa50   : > { %2707 = vmax.xlane.f32.xlu1 %v2706_v15 }
 0xa56   : > { %v2879_v16 = vpop.f32.mrb[22].mxu0 }
 0xa57   : > { %v4802_v17 = vpop.f32.mrb[23].mxu0  ;;  %v2883_v18 = vsel %vm2532_vm8, %v2879_v16, -inf }
 0xa58   : > { %2884 = vmax.xlane.f32.xlu0 %v2883_v18 }
 0xa61   : > { %5213 = vrot.lane.b32.xlu1 %v6375_v7, %s5732_s18 }
 0xa6b   : > { %v2535_v19 = vpop.xlane.xlu0 %2534 }
 0xa6c   : > { %v2536_v20 = vsub.f32 %v2528_v6, %v2535_v19 }
 0xa6e   : > { %v2537_v21 = vmul.f32 1.442695, %v2536_v20 }
 0xa70   : > { %5308 = vpow2.f32 %v2537_v21 }
 0xa7a   : > { %v5309_v22 = vpop.eup %5308 }
 0xa7b   : > { %v2539_v23 = vsel %vm2532_vm8, %v5309_v22, 0.0 }
 0xa7c   : > { %2540 = vadd.xlane.f32.xlu0 %v2539_v23 }
 0xadd   : > { %v2708_v24 = vpop.xlane.xlu1 %2707 }
 0xade   : > { %v2709_v25 = vsub.f32 %v2702_v11, %v2708_v24 }
 0xae0   : > { %v2710_v26 = vmul.f32 1.442695, %v2709_v25 }
 0xae1   : > { %v5214_v27 = vpop.permute.xlu1 %5213 }
 0xae2   : > { %5310 = vpow2.f32 %v2710_v26  ;;  %v5216_v28 = vunpack.i.h.bf16 %v5214_v27  ;;  %v5215_v29 = vunpack.i.l.bf16 %v5214_v27 }
 0xae4   : > { %v4958_v30 = vpack.c.bf16 %v5216_v28, %v5215_v29 }
 0xae5   : > { %v2885_v31 = vpop.xlane.xlu0 %2884 }
 0xae6   : > { %v2886_v32 = vsub.f32 %v2879_v16, %v2885_v31  ;;  %4959 = vmatpush3.bf16.msra.mxu1 %v4958_v30 }
 0xae7   : > { %4964 = vmatprep.subr.bf16.mxu1 %v5746_v12 }
 0xae8   : > { %v2887_v33 = vmul.f32 1.442695, %v2886_v32 }
 0xaea   : > { %5312 = vpow2.f32 %v2887_v33 }
 0xaec   : > { %v5311_v34 = vpop.eup %5310 }
 0xaed   : > { %v2712_v35 = vsel %vm2532_vm8, %v5311_v34, 0.0 }
 0xaee   : > { %2713 = vadd.xlane.f32.xlu1 %v2712_v35 }
 0xaf4   : > { %v5313_v37 = vpop.eup %5312 }
 0xaf5   : > { %v2889_v39 = vsel %vm2532_vm8, %v5313_v37, 0.0 }
 0xaf6   : > { %2890 = vadd.xlane.f32.xlu0 %v2889_v39 }
 0xaff   : > { %5223 = vrot.lane.b32.xlu1 %v6375_v7, %s5733_s17 }
 0xb03   : > { %5228 = vrot.lane.b32.xlu1 %v6375_v7, %s5737_s29 }
 0xb09   : > { %v2541_v40 = vpop.xlane.xlu0 %2540 }
 0xb0a   : > { %5314 = vrcp.f32 %v2541_v40 }
 0xb0c   : > { %5218 = vrot.lane.b32.xlu0 %v6375_v7, %s5734_s26 }
 0xb10   : > { %2978 = vrot.lane.b32.xlu0 %v6395_v56, %s5737_s29 }
 0xb14   : > { %v5315_v41 = vpop.eup %5314 }
 0xb15   : > { %v2543_v5 = vmul.f32 %v5315_v41, %v5309_v22 }
 0xb17   : > { %4780 = vmatmul.mubr.msk.f32.vlgmr.msra.gmra.mrb[24].mxu1 %vm2532_vm8, %v2543_v5 }
 0xb18   : > { %4793 = vmatprep.mubr.msk.f32.mxu1 %vm5730_vm1, %v5729_v8 }
 0xb7b   : > { %v2714_v42 = vpop.xlane.xlu1 %2713 }
 0xb7c   : > { %5316 = vrcp.f32 %v2714_v42 }
 0xb7f   : > { %v5224_v46 = vpop.permute.xlu1 %5223 }
 0xb80   : > { %v5226_v52 = vunpack.i.h.bf16 %v5224_v46  ;;  %v5225_v53 = vunpack.i.l.bf16 %v5224_v46 }
 0xb82   : > { %v4972_v57 = vpack.c.bf16 %v5226_v52, %v5225_v53 }
 0xb83   : > { %v2891_v44 = vpop.xlane.xlu0 %2890  ;;  %v5229_v58 = vpop.permute.xlu1 %5228 }
 0xb84   : > { %5318 = vrcp.f32 %v2891_v44  ;;  %v5231_v60 = vunpack.i.h.bf16 %v5229_v58  ;;  %v5230_v61 = vunpack.i.l.bf16 %v5229_v58 }
 0xb86   : > { %v5317_v51 = vpop.eup %5316  ;;  %v4975_v62 = vpack.c.bf16 %v5231_v60, %v5230_v61 }
 0xb87   : > { %v5219_v48 = vpop.permute.xlu0 %5218  ;;  %v2716_v55 = vmul.f32 %v5317_v51, %v5311_v34 }
 0xb88   : > { %v5221_v49 = vunpack.i.h.bf16 %v5219_v48  ;;  %v5220_v50 = vunpack.i.l.bf16 %v5219_v48 }
 0xb8a   : > { %v4965_v13 = vpack.c.bf16 %v5221_v49, %v5220_v50 }
 0xb8b   : > { %v2979_v63 = vpop.permute.xlu0 %2978 }
 0xb8c   : > { %4966 = vmatpush3.bf16.msra.mxu1 %v4965_v13 }
 0xb8d   : > { %4971 = vmatprep.subr.bf16.mxu1 %v5746_v12 }
 0xb8e   : > { %v5319_v56 = vpop.eup %5318 }
 0xb8f   : > { %4794 = vmatmul.mubr.msk.f32.vlgmr.msra.gmra.mrb[26].mxu1 %vm2532_vm8, %v2716_v55  ;;  %v2893_v59 = vmul.f32 %v5319_v56, %v5313_v37 }
 0xb90   : > { %4973 = vmatpush3.bf16.msra.mxu1 %v4972_v57  ;;  %4807 = vmatprep.mubr.msk.f32.mxu1 %vm5730_vm1, %v5729_v8 }
 0xb91   : > { %4974 = vmatprep.subr.bf16.mxu1 %v5746_v12 }
 0xb93   : > { %4808 = vmatmul.mubr.msk.f32.vlgmr.msra.gmra.mrb[28].mxu1 %vm2532_vm8, %v2893_v59 }
 0xb94   : > { %4814 = vmatprep.mubr.msk.f32.mxu1 %vm5730_vm1, %v5729_v8 }
 0xb99   : > { %4977 = vmatpush3.bf16.xpose.msk.msra.mxu1 %vm6371_vm7, %v4975_v62 }
 0xb9a   : > { %4985 = vmatprep.subr.bf16.mxu1 %v5746_v12 }
 0xba0   : > { %4815 = vmatmul.mubr.msk.f32.vlgmr.msra.gmra.mrb[30].mxu1 %vm770_vm2, %v2979_v63 }
 0xba1   : > { %4835 = vmatprep.mubr.msk.f32.mxu1 %vm5730_vm1, %v5729_v8 }
 0xbea   : > { %v2619_v0 = vpop.f32.mrb[24].mxu1 }
 0xbeb   : > { %2623 = vst.msk [vmem:[#allocation2] sm:$0xff] %vm770_vm2, %v2619_v0  ;;  %v4781_v6 = vpop.f32.mrb[25].mxu1 }
 0xc62   : > { %v6459_v9 = vpop.f32.mrb[26].mxu1 }
 0xc63   : > { %v4795_v10 = vpop.f32.mrb[27].mxu1 }
 0xc66   : > { %v6461_v11 = vpop.f32.mrb[28].mxu1 }
 0xc67   : > { %v4809_v14 = vpop.f32.mrb[29].mxu1 }
 0xc73   : > { %v3056_v15 = vpop.f32.mrb[30].mxu1 }
 0xc74   : > { %v4816_v16 = vpop.f32.mrb[31].mxu1  ;;  %v3060_v17 = vsel %vm2532_vm8, %v3056_v15, -inf }
 0xc75   : > { %3061 = vmax.xlane.f32.xlu1 %v3060_v17 }
 0xd02   : > { %v3062_v18 = vpop.xlane.xlu1 %3061 }
 0xd03   : > { %v3063_v19 = vsub.f32 %v3056_v15, %v3062_v18 }
 0xd05   : > { %v3064_v20 = vmul.f32 1.442695, %v3063_v19 }
 0xd07   : > { %5320 = vpow2.f32 %v3064_v20 }
 0xd11   : > { %v5321_v21 = vpop.eup %5320 }
 0xd12   : > { %v3066_v22 = vsel %vm2532_vm8, %v5321_v21, 0.0 }
 0xd13   : > { %3067 = vadd.xlane.f32.xlu0 %v3066_v22 }
 0xd29   : > { %5233 = vrot.lane.b32.xlu0 %v6375_v7, %s5735_s19 }
 0xd2d   : > { %5243 = vrot.lane.b32.xlu0 %v6420_v3, %s5731_s27 }
 0xd31   : > { %3325 = vrot.lane.b32.xlu0 %v6393_v54, %s5731_s27  ;;  %s5747_s27 = smov [#allocation20]  }
 0xda0   : > { %v3068_v23 = vpop.xlane.xlu0 %3067 }
 0xda1   : > { %5322 = vrcp.f32 %v3068_v23 }
 0xda4   : > { %v5234_v24 = vpop.permute.xlu0 %5233 }
 0xda5   : > { %v5236_v25 = vunpack.i.h.bf16 %v5234_v24  ;;  %v5235_v26 = vunpack.i.l.bf16 %v5234_v24 }
 0xda7   : > { %v4979_v27 = vpack.c.bf16 %v5236_v25, %v5235_v26 }
 0xda8   : > { %v5244_v42 = vpop.permute.xlu0 %5243 }
 0xda9   : > { %4980 = vmatpush3.bf16.msra.mxu0 %v4979_v27  ;;  %v5246_v46 = vunpack.i.h.bf16 %v5244_v42  ;;  %v5245_v48 = vunpack.i.l.bf16 %v5244_v42 }
 0xdaa   : > { %4981 = vmatprep.subr.bf16.mxu0 %v5746_v12 }
 0xdab   : > { %v5323_v28 = vpop.eup %5322  ;;  %v4989_v50 = vpack.c.bf16 %v5246_v46, %v5245_v48 }
 0xdac   : > { %v3070_v29 = vmul.f32 %v5323_v28, %v5321_v21  ;;  %v3326_v51 = vpop.permute.xlu0 %3325 }
 0xdae   : > { %4822 = vmatmul.mubr.msk.f32.vlgmr.msra.gmra.mrb[24].mxu0 %vm2532_vm8, %v3070_v29 }
 0xdaf   : > { %4828 = vmatprep.mubr.msk.f32.mxu0 %vm5730_vm1, %v5729_v8 }
 0xdb2   : > { %4984 = vmatpush3.bf16.xpose.msk.msra.mxu0 %vm6371_vm7, %v4982_v4 }
 0xdb3   : > { %4992 = vmatprep.subr.bf16.mxu0 %v5746_v12 }
 0xdb9   : > { %4829 = vmatmul.mubr.msk.f32.vlgmr.msra.gmra.mrb[26].mxu0 %vm770_vm2, %v6393_v54 }
 0xdba   : > { %4849 = vmatprep.mubr.msk.f32.mxu0 %vm5730_vm1, %v5729_v8 }
 0xe81   : > { %v6485_v7 = vpop.f32.mrb[24].mxu0 }
 0xe82   : > { %v4823_v30 = vpop.f32.mrb[25].mxu0 }
 0xe8c   : > { %v3230_v31 = vpop.f32.mrb[26].mxu0 }
 0xe8d   : > { %v4830_v32 = vpop.f32.mrb[27].mxu0  ;;  %v3234_v33 = vsel %vm2532_vm8, %v3230_v31, -inf }
 0xe8e   : > { %3235 = vmax.xlane.f32.xlu1 %v3234_v33 }
 0xf1b   : > { %v3236_v1 = vpop.xlane.xlu1 %3235 }
 0xf1c   : > { %v3237_v2 = vsub.f32 %v3230_v31, %v3236_v1 }
 0xf1e   : > { %v3238_v34 = vmul.f32 1.442695, %v3237_v2 }
 0xf20   : > { %5324 = vpow2.f32 %v3238_v34 }
 0xf2a   : > { %v5325_v4 = vpop.eup %5324 }
 0xf2b   : > { %v3240_v35 = vsel %vm2532_vm8, %v5325_v4, 0.0 }
 0xf2c   : > { %3241 = vadd.xlane.f32.xlu1 %v3240_v35 }
 0xf3d   : > { %5238 = vrot.lane.b32.xlu1 %v6420_v3, %s5732_s18  ;;  %s6732_s18 = sld [smem:[#allocation38_spill]] }
 0xfb9   : > { %v3242_v37 = vpop.xlane.xlu1 %3241 }
 0xfba   : > { %5326 = vrcp.f32 %v3242_v37 }
 0xfbd   : > { %v5239_v39 = vpop.permute.xlu1 %5238 }
 0xfbe   : > { %v5241_v40 = vunpack.i.h.bf16 %v5239_v39  ;;  %v5240_v41 = vunpack.i.l.bf16 %v5239_v39 }
 0xfc0   : > { %v4986_v5 = vpack.c.bf16 %v5241_v40, %v5240_v41 }
 0xfc2   : > { %4987 = vmatpush3.bf16.msra.mxu1 %v4986_v5 }
 0xfc3   : > { %4988 = vmatprep.subr.bf16.mxu1 %v5746_v12 }
 0xfc4   : > { %v5327_v44 = vpop.eup %5326 }
 0xfc5   : > { %v3244_v49 = vmul.f32 %v5327_v44, %v5325_v4 }
 0xfc7   : > { %4836 = vmatmul.mubr.msk.f32.vlgmr.msra.gmra.mrb[32].mxu1 %vm2532_vm8, %v3244_v49 }
 0xfc8   : > { %4842 = vmatprep.mubr.msk.f32.mxu1 %vm5730_vm1, %v5729_v8 }
 0xfcb   : > { %4991 = vmatpush3.bf16.xpose.msk.msra.mxu1 %vm6371_vm7, %v4989_v50 }
 0xfcc   : > { %4999 = vmatprep.subr.bf16.mxu1 %v5746_v12 }
 0xfd2   : > { %4843 = vmatmul.mubr.msk.f32.vlgmr.msra.gmra.mrb[34].mxu1 %vm770_vm2, %v3326_v51 }
 0xfd3   : > { %4863 = vmatprep.mubr.msk.f32.mxu1 %vm5730_vm1, %v5729_v8 }
0x109a   : > { %v3320_v52 = vpop.f32.mrb[32].mxu1 }
0x109b   : > { %3324 = vst.msk [vmem:[#allocation2 + $0x8] sm:$0xff] %vm770_vm2, %v3320_v52  ;;  %v4837_v53 = vpop.f32.mrb[33].mxu1 }
0x10a5   : > { %v3403_v13 = vpop.f32.mrb[34].mxu1 }
0x10a6   : > { %v4844_v55 = vpop.f32.mrb[35].mxu1  ;;  %v3407_v56 = vsel %vm2532_vm8, %v3403_v13, -inf }
0x10a7   : > { %3408 = vmax.xlane.f32.xlu1 %v3407_v56 }
0x10b8   : > { %5253 = vrot.lane.b32.xlu1 %v6420_v3, %s5736_s1 }
0x10bc   : > { %3502 = vrot.lane.b32.xlu1 %v6393_v54, %s5736_s1 }
0x1134   : > { %v3409_v57 = vpop.xlane.xlu1 %3408 }
0x1135   : > { %v3410_v58 = vsub.f32 %v3403_v13, %v3409_v57 }
0x1137   : > { %v3411_v59 = vmul.f32 1.442695, %v3410_v58 }
0x1138   : > { %v5254_v14 = vpop.permute.xlu1 %5253 }
0x1139   : > { %5328 = vpow2.f32 %v3411_v59  ;;  %v5256_v16 = vunpack.i.h.bf16 %v5254_v14  ;;  %v5255_v17 = vunpack.i.l.bf16 %v5254_v14  ;;  %v2449_v59 = vld [vmem:[#allocation15] sm:$0xff] }
0x113b   : > { %v4996_v19 = vpack.c.bf16 %v5256_v16, %v5255_v17  ;;  %v3860_v16 = vsub.s32 3, %v6328_v45 }
0x113c   : > { %v3503_v20 = vpop.permute.xlu1 %3502 }
0x113d   : > { %v3861_v17 = vrot.slane %v6334_v47, %v3860_v16  ;;  %v4087_v16 = vsub.s32 6, %v6328_v45 }
0x1143   : > { %v5329_v60 = vpop.eup %5328 }
0x1144   : > { %v3413_v61 = vsel %vm2532_vm8, %v5329_v60, 0.0 }
0x1145   : > { %3414 = vadd.xlane.f32.xlu0 %v3413_v61 }
0x115b   : > { %5248 = vrot.lane.b32.xlu0 %v6420_v3, %s5734_s26  ;;  %s6734_s26 = sld [smem:[#allocation29_spill]] }
0x11d2   : > { %v3415_v62 = vpop.xlane.xlu0 %3414 }
0x11d3   : > { %5330 = vrcp.f32 %v3415_v62  ;;  %v2451_v62 = vld [vmem:[#allocation15 + $0x10] sm:$0xff] }
0x11d6   : > { %v5249_v63 = vpop.permute.xlu0 %5248 }
0x11d7   : > { %v5251_v0 = vunpack.i.h.bf16 %v5249_v63  ;;  %v5250_v6 = vunpack.i.l.bf16 %v5249_v63  ;;  %v2452_v63 = vld [vmem:[#allocation15 + $0x18] sm:$0xff] }
0x11d9   : > { %v4993_v10 = vpack.c.bf16 %v5251_v0, %v5250_v6  ;;  %v5013_v0 = vpack.c.bf16 %v2452_v63, %v2451_v62  ;;  %v4500_v63 = vld [vmem:[#allocation18] ss:$0 sm:$0xff] }
0x11db   : > { %4994 = vmatpush3.bf16.msra.mxu0 %v4993_v10 }
0x11dc   : > { %4995 = vmatprep.subr.bf16.mxu0 %v5746_v12 }
0x11dd   : > { %v5331_v15 = vpop.eup %5330 }
0x11de   : > { %v3417_v18 = vmul.f32 %v5331_v15, %v5329_v60  ;;  %v2450_v60 = vld [vmem:[#allocation15 + $0x8] sm:$0xff] }
0x11df   : > { %v5009_v61 = vpack.c.bf16 %v2450_v60, %v2449_v59 }
0x11e0   : > { %4850 = vmatmul.mubr.msk.f32.vlgmr.msra.gmra.mrb[28].mxu0 %vm2532_vm8, %v3417_v18 }
0x11e1   : > { %4856 = vmatprep.mubr.msk.f32.mxu0 %vm5730_vm1, %v5729_v8 }
0x11e4   : > { %4998 = vmatpush3.bf16.xpose.msk.msra.mxu0 %vm6371_vm7, %v4996_v19 }
0x11e5   : > { %5006 = vmatprep.subr.bf16.mxu0 %v5746_v12 }
0x11eb   : > { %4857 = vmatmul.mubr.msk.f32.vlgmr.msra.gmra.mrb[30].mxu0 %vm770_vm2, %v3503_v20 }
0x11ec   : > { %4877 = vmatprep.mubr.msk.f32.mxu0 %vm5730_vm1, %v5729_v8 }
0x12b3   : > { %v3493_v21 = vpop.f32.mrb[28].mxu0 }
0x12b4   : > { %v4851_v22 = vpop.f32.mrb[29].mxu0 }
0x12be   : > { %v3580_v23 = vpop.f32.mrb[30].mxu0 }
0x12bf   : > { %v4858_v24 = vpop.f32.mrb[31].mxu0  ;;  %v3584_v25 = vsel %vm2532_vm8, %v3580_v23, -inf }
0x12c0   : > { %3585 = vmax.xlane.f32.xlu0 %v3584_v25 }
0x12d6   : > { %5258 = vrot.lane.b32.xlu0 %v6420_v3, %s5733_s17  ;;  %s6733_s17 = smov %s6732_s18 }
0x12d7   : > { %v4084_v62 = vld [vmem:[%s6733_s17 + $0x38] sm:$0xff] }
0x12da   : > { %3679 = vrot.lane.b32.xlu0 %v6393_v54, %s5737_s29 }
0x134d   : > { %v3586_v26 = vpop.xlane.xlu0 %3585 }
0x134e   : > { %v3587_v27 = vsub.f32 %v3580_v23, %v3586_v26 }
0x1350   : > { %v3588_v28 = vmul.f32 1.442695, %v3587_v27 }
0x1351   : > { %v5259_v29 = vpop.permute.xlu0 %5258 }
0x1352   : > { %5332 = vpow2.f32 %v3588_v28  ;;  %v5261_v30 = vunpack.i.h.bf16 %v5259_v29  ;;  %v5260_v31 = vunpack.i.l.bf16 %v5259_v29 }
0x1354   : > { %v5000_v32 = vpack.c.bf16 %v5261_v30, %v5260_v31 }
0x1356   : > { %5001 = vmatpush3.bf16.msra.mxu1 %v5000_v32 }
0x1357   : > { %5002 = vmatprep.subr.bf16.mxu1 %v5746_v12  ;;  %v3680_v12 = vpop.permute.xlu0 %3679 }
0x135c   : > { %v5333_v33 = vpop.eup %5332 }
0x135d   : > { %v3590_v1 = vsel %vm2532_vm8, %v5333_v33, 0.0 }
0x135e   : > { %3591 = vadd.xlane.f32.xlu1 %v3590_v1  ;;  %v3983_v1 = vld [vmem:[#allocation17] sm:$0xff] }
0x136f   : > { %5263 = vrot.lane.b32.xlu1 %v6420_v3, %s5737_s29 }
0x13eb   : > { %v3592_v2 = vpop.xlane.xlu1 %3591 }
0x13ec   : > { %5334 = vrcp.f32 %v3592_v2  ;;  %v3984_v2 = vld [vmem:[#allocation17 + $0x8] sm:$0xff] }
0x13ef   : > { %v5264_v54 = vpop.permute.xlu1 %5263 }
0x13f0   : > { %v5266_v34 = vunpack.i.h.bf16 %v5264_v54  ;;  %v5265_v4 = vunpack.i.l.bf16 %v5264_v54  ;;  %v5017_v54 = vpack.c.bf16 %v3984_v2, %v3983_v1 }
0x13f2   : > { %v5003_v39 = vpack.c.bf16 %v5266_v34, %v5265_v4  ;;  %v3985_v34 = vld [vmem:[#allocation17 + $0x10] sm:$0xff]  ;;  %v3986_v4 = vld [vmem:[#allocation17 + $0x18] sm:$0xff] }
0x13f6   : > { %v5335_v35 = vpop.eup %5334 }
0x13f7   : > { %v3594_v37 = vmul.f32 %v5335_v35, %v5333_v33  ;;  %v5021_v35 = vpack.c.bf16 %v3986_v4, %v3985_v34 }
0x13f9   : > { %4864 = vmatmul.mubr.msk.f32.vlgmr.msra.gmra.mrb[36].mxu1 %vm2532_vm8, %v3594_v37  ;;  %v4077_v37 = vld [vmem:[%s6732_s18] sm:$0xff]  ;;  %s5633_s18 = sshll.u32 %s5747_s27, 4  ;;  %s5634_s18 = int_to_ptr.vmem [resolvable:$false] %s5633_s18 }
0x13fa   : > { %5005 = vmatpush3.bf16.xpose.msk.msra.mxu1 %vm6371_vm7, %v5003_v39  ;;  %4870 = vmatprep.mubr.msk.f32.mxu1 %vm5730_vm1, %v5729_v8  ;;  %v4078_v39 = vld [vmem:[%s6733_s17 + $0x8] sm:$0xff] }
0x13fb   : > { %5018 = vmatprep.subr.bf16.mxu1 %v5017_v54 }
0x1401   : > { %4871 = vmatmul.mubr.msk.f32.vlgmr.msra.gmra.mrb[38].mxu1 %vm770_vm2, %v3680_v12  ;;  %v4079_v12 = vld [vmem:[%s6733_s17 + $0x10] sm:$0xff] }
0x1402   : > { %5020 = vmatpush3.bf16.msra.mxu1 %v5017_v54 }
0x1403   : > { %5022 = vmatprep.subr.bf16.mxu1 %v5021_v35 }
0x1406   : > { %5024 = vmatpush3.bf16.msra.mxu1 %v5021_v35 }
0x14cc   : > { %v3670_v40 = vpop.f32.mrb[36].mxu1 }
0x14cd   : > { %v4865_v41 = vpop.f32.mrb[37].mxu1 }
0x14ce   : > { %v4080_v41 = vld [vmem:[%s6733_s17 + $0x18] sm:$0xff] }
0x14d4   : > { %v3757_v5 = vpop.f32.mrb[38].mxu1 }
0x14d5   : > { %v4872_v42 = vpop.f32.mrb[39].mxu1  ;;  %v3761_v44 = vsel %vm2532_vm8, %v3757_v5, -inf }
0x14d6   : > { %3762 = vmax.xlane.f32.xlu1 %v3761_v44  ;;  %v4081_v42 = vld [vmem:[%s6733_s17 + $0x20] sm:$0xff]  ;;  %v4082_v44 = vld [vmem:[%s6733_s17 + $0x28] sm:$0xff] }
0x14e7   : > { %2797 = vrot.lane.b32.xlu1 %v6459_v9, %s5743_s30 }
0x14eb   : > { %2974 = vrot.lane.b32.xlu1 %v6461_v11, %s5744_s23 }
0x14ef   : > { %3151 = vrot.lane.b32.xlu1 %v6485_v7, %s5745_s13 }
0x1563   : > { %v3763_v8 = vpop.xlane.xlu1 %3762 }
0x1564   : > { %v3764_v43 = vsub.f32 %v3757_v5, %v3763_v8  ;;  %v5029_v5 = vpack.c.bf16 %v4080_v41, %v4079_v12  ;;  %v5033_v8 = vpack.c.bf16 %v4082_v44, %v4081_v42  ;;  %v4505_v42 = vld [vmem:[%s6682_s14 + $0x8] ss:$0 sm:$0xff] }
0x1566   : > { %v3765_v46 = vmul.f32 1.442695, %v3764_v43 }
0x1567   : > { %v2798_v48 = vpop.permute.xlu1 %2797 }
0x1568   : > { %5336 = vpow2.f32 %v3765_v46  ;;  %2800 = vst.msk [vmem:[#allocation2] sm:$0xff] %vm1102_vm4, %v2798_v48 }
0x156b   : > { %v2975_v49 = vpop.permute.xlu1 %2974 }
0x156c   : > { %2977 = vst.msk [vmem:[#allocation2] sm:$0xff] %vm1273_vm5, %v2975_v49 }
0x156f   : > { %v3152_v50 = vpop.permute.xlu1 %3151 }
0x1570   : > { %3154 = vst.msk [vmem:[#allocation2] sm:$0xff] %vm1444_vm6, %v3152_v50 }
0x1572   : > { %v5337_v9 = vpop.eup %5336 }
0x1573   : > { %v3767_v51 = vsel %vm2532_vm8, %v5337_v9, 0.0 }
0x1574   : > { %3768 = vadd.xlane.f32.xlu0 %v3767_v51  ;;  %v3971_v51 = vsub.s32 4, %v6328_v45 }
0x158a   : > { %5268 = vrot.lane.b32.xlu0 %v6420_v3, %s5735_s19  ;;  %v3856_v3 = vld [vmem:[#allocation2] sm:$0xff]  ;;  %s642_s19 = sand.u32 1, %s6734_s26   ;;  %s5635_s26 = scalar_lea.vmem %s5634_s18, 512 }
0x158b   : > { %s4423_s1 = sshll.u32 %s642_s19, 4  ;;  %s6626_s22 = scalar_lea.sflag [#allocation5], %s642_s19 }
0x158c   : > { %s644_s3 = scalar_lea.vmem [#allocation20], %s4423_s1 }
0x158d   : > { %s4227_s16 = sshll.u32 %s644_s3, 4  ;;  %s6622_s16 = int_to_ptr.vmem [resolvable:$true] %s4227_s16 }
0x158e   : > { %3498 = vrot.lane.b32.xlu0 %v3493_v21, %s5743_s30  ;;  %s5629_s15 = scalar_lea.vmem %s6622_s16, 256  ;;  %p5636_p3 = scmp.lt.s32.totalorder %s6622_s16, %s5634_s18 }
0x158f   : > { %p5630_p5 = scmp.ne.s32.totalorder %s6622_s16, %s5629_s15  ;;  %p5637_p4 = scmp.lt.s32.totalorder %s5635_s26, %s5629_s15 }
0x1591   : > { %p5638_p12 = por %p5637_p4, %p5636_p3 }
0x1592   : > { %3675 = vrot.lane.b32.xlu0 %v3670_v40, %s5744_s23  ;;  %v5025_v40 = vpack.c.bf16 %v4078_v39, %v4077_v37  ;;  %v4199_v39 = vsub.s32 7, %v6328_v45 }
0x1601   : > { %v3769_v11 = vpop.xlane.xlu0 %3768 }
0x1602   : > { %5338 = vrcp.f32 %v3769_v11  ;;  %v3977_v11 = vsub.s32 5, %v6328_v45 }
0x1605   : > { %v5269_v7 = vpop.permute.xlu0 %5268 }
0x1606   : > { %v5271_v52 = vunpack.i.h.bf16 %v5269_v7  ;;  %v5270_v53 = vunpack.i.l.bf16 %v5269_v7  ;;  %v3972_v7 = vrot.slane %v6334_v47, %v3971_v51 }
0x1608   : > { %v5007_v13 = vpack.c.bf16 %v5271_v52, %v5270_v53 }
0x1609   : > { %v3499_v55 = vpop.permute.xlu0 %3498 }
0x160a   : > { %3501 = vst.msk [vmem:[#allocation2 + $0x8] sm:$0xff] %vm1102_vm4, %v3499_v55  ;;  %5008 = vmatpush3.bf16.msra.mxu0 %v5007_v13  ;;  %v3978_v13 = vrot.slane %v6334_v47, %v3977_v11  ;;  %v4083_v47 = vld [vmem:[%s6733_s17 + $0x30] sm:$0xff] }
0x160b   : > { %5010 = vmatprep.subr.bf16.mxu0 %v5009_v61 }
0x160c   : > { %v5339_v56 = vpop.eup %5338 }
0x160d   : > { %v3771_v57 = vmul.f32 %v5339_v56, %v5337_v9  ;;  %v3676_v58 = vpop.permute.xlu0 %3675 }
0x160e   : > { %3678 = vst.msk [vmem:[#allocation2 + $0x8] sm:$0xff] %vm1273_vm5, %v3676_v58 }
0x160f   : > { %4878 = vmatmul.mubr.msk.f32.vlgmr.msra.gmra.mrb[32].mxu0 %vm2532_vm8, %v3771_v57 }
0x1610   : > { %4888 = vmatprep.mubr.msk.f32.mxu0 %vm681_vm0, %v3856_v3  ;;  %5012 = vmatpush3.bf16.msra.mxu0 %v5009_v61 }
0x1611   : > { %5014 = vmatprep.subr.bf16.mxu0 %v5013_v0 }
0x1614   : > { %5016 = vmatpush3.bf16.msra.mxu0 %v5013_v0 }
0x1615   : > { %5026 = vmatprep.subr.bf16.mxu0 %v5025_v40 }
0x16e2   : > { %v3847_v6 = vpop.f32.mrb[32].mxu0 }
0x16e3   : > { %3852 = vrot.lane.b32.xlu1 %v3847_v6, %s5745_s13  ;;  %v4879_v10 = vpop.f32.mrb[33].mxu0  ;;  %s6735_s13 = sld [smem:[#allocation34_spill]] }
0x16e9   : > { %p6737_p10 = scmp.ne.s32.totalorder %s6735_s13, 0 }
0x16eb   : > { %p5631_p0 = pnand %p5630_p5, %p6737_p10 }
0x16ed   : > { %p5632_p2 = pneg %p5631_p0 }
0x16ef   : > { %p5639_p7 = pnand %p5638_p12, %p5632_p2 }
0x1755   : > { %v3853_v14 = vpop.permute.xlu1 %3852 }
0x1756   : > { %3855 = vst.msk [vmem:[#allocation2 + $0x8] sm:$0xff] %vm1444_vm6, %v3853_v14 }
0x175d   : > { %v3857_v15 = vld [vmem:[#allocation2 + $0x8] sm:$0xff] }
0x175e   : > { %4889 = vmatmul.mubr.msk.f32.vlgmr.msra.gmra.mrb[34].mxu0 %vm681_vm0, %v3857_v15 }
0x175f   : > { %5028 = vmatpush3.bf16.msra.mxu0 %v5025_v40 }
0x1760   : > { %5030 = vmatprep.subr.bf16.mxu0 %v5029_v5 }
0x1763   : > { %5032 = vmatpush3.bf16.msra.mxu0 %v5029_v5 }
0x1764   : > { %5034 = vmatprep.subr.bf16.mxu0 %v5033_v8 }
0x1767   : > { %5036 = vmatpush3.bf16.msra.mxu0 %v5033_v8 }
0x1831   : > { %v4890_v18 = vpop.f32.mrb[34].mxu0 }
0x1832   : > { %v3940_v19 = vadd.f32 %v4890_v18, %v3861_v17  ;;  %v3934_v20 = vpop.f32.mrb[35].mxu0 }
0x1833   : > { %v3935_v21 = vadd.f32 %v3934_v20, %v3861_v17  ;;  %v5348_v17 = vld [vmem:[%s6682_s14] sm:$0xff] }
0x1834   : > { %v3946_v22 = vsel %vm681_vm0, %v3940_v19, 0.0  ;;  %v4088_v18 = vrot.slane %v5348_v17, %v4087_v16  ;;  %v4200_v12 = vrot.slane %v5348_v17, %v4199_v39 }
0x1835   : > { %3947 = vadd.xlane.f32.xlu1 %v3946_v22  ;;  %v3943_v23 = vsel %vm681_vm0, %v3935_v21, 0.0 }
0x1836   : > { %3944 = vadd.xlane.f32.xlu0 %v3943_v23 }
0x18c2   : > { %v3948_v24 = vpop.xlane.xlu1 %3947 }
0x18c3   : > { %v3950_v25 = vmul.f32 0.03125, %v3948_v24  ;;  %v3945_v26 = vpop.xlane.xlu0 %3944 }
0x18c4   : > { %v3949_v27 = vmul.f32 0.03125, %v3945_v26 }
0x18c5   : > { %v3952_v28 = vsub.f32 %v3940_v19, %v3950_v25 }
0x18c6   : > { %v3951_v29 = vsub.f32 %v3935_v21, %v3949_v27 }
0x18c7   : > { %v3954_v32 = vmul.f32 %v3952_v28, %v3952_v28 }
0x18c8   : > { %v3953_v30 = vmul.f32 %v3951_v29, %v3951_v29 }
0x18c9   : > { %v3958_v33 = vsel %vm681_vm0, %v3954_v32, 0.0 }
0x18ca   : > { %v3955_v31 = vsel %vm681_vm0, %v3953_v30, 0.0 }
0x18cb   : > { %3956 = vadd.xlane.f32.xlu0 %v3955_v31 }
0x18cf   : > { %3959 = vadd.xlane.f32.xlu0 %v3958_v33 }
0x1958   : > { %v3957_v43 = vpop.xlane.xlu0 %3956 }
0x1959   : > { %v3961_v46 = vmul.f32 0.03125, %v3957_v43 }
0x195b   : > { %v3963_v48 = vadd.f32 1e-05, %v3961_v46 }
0x195c   : > { %v3960_v49 = vpop.xlane.xlu0 %3959 }
0x195d   : > { %5340 = vrsqrt.f32 %v3963_v48  ;;  %v3962_v50 = vmul.f32 0.03125, %v3960_v49 }
0x195f   : > { %v3964_v9 = vadd.f32 1e-05, %v3962_v50 }
0x1961   : > { %5342 = vrsqrt.f32 %v3964_v9 }
0x1967   : > { %v5341_v52 = vpop.eup %5340 }
0x1968   : > { %v3967_v53 = vmul.f32 %v5341_v52, %v3951_v29 }
0x196a   : > { %v3973_v55 = vmul.f32 %v3972_v7, %v3967_v53 }
0x196b   : > { %v5343_v56 = vpop.eup %5342 }
0x196c   : > { %v3968_v57 = vmul.f32 %v5343_v56, %v3952_v28  ;;  %v3979_v58 = vadd.f32 %v3978_v13, %v3973_v55 }
0x196e   : > { %v3974_v3 = vmul.f32 %v3972_v7, %v3968_v57  ;;  %v6586_v59 = vadd.f32 %v3979_v58, %v6358_v36  ;;  %v5037_v36 = vpack.c.bf16 %v4084_v62, %v4083_v47 }
0x1970   : > { %v3980_v60 = vadd.f32 %v3978_v13, %v3974_v3  ;;  %4899 = vmatprep.mubr.msk.f32.mxu1 %vm681_vm0, %v6586_v59  ;;  %5038 = vmatprep.subr.bf16.mxu0 %v5037_v36 }
0x1971   : > { %5040 = vmatpush3.bf16.msra.mxu0 %v5037_v36 }
0x1972   : > { %v6591_v61 = vadd.f32 %v3980_v60, %v6363_v38 }
0x1974   : > { %4900 = vmatmul.mubr.msk.f32.vlgmr.msra.gmra.mrb[40].mxu1 %vm681_vm0, %v6591_v61 }
0x1a47   : > { %v4901_v0 = vpop.f32.mrb[40].mxu1 }
0x1a48   : > { %v4072_v6 = vadd.f32 %v4901_v0, %v4500_v63  ;;  %v4066_v10 = vpop.f32.mrb[41].mxu1 }
0x1a49   : > { %v4067_v38 = vadd.f32 %v4500_v63, %v4066_v10 }
0x1a4a   : > { %v4076_v15 = vmax.f32 %v4072_v6, 0.0 }
0x1a4b   : > { %v4075_v14 = vmax.f32 %v4067_v38, 0.0 }
0x1a4d   : > { %4918 = vmatprep.mubr.msk.f32.mxu0 %vm4089_vm9, %v4075_v14 }
0x1a4e   : > { %4919 = vmatmul.mubr.msk.f32.vlgmr.msra.gmra.mrb[36].mxu0 %vm4089_vm9, %v4076_v15 }
0x1b21   : > { %v4920_v19 = vpop.f32.mrb[36].mxu0 }
0x1b22   : > { %v4168_v20 = vadd.f32 %v4920_v19, %v4088_v18  ;;  %v4162_v21 = vpop.f32.mrb[37].mxu0 }
0x1b23   : > { %v4163_v22 = vadd.f32 %v4162_v21, %v4088_v18 }
0x1b24   : > { %v4174_v23 = vsel %vm681_vm0, %v4168_v20, 0.0 }
0x1b25   : > { %4175 = vadd.xlane.f32.xlu0 %v4174_v23  ;;  %v4171_v24 = vsel %vm681_vm0, %v4163_v22, 0.0 }
0x1b26   : > { %4172 = vadd.xlane.f32.xlu1 %v4171_v24 }
0x1bb2   : > { %v4176_v25 = vpop.xlane.xlu0 %4175 }
0x1bb3   : > { %v4178_v26 = vmul.f32 0.03125, %v4176_v25  ;;  %v4173_v27 = vpop.xlane.xlu1 %4172 }
0x1bb4   : > { %v4177_v28 = vmul.f32 0.03125, %v4173_v27 }
0x1bb5   : > { %v4180_v29 = vsub.f32 %v4168_v20, %v4178_v26 }
0x1bb6   : > { %v4179_v30 = vsub.f32 %v4163_v22, %v4177_v28 }
0x1bb7   : > { %v4182_v31 = vmul.f32 %v4180_v29, %v4180_v29 }
0x1bb8   : > { %v4181_v32 = vmul.f32 %v4179_v30, %v4179_v30 }
0x1bb9   : > { %v4186_v33 = vsel %vm681_vm0, %v4182_v31, 0.0 }
0x1bba   : > { %4187 = vadd.xlane.f32.xlu0 %v4186_v33  ;;  %v4183_v1 = vsel %vm681_vm0, %v4181_v32, 0.0 }
0x1bbb   : > { %4184 = vadd.xlane.f32.xlu1 %v4183_v1 }
0x1c47   : > { %v4188_v2 = vpop.xlane.xlu0 %4187 }
0x1c48   : > { %v4190_v54 = vmul.f32 0.03125, %v4188_v2  ;;  %v4185_v34 = vpop.xlane.xlu1 %4184 }
0x1c49   : > { %v4189_v4 = vmul.f32 0.03125, %v4185_v34 }
0x1c4a   : > { %v4192_v35 = vadd.f32 1e-05, %v4190_v54 }
0x1c4b   : > { %v4191_v37 = vadd.f32 1e-05, %v4189_v4 }
0x1c4c   : > { %5344 = vrsqrt.f32 %v4192_v35 }
0x1c4d   : > { %5346 = vrsqrt.f32 %v4191_v37 }
0x1c56   : > { %v5345_v40 = vpop.eup %5344 }
0x1c57   : > { %v5347_v41 = vpop.eup %5346  ;;  %v4196_v5 = vmul.f32 %v5345_v40, %v4180_v29 }
0x1c58   : > { %v4195_v44 = vmul.f32 %v5347_v41, %v4179_v30 }
0x1c59   : > { %v4202_v8 = vmul.f32 %v4200_v12, %v4196_v5 }
0x1c5a   : > { %v4201_v43 = vmul.f32 %v4200_v12, %v4195_v44 }
0x1c5b   : > { %v4208_v46 = vadd.f32 %v4505_v42, %v4202_v8 }
0x1c5c   : > { %v4207_v48 = vadd.f32 %v4505_v42, %v4201_v43 }
0x1c5d   : > { %v4210_v45 = vadd.f32 %v4208_v46, %v6591_v61 }
0x1c5e   : > { %v4209_v49 = vadd.f32 %v4207_v48, %v6586_v59 }
0x1c5f   : > { %4212 = vst.msk [vmem:[%s644_s3 + $0x8] sm:$0xff] %vm681_vm0, %v4210_v45 }
0x1c60   : > { %4211 = vst.msk [vmem:[%s644_s3] sm:$0xff] %vm681_vm0, %v4209_v49 }
0x1c61   : > { %5642 = shalt.err (!%p5639_p7)
}
0x1c62   : > { %s5643_s19 = scalar_lea.hbm %s6619_s28, 256  ;;  %s5647_s23 = scalar_lea.hbm %s6736_s25, 512 }
0x1c63   : > { %p5644_p8 = scmp.ne.s32.totalorder %s6619_s28, %s5643_s19  ;;  %p5648_p1 = scmp.lt.u32.totalorder %s6619_s28, %s6736_s25 }
0x1c64   : > { %p5649_p6 = scmp.lt.u32.totalorder %s5647_s23, %s5643_s19  ;;  %p5651_p5 = scmp.lt.u32.totalorder %s5643_s19, %s6619_s28 }
0x1c65   : > { %p5645_p11 = pnand %p5644_p8, %p6737_p10 }
0x1c66   : > { %p5650_p9 = por %p5649_p6, %p5648_p1 }
0x1c67   : > { %p5646_p13 = pneg %p5645_p11 }
0x1c68   : > { %p5652_p0 = por %p5651_p5, %p5650_p9 }
0x1c6a   : > { %p5653_p2 = pnand %p5652_p0, %p5646_p13 }
0x1c6c   : > { %5656 = shalt.err (!%p5653_p2)
}
0x1c6d   : > { %s5748_s21 = smov 128  }
0x1c6e   : > { %5081 = dma.vmem_to_hbm [thread:$0]  (%p6737_p10), %s6622_s16, 256, %s6619_s28, %s6626_s22, %s5748_s21, %s5748_s21, %s5743_s30  }
0x1c6f PF: > { %s6738_s24 = sld [smem:[#allocation31_spill]]  ;;  %s6739_s15 = sld [smem:[#allocation28_spill]] }
0x1c70   : > { %s6740_s27 = sld [smem:[#allocation35_spill]] }
0x1c75   : > { %p5138_p3 = scmp.ge.s32.totalorder %s6738_s24, 2  ;;  %s4242_s18 = sand.u32 1, %s6739_s15  }
0x1c76   : > { %p6741_p4 = scmp.ne.s32.totalorder %s6740_s27, 0  ;;  %s4243_s26 = scalar_lea.sflag [#allocation5], %s4242_s18 }
0x1c78   : > { %p5115_p12 = pnand %p5138_p3, %p6741_p4 }
0x1c7a   : > { %5698 = dma.done.wait (!%p5115_p12), %s4243_s26, 256  }
0x1c7b   : > { %5700 = vsyncadd (!%p5115_p12), %s4243_s26, 4294967040  ;;  %s6742_s21 = sld [smem:[#allocation32_spill]]  ;;  %s6743_s18 = sld [smem:[#allocation29_spill]] }
0x1c7c   : > { %s6744_s19 = sld [smem:[#allocation30_spill]]  ;;  %s6745_s20 = sld [smem:[#allocation33_spill]] }
0x1c81   : > { %p31_p7 = scmp.ge.s32.totalorder %s6742_s21, 4  }
0x1c83   :  { %33 = sbr.rel (!%p31_p7) target bundleno = 14 (0xe), region = 159 }
0x1c8a   :  { %4248 = vsyncpa [#allocation4], 1 }
0x1c8b   :  { %4250 = vsyncpa [#allocation4 + $0x1], 1 }
0x1c8c   :  { %4251 = vsyncpa [#allocation7], 1 }
0x1c8d   :  { %4252 = vsyncpa [#allocation10], 1 }
0x1c8e   :  { %4253 = vsyncpa [#allocation13], 1 }
0x1c8f   :  { %4254 = vsyncpa [#allocation16], 1 }
0x1c90   :  { %4255 = vsyncpa [#allocation19], 1 }
0x1c91   :  { %4256 = vsyncpa [#allocation5], 1 }
0x1c92   :  { %4258 = vsyncpa [#allocation5 + $0x1], 1 }

</bundles_post_ra>
